<compile_context>
chip_gen: v7x
topology: tpu7x:2x2x1
jax: 0.10.0
libtpu: 0.0.40
codegen_flags: <defaults>
</compile_context>

<pallas_src>
import functools

import jax
import jax.numpy as jnp
from jax import lax
from jax.experimental import pallas as pl
from jax.experimental.pallas import tpu as pltpu

LEAKY_SLOPE = 0.1      # HiFi-GAN convention (PyTorch nn.LeakyReLU default is 0.01)
LANES = 128


def _leaky(x):
    return jnp.where(x >= 0.0, x, LEAKY_SLOPE * x)


# ------------------------------- fused kernel --------------------------------

def _decode_fused_kernel(
    sid_ref,                                   # scalar prefetch (used only by index_maps)
    f0_ref, ph_ref, spk_ref,                   # per-batch activations
    w1f0_ref, w1ph_ref, w1spk_ref, b1_ref,     # MLP layer 1 (w1 split by input rows)
    w2_ref, b2_ref,                            # MLP layer 2 -> spec
    wpre_ref, bpre_ref,                        # hifi conv_pre   (K=7, pad=3)
    wup_ref, bup_ref,                          # hifi ConvTranspose (K=2U, stride=U)
    wres_ref, bres_ref,                        # hifi residual conv (K=3, pad=1)
    wpost_ref, bpost_ref,                      # hifi conv_post  (K=7, pad=3, -> 1 ch)
    spec_ref, wave_ref,                        # outputs: (L, Cp) and (L, U)
):
    del sid_ref
    L = f0_ref.shape[0]
    U = wave_ref.shape[-1]
    f32 = jnp.float32

    def shift_rows(x, d):
        # y[m] = x[m + d], zeros outside [0, L). XLU roll + VPU mask (no jnp.pad,
        # no unaligned sublane slices).
        if d == 0:
            return x
        rolled = pltpu.roll(x, shift=(-d) % L, axis=0)
        rows = lax.broadcasted_iota(jnp.int32, (L, 1), 0)
        return jnp.where((rows + d >= 0) & (rows + d < L), rolled, 0.0)

    def conv_taps(x, w_ref, b, pad):
        # standard 1-D conv over the sublane (time) axis: K shifted MXU matmuls
        K = w_ref.shape[0]
        acc = jnp.zeros((L, w_ref.shape[-1]), f32) + b
        for k in range(K):
            acc = acc + jnp.dot(shift_rows(x, k - pad), w_ref[k],
                                preferred_element_type=f32)
        return acc

    # ---- yukarin_sosoa: concat-free MLP -> spec ------------------------------
    h = f0_ref[...] * w1f0_ref[...]                     # (L,1)*(1,Hp): VPU outer product
    h = h + jnp.dot(ph_ref[...], w1ph_ref[...], preferred_element_type=f32)
    h = h + jnp.dot(spk_ref[...], w1spk_ref[...], preferred_element_type=f32)  # (1,Hp), per-batch
    h = jnp.maximum(h + b1_ref[...], 0.0)
    spec = jnp.dot(h, w2_ref[...], preferred_element_type=f32) + b2_ref[...]
    spec_ref[...] = spec                                # lane-dense (L, 128) store

    # ---- hifi_gan: conv_pre --------------------------------------------------
    Kp = wpre_ref.shape[0]
    pre = _leaky(conv_taps(spec, wpre_ref, bpre_ref[...], (Kp - 1) // 2))

    # ---- ConvTranspose1d(stride=U, K=2U, pad=U//2) via polyphase --------------
    # out[m*U + r] = sum_{j : (r + j - (2U-1-U//2)) % U == 0} pre[m + d_j] @ w_up[j]
    Ku = wup_ref.shape[0]
    lead = Ku - 1 - (U // 2)
    Hh = wup_ref.shape[-1]
    phases = []
    for r in range(U):
        acc = jnp.zeros((L, Hh), f32) + bup_ref[...]
        for j in range(Ku):
            q = r + j - lead
            if q % U == 0:
                acc = acc + jnp.dot(shift_rows(pre, q // U), wup_ref[j],
                                    preferred_element_type=f32)
        phases.append(_leaky(acc))

    # ---- residual 3-tap conv, computed in phase space ------------------------
    Kr = wres_ref.shape[0]
    pr = (Kr - 1) // 2
    res = []
    for r in range(U):
        acc = jnp.zeros((L, Hh), f32) + bres_ref[...]
        for k in range(Kr):
            q = r + k - pr
            acc = acc + jnp.dot(shift_rows(phases[q % U], q // U), wres_ref[k],
                                preferred_element_type=f32)
        res.append(phases[r] + _leaky(acc))

    # ---- conv_post (-> 1 channel): VPU multiply + XLU lane reduce + tanh ------
    wpost = wpost_ref[...]                               # (K_post, Hh)
    Ko = wpost.shape[0]
    po = (Ko - 1) // 2
    for r in range(U):
        acc = jnp.zeros((L, 1), f32) + bpost_ref[...]
        for k in range(Ko):
            q = r + k - po
            xk = shift_rows(res[q % U], q // U)
            acc = acc + jnp.sum(xk * wpost[k:k + 1, :], axis=-1, keepdims=True)
        wave_ref[:, r:r + 1] = jnp.tanh(acc)             # phase r -> lane r of (L, U)


# ----------------------------- Pallas wrapper ---------------------------------

def _pad_axis(x, axis, mult=LANES):
    n = x.shape[axis]
    t = ((n + mult - 1) // mult) * mult
    if t == n:
        return x
    widths = [(0, 0)] * x.ndim
    widths[axis] = (0, t - n)
    return jnp.pad(x, widths)


def _padded_kernel_params(params, phoneme_size, spk_dim):
    """Split w1 by input rows and zero-pad channel dims to 128 lanes (exact math)."""
    P, S = phoneme_size, spk_dim
    w1 = params["w1"]
    padl = lambda x: _pad_axis(x, -1)
    return dict(
        spk_emb3=params["spk_emb"][:, None, :],            # (n_spk, 1, S)
        w1_f0=padl(w1[0:1]),
        w1_ph=padl(w1[1:1 + P]),
        w1_spk=padl(w1[1 + P:1 + P + S]),
        b1=padl(params["b1"]),
        w2=_pad_axis(padl(params["w2"]), 0),
        b2=padl(params["b2"]),
        w_pre=_pad_axis(padl(params["w_pre"]), 1),
        b_pre=padl(params["b_pre"]),
        w_up=_pad_axis(padl(params["w_up"]), 1),
        b_up=padl(params["b_up"]),
        w_res=_pad_axis(padl(params["w_res"]), 1),
        b_res=padl(params["b_res"]),
        w_post=_pad_axis(params["w_post"][:, :, 0], 1),    # (K, Hh): single out channel
        b_post=params["b_post"],                           # (1, 1)
    )


def decode_forward_pallas(params, f0, phoneme, speaker_id, *, upsample):
    """WrapperDecodeForwarder.forward -> (spec, wave) as one fused Pallas call."""
    B, L, _ = f0.shape
    P = phoneme.shape[-1]
    S = params["spk_emb"].shape[-1]
    spec_c = params["w2"].shape[-1]
    U = upsample
    pp = _padded_kernel_params(params, P, S)

    def rep(x):   # whole-array weight block, constant block index (loaded once)
        nd = x.ndim
        return pl.BlockSpec(x.shape, lambda b, sid, _z=(0,) * nd: _z)

    weight_keys = ["w1_f0", "w1_ph", "w1_spk", "b1", "w2", "b2",
                   "w_pre", "b_pre", "w_up", "b_up",
                   "w_res", "b_res", "w_post", "b_post"]
    weights = [pp[k] for k in weight_keys]
    Cp = pp["w2"].shape[-1]

    grid_spec = pltpu.PrefetchScalarGridSpec(
        num_scalar_prefetch=1,                  # speaker_id -> SMEM, used by index_map
        grid=(B,),
        in_specs=[
            pl.BlockSpec((None, L, 1), lambda b, sid: (b, 0, 0)),          # f0
            pl.BlockSpec((None, L, P), lambda b, sid: (b, 0, 0)),          # phoneme
            pl.BlockSpec((None, 1, S), lambda b, sid: (sid[b], 0, 0)),     # spk_emb[sid[b]]
        ] + [rep(w) for w in weights],
        out_specs=[
            pl.BlockSpec((None, L, Cp), lambda b, sid: (b, 0, 0)),         # spec (padded)
            pl.BlockSpec((None, L, U), lambda b, sid: (b, 0, 0)),          # wave phases
        ],
    )

    spec_pad, wave_ph = pl.pallas_call(
        _decode_fused_kernel,
        out_shape=(jax.ShapeDtypeStruct((B, L, Cp), jnp.float32),
                   jax.ShapeDtypeStruct((B, L, U), jnp.float32)),
        grid_spec=grid_spec,
        compiler_params=pltpu.CompilerParams(dimension_semantics=("parallel",)),
    )(speaker_id, f0, phoneme, pp["spk_emb3"], *weights)

    spec = spec_pad[:, :, :spec_c]
    wave = wave_ph.reshape(B, L * U)            # phase interleave: (m, r) -> m*U + r
    return spec, wave


# ------------------------ pure-JAX reference (checking) ------------------------

def _einsum_hp(subscripts, *ops):
    return jnp.einsum(subscripts, *ops, precision=lax.Precision.HIGHEST)


def _mlp_ref(x, w1, b1, w2, b2):
    h = jnp.maximum(_einsum_hp("bld,dh->blh", x, w1) + b1, 0.0)
    return _einsum_hp("blh,hc->blc", h, w2) + b2


def _conv1d_ref(x_pad, w, b, act):
    K = w.shape[0]
    T = x_pad.shape[1] - K + 1
    acc = b + sum(_einsum_hp("btc,cd->btd", x_pad[:, k:k + T, :], w[k])
                  for k in range(K))
    if act == "leaky":
        acc = jnp.where(acc >= 0.0, acc, LEAKY_SLOPE * acc)
    elif act == "tanh":
        acc = jnp.tanh(acc)
    return acc


def decode_forward_ref(params, f0, phoneme, speaker_id, *, upsample):
    B, L, _ = f0.shape
    U = upsample
    spk = jnp.take(params["spk_emb"], speaker_id, axis=0)
    spk = jnp.broadcast_to(spk[:, None, :], (B, L, spk.shape[-1]))
    x = jnp.concatenate([f0, phoneme, spk], axis=-1)
    spec = _mlp_ref(x, params["w1"], params["b1"], params["w2"], params["b2"])

    h = _conv1d_ref(jnp.pad(spec, ((0, 0), (3, 3), (0, 0))),
                    params["w_pre"], params["b_pre"], "leaky")
    K_up, Pt = 2 * U, U // 2
    Hh = h.shape[-1]
    up = jnp.zeros((B, L * U, Hh), jnp.float32).at[:, ::U, :].set(h)
    h = _conv1d_ref(jnp.pad(up, ((0, 0), (K_up - 1 - Pt, Pt), (0, 0))),
                    params["w_up"], params["b_up"], "leaky")
    h = h + _conv1d_ref(jnp.pad(h, ((0, 0), (1, 1), (0, 0))),
                        params["w_res"], params["b_res"], "leaky")
    wave = _conv1d_ref(jnp.pad(h, ((0, 0), (3, 3), (0, 0))),
                       params["w_post"], params["b_post"], "tanh")
    return spec, wave[..., 0]


# ----------------------------- deterministic params ----------------------------

def init_params(key, *, phoneme_size, spk_dim, n_speakers, hidden, spec_c,
                hifi_h, upsample):
    ks = jax.random.split(key, 12)

    def nrm(k, shape, s=0.1):
        return (s * jax.random.normal(k, shape)).astype(jnp.float32)

    din = 1 + phoneme_size + spk_dim
    return {
        "spk_emb": nrm(ks[0], (n_speakers, spk_dim), 0.5),
        "w1": nrm(ks[1], (din, hidden)),
        "b1": nrm(ks[2], (1, hidden), 0.01),
        "w2": nrm(ks[3], (hidden, spec_c)),
        "b2": nrm(ks[4], (1, spec_c), 0.01),
        "w_pre": nrm(ks[5], (7, spec_c, hifi_h)),
        "b_pre": nrm(ks[6], (1, hifi_h), 0.01),
        "w_up": nrm(ks[7], (2 * upsample, hifi_h, hifi_h)),
        "b_up": nrm(ks[8], (1, hifi_h), 0.01),
        "w_res": nrm(ks[9], (3, hifi_h, hifi_h)),
        "b_res": nrm(ks[10], (1, hifi_h), 0.01),
        "w_post": nrm(ks[11], (7, hifi_h, 1)),
        "b_post": jnp.zeros((1, 1), jnp.float32),
    }


# ----------------------------------- main --------------------------------------

if __name__ == "__main__":
    B, L = 2, 16
    PHONEME, SPK_DIM, N_SPK = 8, 4, 10
    HIDDEN, SPEC_C, HIFI_H, U = 32, 16, 32, 4

    key = jax.random.PRNGKey(0)
    kp, kf, kph, ksid = jax.random.split(key, 4)
    params = init_params(kp, phoneme_size=PHONEME, spk_dim=SPK_DIM,
                         n_speakers=N_SPK, hidden=HIDDEN, spec_c=SPEC_C,
                         hifi_h=HIFI_H, upsample=U)

    f0 = jax.random.normal(kf, (B, L, 1), jnp.float32)
    phoneme = jax.random.normal(kph, (B, L, PHONEME), jnp.float32)
    speaker_id = jax.random.randint(ksid, (B,), 0, N_SPK, jnp.int32)

    fwd = jax.jit(functools.partial(decode_forward_pallas, upsample=U))
    spec, wave = fwd(params, f0, phoneme, speaker_id)
    jax.block_until_ready((spec, wave))

    spec_r, wave_r = decode_forward_ref(params, f0, phoneme, speaker_id, upsample=U)

    assert spec.shape == (B, L, SPEC_C) and wave.shape == (B, L * U)
    assert bool(jnp.all(jnp.isfinite(spec))) and bool(jnp.all(jnp.isfinite(wave)))
    assert float(jnp.max(jnp.abs(spec - spec_r))) < 1e-4
    assert float(jnp.max(jnp.abs(wave - wave_r))) < 1e-4

    print("KERNEL_OK")
</pallas_src>

<mosaic_0001>
module attributes {stable_mosaic.version = 11 : i64} {
  func.func @_decode_fused_kernel(%arg0: i32, %arg1: memref<2xi32, #tpu.memory_space<smem>>, %arg2: memref<1x16x1xf32, #tpu.memory_space<vmem>>, %arg3: memref<1x16x8xf32, #tpu.memory_space<vmem>>, %arg4: memref<1x1x4xf32, #tpu.memory_space<vmem>>, %arg5: memref<1x128xf32, #tpu.memory_space<vmem>>, %arg6: memref<8x128xf32, #tpu.memory_space<vmem>>, %arg7: memref<4x128xf32, #tpu.memory_space<vmem>>, %arg8: memref<1x128xf32, #tpu.memory_space<vmem>>, %arg9: memref<128x128xf32, #tpu.memory_space<vmem>>, %arg10: memref<1x128xf32, #tpu.memory_space<vmem>>, %arg11: memref<7x128x128xf32, #tpu.memory_space<vmem>>, %arg12: memref<1x128xf32, #tpu.memory_space<vmem>>, %arg13: memref<8x128x128xf32, #tpu.memory_space<vmem>>, %arg14: memref<1x128xf32, #tpu.memory_space<vmem>>, %arg15: memref<3x128x128xf32, #tpu.memory_space<vmem>>, %arg16: memref<1x128xf32, #tpu.memory_space<vmem>>, %arg17: memref<7x128xf32, #tpu.memory_space<vmem>>, %arg18: memref<1x1xf32, #tpu.memory_space<vmem>>, %arg19: memref<1x16x128xf32, #tpu.memory_space<vmem>>, %arg20: memref<1x16x4xf32, #tpu.memory_space<vmem>>) attributes {dimension_semantics = [#tpu.dimension_semantics<parallel>], iteration_bounds = array<i64: 2>, scalar_prefetch = 1 : i64, scratch_operands = 0 : i64, tpu.core_type = #tpu.core_type<tc>, window_params = [{transform_indices = @transform_0, window_bounds = array<i64: 1, 16, 1>}, {transform_indices = @transform_1, window_bounds = array<i64: 1, 16, 8>}, {transform_indices = @transform_2, window_bounds = array<i64: 1, 1, 4>}, {pipeline_mode = #tpu.pipeline_mode<synchronous>, transform_indices = @transform_3, window_bounds = array<i64: 1, 128>}, {pipeline_mode = #tpu.pipeline_mode<synchronous>, transform_indices = @transform_4, window_bounds = array<i64: 8, 128>}, {pipeline_mode = #tpu.pipeline_mode<synchronous>, transform_indices = @transform_5, window_bounds = array<i64: 4, 128>}, {pipeline_mode = #tpu.pipeline_mode<synchronous>, transform_indices = @transform_6, window_bounds = array<i64: 1, 128>}, {pipeline_mode = #tpu.pipeline_mode<synchronous>, transform_indices = @transform_7, window_bounds = array<i64: 128, 128>}, {pipeline_mode = #tpu.pipeline_mode<synchronous>, transform_indices = @transform_8, window_bounds = array<i64: 1, 128>}, {pipeline_mode = #tpu.pipeline_mode<synchronous>, transform_indices = @transform_9, window_bounds = array<i64: 7, 128, 128>}, {pipeline_mode = #tpu.pipeline_mode<synchronous>, transform_indices = @transform_10, window_bounds = array<i64: 1, 128>}, {pipeline_mode = #tpu.pipeline_mode<synchronous>, transform_indices = @transform_11, window_bounds = array<i64: 8, 128, 128>}, {pipeline_mode = #tpu.pipeline_mode<synchronous>, transform_indices = @transform_12, window_bounds = array<i64: 1, 128>}, {pipeline_mode = #tpu.pipeline_mode<synchronous>, transform_indices = @transform_13, window_bounds = array<i64: 3, 128, 128>}, {pipeline_mode = #tpu.pipeline_mode<synchronous>, transform_indices = @transform_14, window_bounds = array<i64: 1, 128>}, {pipeline_mode = #tpu.pipeline_mode<synchronous>, transform_indices = @transform_15, window_bounds = array<i64: 7, 128>}, {pipeline_mode = #tpu.pipeline_mode<synchronous>, transform_indices = @transform_16, window_bounds = array<i64: 1, 1>}, {transform_indices = @transform_17, window_bounds = array<i64: 1, 16, 128>}, {transform_indices = @transform_18, window_bounds = array<i64: 1, 16, 4>}]} {
    %c0 = arith.constant 0 : index
    %c0_0 = arith.constant 0 : index
    %c0_1 = arith.constant 0 : index
    %0 = vector.load %arg2[%c0, %c0_0, %c0_1] : memref<1x16x1xf32, #tpu.memory_space<vmem>>, vector<1x16x1xf32>
    %1 = vector.shape_cast %0 : vector<1x16x1xf32> to vector<16x1xf32>
    %c0_2 = arith.constant 0 : index
    %c0_3 = arith.constant 0 : index
    %2 = vector.load %arg5[%c0_2, %c0_3] : memref<1x128xf32, #tpu.memory_space<vmem>>, vector<1x128xf32>
    %3 = vector.broadcast %1 : vector<16x1xf32> to vector<16x128xf32>
    %4 = vector.broadcast %2 : vector<1x128xf32> to vector<16x128xf32>
    %5 = arith.mulf %3, %4 : vector<16x128xf32>
    %c0_4 = arith.constant 0 : index
    %c0_5 = arith.constant 0 : index
    %c0_6 = arith.constant 0 : index
    %6 = vector.load %arg3[%c0_4, %c0_5, %c0_6] : memref<1x16x8xf32, #tpu.memory_space<vmem>>, vector<1x16x8xf32>
    %7 = vector.shape_cast %6 : vector<1x16x8xf32> to vector<16x8xf32>
    %c0_7 = arith.constant 0 : index
    %c0_8 = arith.constant 0 : index
    %8 = vector.load %arg6[%c0_7, %c0_8] : memref<8x128xf32, #tpu.memory_space<vmem>>, vector<8x128xf32>
    %cst = arith.constant dense<0.000000e+00> : vector<16x128xf32>
    %9 = tpu.matmul %7, %8, %cst {dimension_numbers = #tpu.dot_dimension_numbers<[1], [0], [0], [1], [0, 0, 1, 1], [], []>} : vector<16x8xf32>, vector<8x128xf32>, vector<16x128xf32> -> vector<16x128xf32>
    %10 = arith.addf %5, %9 : vector<16x128xf32>
    %c0_9 = arith.constant 0 : index
    %c0_10 = arith.constant 0 : index
    %c0_11 = arith.constant 0 : index
    %11 = vector.load %arg4[%c0_9, %c0_10, %c0_11] : memref<1x1x4xf32, #tpu.memory_space<vmem>>, vector<1x1x4xf32>
    %12 = vector.shape_cast %11 : vector<1x1x4xf32> to vector<1x4xf32>
    %c0_12 = arith.constant 0 : index
    %c0_13 = arith.constant 0 : index
    %13 = vector.load %arg7[%c0_12, %c0_13] : memref<4x128xf32, #tpu.memory_space<vmem>>, vector<4x128xf32>
    %cst_14 = arith.constant dense<0.000000e+00> : vector<1x128xf32>
    %14 = tpu.matmul %12, %13, %cst_14 {dimension_numbers = #tpu.dot_dimension_numbers<[1], [0], [0], [1], [0, 0, 1, 1], [], []>} : vector<1x4xf32>, vector<4x128xf32>, vector<1x128xf32> -> vector<1x128xf32>
    %15 = vector.broadcast %14 : vector<1x128xf32> to vector<16x128xf32>
    %16 = arith.addf %10, %15 : vector<16x128xf32>
    %c0_15 = arith.constant 0 : index
    %c0_16 = arith.constant 0 : index
    %17 = vector.load %arg8[%c0_15, %c0_16] : memref<1x128xf32, #tpu.memory_space<vmem>>, vector<1x128xf32>
    %18 = vector.broadcast %17 : vector<1x128xf32> to vector<16x128xf32>
    %19 = arith.addf %16, %18 : vector<16x128xf32>
    %cst_17 = arith.constant 0.000000e+00 : f32
    %20 = vector.broadcast %cst_17 : f32 to vector<16x128xf32>
    %21 = arith.maximumf %19, %20 : vector<16x128xf32>
    %c0_18 = arith.constant 0 : index
    %c0_19 = arith.constant 0 : index
    %22 = vector.load %arg9[%c0_18, %c0_19] : memref<128x128xf32, #tpu.memory_space<vmem>>, vector<128x128xf32>
    %cst_20 = arith.constant dense<0.000000e+00> : vector<16x128xf32>
    %23 = tpu.matmul %21, %22, %cst_20 {dimension_numbers = #tpu.dot_dimension_numbers<[1], [0], [0], [1], [0, 0, 1, 1], [], []>} : vector<16x128xf32>, vector<128x128xf32>, vector<16x128xf32> -> vector<16x128xf32>
    %c0_21 = arith.constant 0 : index
    %c0_22 = arith.constant 0 : index
    %24 = vector.load %arg10[%c0_21, %c0_22] : memref<1x128xf32, #tpu.memory_space<vmem>>, vector<1x128xf32>
    %25 = vector.broadcast %24 : vector<1x128xf32> to vector<16x128xf32>
    %26 = arith.addf %23, %25 : vector<16x128xf32>
    %c0_23 = arith.constant 0 : index
    %c0_24 = arith.constant 0 : index
    %c0_25 = arith.constant 0 : index
    %27 = vector.load %arg19[%c0_23, %c0_24, %c0_25] : memref<1x16x128xf32, #tpu.memory_space<vmem>>, vector<1x16x128xf32>
    %28 = vector.shape_cast %27 : vector<1x16x128xf32> to vector<16x128xf32>
    %29 = vector.shape_cast %26 : vector<16x128xf32> to vector<1x16x128xf32>
    tpu.vector_store %arg19[%c0_23, %c0_24, %c0_25], %29 {strides = array<i32>} : memref<1x16x128xf32, #tpu.memory_space<vmem>>, vector<1x16x128xf32>,
    %c0_26 = arith.constant 0 : index
    %c0_27 = arith.constant 0 : index
    %30 = vector.load %arg12[%c0_26, %c0_27] : memref<1x128xf32, #tpu.memory_space<vmem>>, vector<1x128xf32>
    %cst_28 = arith.constant 0.000000e+00 : f32
    %31 = vector.broadcast %cst_28 : f32 to vector<16x128xf32>
    %32 = vector.broadcast %30 : vector<1x128xf32> to vector<16x128xf32>
    %33 = arith.addf %31, %32 : vector<16x128xf32>
    %c3_i32 = arith.constant 3 : i32
    %34 = tpu.dynamic_rotate %26 by %c3_i32 dim 0 : vector<16x128xf32>, i32 -> vector<16x128xf32>
    %35 = tpu.iota {dimensions = array<i32: 0>} : vector<16x1xi32>
    %c-3_i32 = arith.constant -3 : i32
    %36 = vector.broadcast %c-3_i32 : i32 to vector<16x1xi32>
    %37 = arith.addi %35, %36 : vector<16x1xi32>
    %c0_i32 = arith.constant 0 : i32
    %38 = vector.broadcast %c0_i32 : i32 to vector<16x1xi32>
    %39 = arith.cmpi sge, %37, %38 : vector<16x1xi32>
    %c-3_i32_29 = arith.constant -3 : i32
    %40 = vector.broadcast %c-3_i32_29 : i32 to vector<16x1xi32>
    %41 = arith.addi %35, %40 : vector<16x1xi32>
    %c16_i32 = arith.constant 16 : i32
    %42 = vector.broadcast %c16_i32 : i32 to vector<16x1xi32>
    %43 = arith.cmpi slt, %41, %42 : vector<16x1xi32>
    %44 = arith.andi %39, %43 : vector<16x1xi1>
    %cst_30 = arith.constant 0.000000e+00 : f32
    %45 = vector.shape_cast %44 : vector<16x1xi1> to vector<16x1xi1>
    %46 = vector.broadcast %45 : vector<16x1xi1> to vector<16x128xi1>
    %47 = vector.broadcast %cst_30 : f32 to vector<16x128xf32>
    %48 = arith.select %46, %34, %47 : vector<16x128xi1>, vector<16x128xf32>
    %c0_31 = arith.constant 0 : index
    %c0_32 = arith.constant 0 : index
    %c0_33 = arith.constant 0 : index
    %49 = vector.load %arg11[%c0_31, %c0_32, %c0_33] : memref<7x128x128xf32, #tpu.memory_space<vmem>>, vector<1x128x128xf32>
    %50 = vector.shape_cast %49 : vector<1x128x128xf32> to vector<128x128xf32>
    %cst_34 = arith.constant dense<0.000000e+00> : vector<16x128xf32>
    %51 = tpu.matmul %48, %50, %cst_34 {dimension_numbers = #tpu.dot_dimension_numbers<[1], [0], [0], [1], [0, 0, 1, 1], [], []>} : vector<16x128xf32>, vector<128x128xf32>, vector<16x128xf32> -> vector<16x128xf32>
    %52 = arith.addf %33, %51 : vector<16x128xf32>
    %c2_i32 = arith.constant 2 : i32
    %53 = tpu.dynamic_rotate %26 by %c2_i32 dim 0 : vector<16x128xf32>, i32 -> vector<16x128xf32>
    %54 = tpu.iota {dimensions = array<i32: 0>} : vector<16x1xi32>
    %c-2_i32 = arith.constant -2 : i32
    %55 = vector.broadcast %c-2_i32 : i32 to vector<16x1xi32>
    %56 = arith.addi %54, %55 : vector<16x1xi32>
    %c0_i32_35 = arith.constant 0 : i32
    %57 = vector.broadcast %c0_i32_35 : i32 to vector<16x1xi32>
    %58 = arith.cmpi sge, %56, %57 : vector<16x1xi32>
    %c-2_i32_36 = arith.constant -2 : i32
    %59 = vector.broadcast %c-2_i32_36 : i32 to vector<16x1xi32>
    %60 = arith.addi %54, %59 : vector<16x1xi32>
    %c16_i32_37 = arith.constant 16 : i32
    %61 = vector.broadcast %c16_i32_37 : i32 to vector<16x1xi32>
    %62 = arith.cmpi slt, %60, %61 : vector<16x1xi32>
    %63 = arith.andi %58, %62 : vector<16x1xi1>
    %cst_38 = arith.constant 0.000000e+00 : f32
    %64 = vector.shape_cast %63 : vector<16x1xi1> to vector<16x1xi1>
    %65 = vector.broadcast %64 : vector<16x1xi1> to vector<16x128xi1>
    %66 = vector.broadcast %cst_38 : f32 to vector<16x128xf32>
    %67 = arith.select %65, %53, %66 : vector<16x128xi1>, vector<16x128xf32>
    %c1 = arith.constant 1 : index
    %c0_39 = arith.constant 0 : index
    %c0_40 = arith.constant 0 : index
    %68 = vector.load %arg11[%c1, %c0_39, %c0_40] : memref<7x128x128xf32, #tpu.memory_space<vmem>>, vector<1x128x128xf32>
    %69 = vector.shape_cast %68 : vector<1x128x128xf32> to vector<128x128xf32>
    %cst_41 = arith.constant dense<0.000000e+00> : vector<16x128xf32>
    %70 = tpu.matmul %67, %69, %cst_41 {dimension_numbers = #tpu.dot_dimension_numbers<[1], [0], [0], [1], [0, 0, 1, 1], [], []>} : vector<16x128xf32>, vector<128x128xf32>, vector<16x128xf32> -> vector<16x128xf32>
    %71 = arith.addf %52, %70 : vector<16x128xf32>
    %c1_i32 = arith.constant 1 : i32
    %72 = tpu.dynamic_rotate %26 by %c1_i32 dim 0 : vector<16x128xf32>, i32 -> vector<16x128xf32>
    %73 = tpu.iota {dimensions = array<i32: 0>} : vector<16x1xi32>
    %c-1_i32 = arith.constant -1 : i32
    %74 = vector.broadcast %c-1_i32 : i32 to vector<16x1xi32>
    %75 = arith.addi %73, %74 : vector<16x1xi32>
    %c0_i32_42 = arith.constant 0 : i32
    %76 = vector.broadcast %c0_i32_42 : i32 to vector<16x1xi32>
    %77 = arith.cmpi sge, %75, %76 : vector<16x1xi32>
    %c-1_i32_43 = arith.constant -1 : i32
    %78 = vector.broadcast %c-1_i32_43 : i32 to vector<16x1xi32>
    %79 = arith.addi %73, %78 : vector<16x1xi32>
    %c16_i32_44 = arith.constant 16 : i32
    %80 = vector.broadcast %c16_i32_44 : i32 to vector<16x1xi32>
    %81 = arith.cmpi slt, %79, %80 : vector<16x1xi32>
    %82 = arith.andi %77, %81 : vector<16x1xi1>
    %cst_45 = arith.constant 0.000000e+00 : f32
    %83 = vector.shape_cast %82 : vector<16x1xi1> to vector<16x1xi1>
    %84 = vector.broadcast %83 : vector<16x1xi1> to vector<16x128xi1>
    %85 = vector.broadcast %cst_45 : f32 to vector<16x128xf32>
    %86 = arith.select %84, %72, %85 : vector<16x128xi1>, vector<16x128xf32>
    %c2 = arith.constant 2 : index
    %c0_46 = arith.constant 0 : index
    %c0_47 = arith.constant 0 : index
    %87 = vector.load %arg11[%c2, %c0_46, %c0_47] : memref<7x128x128xf32, #tpu.memory_space<vmem>>, vector<1x128x128xf32>
    %88 = vector.shape_cast %87 : vector<1x128x128xf32> to vector<128x128xf32>
    %cst_48 = arith.constant dense<0.000000e+00> : vector<16x128xf32>
    %89 = tpu.matmul %86, %88, %cst_48 {dimension_numbers = #tpu.dot_dimension_numbers<[1], [0], [0], [1], [0, 0, 1, 1], [], []>} : vector<16x128xf32>, vector<128x128xf32>, vector<16x128xf32> -> vector<16x128xf32>
    %90 = arith.addf %71, %89 : vector<16x128xf32>
    %c3 = arith.constant 3 : index
    %c0_49 = arith.constant 0 : index
    %c0_50 = arith.constant 0 : index
    %91 = vector.load %arg11[%c3, %c0_49, %c0_50] : memref<7x128x128xf32, #tpu.memory_space<vmem>>, vector<1x128x128xf32>
    %92 = vector.shape_cast %91 : vector<1x128x128xf32> to vector<128x128xf32>
    %cst_51 = arith.constant dense<0.000000e+00> : vector<16x128xf32>
    %93 = tpu.matmul %26, %92, %cst_51 {dimension_numbers = #tpu.dot_dimension_numbers<[1], [0], [0], [1], [0, 0, 1, 1], [], []>} : vector<16x128xf32>, vector<128x128xf32>, vector<16x128xf32> -> vector<16x128xf32>
    %94 = arith.addf %90, %93 : vector<16x128xf32>
    %c15_i32 = arith.constant 15 : i32
    %95 = tpu.dynamic_rotate %26 by %c15_i32 dim 0 : vector<16x128xf32>, i32 -> vector<16x128xf32>
    %96 = tpu.iota {dimensions = array<i32: 0>} : vector<16x1xi32>
    %c1_i32_52 = arith.constant 1 : i32
    %97 = vector.broadcast %c1_i32_52 : i32 to vector<16x1xi32>
    %98 = arith.addi %96, %97 : vector<16x1xi32>
    %c0_i32_53 = arith.constant 0 : i32
    %99 = vector.broadcast %c0_i32_53 : i32 to vector<16x1xi32>
    %100 = arith.cmpi sge, %98, %99 : vector<16x1xi32>
    %c1_i32_54 = arith.constant 1 : i32
    %101 = vector.broadcast %c1_i32_54 : i32 to vector<16x1xi32>
    %102 = arith.addi %96, %101 : vector<16x1xi32>
    %c16_i32_55 = arith.constant 16 : i32
    %103 = vector.broadcast %c16_i32_55 : i32 to vector<16x1xi32>
    %104 = arith.cmpi slt, %102, %103 : vector<16x1xi32>
    %105 = arith.andi %100, %104 : vector<16x1xi1>
    %cst_56 = arith.constant 0.000000e+00 : f32
    %106 = vector.shape_cast %105 : vector<16x1xi1> to vector<16x1xi1>
    %107 = vector.broadcast %106 : vector<16x1xi1> to vector<16x128xi1>
    %108 = vector.broadcast %cst_56 : f32 to vector<16x128xf32>
    %109 = arith.select %107, %95, %108 : vector<16x128xi1>, vector<16x128xf32>
    %c4 = arith.constant 4 : index
    %c0_57 = arith.constant 0 : index
    %c0_58 = arith.constant 0 : index
    %110 = vector.load %arg11[%c4, %c0_57, %c0_58] : memref<7x128x128xf32, #tpu.memory_space<vmem>>, vector<1x128x128xf32>
    %111 = vector.shape_cast %110 : vector<1x128x128xf32> to vector<128x128xf32>
    %cst_59 = arith.constant dense<0.000000e+00> : vector<16x128xf32>
    %112 = tpu.matmul %109, %111, %cst_59 {dimension_numbers = #tpu.dot_dimension_numbers<[1], [0], [0], [1], [0, 0, 1, 1], [], []>} : vector<16x128xf32>, vector<128x128xf32>, vector<16x128xf32> -> vector<16x128xf32>
    %113 = arith.addf %94, %112 : vector<16x128xf32>
    %c14_i32 = arith.constant 14 : i32
    %114 = tpu.dynamic_rotate %26 by %c14_i32 dim 0 : vector<16x128xf32>, i32 -> vector<16x128xf32>
    %115 = tpu.iota {dimensions = array<i32: 0>} : vector<16x1xi32>
    %c2_i32_60 = arith.constant 2 : i32
    %116 = vector.broadcast %c2_i32_60 : i32 to vector<16x1xi32>
    %117 = arith.addi %115, %116 : vector<16x1xi32>
    %c0_i32_61 = arith.constant 0 : i32
    %118 = vector.broadcast %c0_i32_61 : i32 to vector<16x1xi32>
    %119 = arith.cmpi sge, %117, %118 : vector<16x1xi32>
    %c2_i32_62 = arith.constant 2 : i32
    %120 = vector.broadcast %c2_i32_62 : i32 to vector<16x1xi32>
    %121 = arith.addi %115, %120 : vector<16x1xi32>
    %c16_i32_63 = arith.constant 16 : i32
    %122 = vector.broadcast %c16_i32_63 : i32 to vector<16x1xi32>
    %123 = arith.cmpi slt, %121, %122 : vector<16x1xi32>
    %124 = arith.andi %119, %123 : vector<16x1xi1>
    %cst_64 = arith.constant 0.000000e+00 : f32
    %125 = vector.shape_cast %124 : vector<16x1xi1> to vector<16x1xi1>
    %126 = vector.broadcast %125 : vector<16x1xi1> to vector<16x128xi1>
    %127 = vector.broadcast %cst_64 : f32 to vector<16x128xf32>
    %128 = arith.select %126, %114, %127 : vector<16x128xi1>, vector<16x128xf32>
    %c5 = arith.constant 5 : index
    %c0_65 = arith.constant 0 : index
    %c0_66 = arith.constant 0 : index
    %129 = vector.load %arg11[%c5, %c0_65, %c0_66] : memref<7x128x128xf32, #tpu.memory_space<vmem>>, vector<1x128x128xf32>
    %130 = vector.shape_cast %129 : vector<1x128x128xf32> to vector<128x128xf32>
    %cst_67 = arith.constant dense<0.000000e+00> : vector<16x128xf32>
    %131 = tpu.matmul %128, %130, %cst_67 {dimension_numbers = #tpu.dot_dimension_numbers<[1], [0], [0], [1], [0, 0, 1, 1], [], []>} : vector<16x128xf32>, vector<128x128xf32>, vector<16x128xf32> -> vector<16x128xf32>
    %132 = arith.addf %113, %131 : vector<16x128xf32>
    %c13_i32 = arith.constant 13 : i32
    %133 = tpu.dynamic_rotate %26 by %c13_i32 dim 0 : vector<16x128xf32>, i32 -> vector<16x128xf32>
    %134 = tpu.iota {dimensions = array<i32: 0>} : vector<16x1xi32>
    %c3_i32_68 = arith.constant 3 : i32
    %135 = vector.broadcast %c3_i32_68 : i32 to vector<16x1xi32>
    %136 = arith.addi %134, %135 : vector<16x1xi32>
    %c0_i32_69 = arith.constant 0 : i32
    %137 = vector.broadcast %c0_i32_69 : i32 to vector<16x1xi32>
    %138 = arith.cmpi sge, %136, %137 : vector<16x1xi32>
    %c3_i32_70 = arith.constant 3 : i32
    %139 = vector.broadcast %c3_i32_70 : i32 to vector<16x1xi32>
    %140 = arith.addi %134, %139 : vector<16x1xi32>
    %c16_i32_71 = arith.constant 16 : i32
    %141 = vector.broadcast %c16_i32_71 : i32 to vector<16x1xi32>
    %142 = arith.cmpi slt, %140, %141 : vector<16x1xi32>
    %143 = arith.andi %138, %142 : vector<16x1xi1>
    %cst_72 = arith.constant 0.000000e+00 : f32
    %144 = vector.shape_cast %143 : vector<16x1xi1> to vector<16x1xi1>
    %145 = vector.broadcast %144 : vector<16x1xi1> to vector<16x128xi1>
    %146 = vector.broadcast %cst_72 : f32 to vector<16x128xf32>
    %147 = arith.select %145, %133, %146 : vector<16x128xi1>, vector<16x128xf32>
    %c6 = arith.constant 6 : index
    %c0_73 = arith.constant 0 : index
    %c0_74 = arith.constant 0 : index
    %148 = vector.load %arg11[%c6, %c0_73, %c0_74] : memref<7x128x128xf32, #tpu.memory_space<vmem>>, vector<1x128x128xf32>
    %149 = vector.shape_cast %148 : vector<1x128x128xf32> to vector<128x128xf32>
    %cst_75 = arith.constant dense<0.000000e+00> : vector<16x128xf32>
    %150 = tpu.matmul %147, %149, %cst_75 {dimension_numbers = #tpu.dot_dimension_numbers<[1], [0], [0], [1], [0, 0, 1, 1], [], []>} : vector<16x128xf32>, vector<128x128xf32>, vector<16x128xf32> -> vector<16x128xf32>
    %151 = arith.addf %132, %150 : vector<16x128xf32>
    %cst_76 = arith.constant 0.000000e+00 : f32
    %152 = vector.broadcast %cst_76 : f32 to vector<16x128xf32>
    %153 = arith.cmpf oge, %151, %152 : vector<16x128xf32>
    %cst_77 = arith.constant 1.000000e-01 : f32
    %154 = vector.broadcast %cst_77 : f32 to vector<16x128xf32>
    %155 = arith.mulf %154, %151 : vector<16x128xf32>
    %156 = arith.select %153, %151, %155 : vector<16x128xi1>, vector<16x128xf32>
    %cst_78 = arith.constant 0.000000e+00 : f32
    %157 = vector.broadcast %cst_78 : f32 to vector<16x128xf32>
    %c0_79 = arith.constant 0 : index
    %c0_80 = arith.constant 0 : index
    %158 = vector.load %arg14[%c0_79, %c0_80] : memref<1x128xf32, #tpu.memory_space<vmem>>, vector<1x128xf32>
    %159 = vector.broadcast %158 : vector<1x128xf32> to vector<16x128xf32>
    %160 = arith.addf %157, %159 : vector<16x128xf32>
    %c1_i32_81 = arith.constant 1 : i32
    %161 = tpu.dynamic_rotate %156 by %c1_i32_81 dim 0 : vector<16x128xf32>, i32 -> vector<16x128xf32>
    %162 = tpu.iota {dimensions = array<i32: 0>} : vector<16x1xi32>
    %c-1_i32_82 = arith.constant -1 : i32
    %163 = vector.broadcast %c-1_i32_82 : i32 to vector<16x1xi32>
    %164 = arith.addi %162, %163 : vector<16x1xi32>
    %c0_i32_83 = arith.constant 0 : i32
    %165 = vector.broadcast %c0_i32_83 : i32 to vector<16x1xi32>
    %166 = arith.cmpi sge, %164, %165 : vector<16x1xi32>
    %c-1_i32_84 = arith.constant -1 : i32
    %167 = vector.broadcast %c-1_i32_84 : i32 to vector<16x1xi32>
    %168 = arith.addi %162, %167 : vector<16x1xi32>
    %c16_i32_85 = arith.constant 16 : i32
    %169 = vector.broadcast %c16_i32_85 : i32 to vector<16x1xi32>
    %170 = arith.cmpi slt, %168, %169 : vector<16x1xi32>
    %171 = arith.andi %166, %170 : vector<16x1xi1>
    %cst_86 = arith.constant 0.000000e+00 : f32
    %172 = vector.shape_cast %171 : vector<16x1xi1> to vector<16x1xi1>
    %173 = vector.broadcast %172 : vector<16x1xi1> to vector<16x128xi1>
    %174 = vector.broadcast %cst_86 : f32 to vector<16x128xf32>
    %175 = arith.select %173, %161, %174 : vector<16x128xi1>, vector<16x128xf32>
    %c1_87 = arith.constant 1 : index
    %c0_88 = arith.constant 0 : index
    %c0_89 = arith.constant 0 : index
    %176 = vector.load %arg13[%c1_87, %c0_88, %c0_89] : memref<8x128x128xf32, #tpu.memory_space<vmem>>, vector<1x128x128xf32>
    %177 = vector.shape_cast %176 : vector<1x128x128xf32> to vector<128x128xf32>
    %cst_90 = arith.constant dense<0.000000e+00> : vector<16x128xf32>
    %178 = tpu.matmul %175, %177, %cst_90 {dimension_numbers = #tpu.dot_dimension_numbers<[1], [0], [0], [1], [0, 0, 1, 1], [], []>} : vector<16x128xf32>, vector<128x128xf32>, vector<16x128xf32> -> vector<16x128xf32>
    %179 = arith.addf %160, %178 : vector<16x128xf32>
    %c5_91 = arith.constant 5 : index
    %c0_92 = arith.constant 0 : index
    %c0_93 = arith.constant 0 : index
    %180 = vector.load %arg13[%c5_91, %c0_92, %c0_93] : memref<8x128x128xf32, #tpu.memory_space<vmem>>, vector<1x128x128xf32>
    %181 = vector.shape_cast %180 : vector<1x128x128xf32> to vector<128x128xf32>
    %cst_94 = arith.constant dense<0.000000e+00> : vector<16x128xf32>
    %182 = tpu.matmul %156, %181, %cst_94 {dimension_numbers = #tpu.dot_dimension_numbers<[1], [0], [0], [1], [0, 0, 1, 1], [], []>} : vector<16x128xf32>, vector<128x128xf32>, vector<16x128xf32> -> vector<16x128xf32>
    %183 = arith.addf %179, %182 : vector<16x128xf32>
    %cst_95 = arith.constant 0.000000e+00 : f32
    %184 = vector.broadcast %cst_95 : f32 to vector<16x128xf32>
    %185 = arith.cmpf oge, %183, %184 : vector<16x128xf32>
    %cst_96 = arith.constant 1.000000e-01 : f32
    %186 = vector.broadcast %cst_96 : f32 to vector<16x128xf32>
    %187 = arith.mulf %186, %183 : vector<16x128xf32>
    %188 = arith.select %185, %183, %187 : vector<16x128xi1>, vector<16x128xf32>
    %cst_97 = arith.constant 0.000000e+00 : f32
    %189 = vector.broadcast %cst_97 : f32 to vector<16x128xf32>
    %c0_98 = arith.constant 0 : index
    %c0_99 = arith.constant 0 : index
    %190 = vector.load %arg14[%c0_98, %c0_99] : memref<1x128xf32, #tpu.memory_space<vmem>>, vector<1x128xf32>
    %191 = vector.broadcast %190 : vector<1x128xf32> to vector<16x128xf32>
    %192 = arith.addf %189, %191 : vector<16x128xf32>
    %c1_i32_100 = arith.constant 1 : i32
    %193 = tpu.dynamic_rotate %156 by %c1_i32_100 dim 0 : vector<16x128xf32>, i32 -> vector<16x128xf32>
    %194 = tpu.iota {dimensions = array<i32: 0>} : vector<16x1xi32>
    %c-1_i32_101 = arith.constant -1 : i32
    %195 = vector.broadcast %c-1_i32_101 : i32 to vector<16x1xi32>
    %196 = arith.addi %194, %195 : vector<16x1xi32>
    %c0_i32_102 = arith.constant 0 : i32
    %197 = vector.broadcast %c0_i32_102 : i32 to vector<16x1xi32>
    %198 = arith.cmpi sge, %196, %197 : vector<16x1xi32>
    %c-1_i32_103 = arith.constant -1 : i32
    %199 = vector.broadcast %c-1_i32_103 : i32 to vector<16x1xi32>
    %200 = arith.addi %194, %199 : vector<16x1xi32>
    %c16_i32_104 = arith.constant 16 : i32
    %201 = vector.broadcast %c16_i32_104 : i32 to vector<16x1xi32>
    %202 = arith.cmpi slt, %200, %201 : vector<16x1xi32>
    %203 = arith.andi %198, %202 : vector<16x1xi1>
    %cst_105 = arith.constant 0.000000e+00 : f32
    %204 = vector.shape_cast %203 : vector<16x1xi1> to vector<16x1xi1>
    %205 = vector.broadcast %204 : vector<16x1xi1> to vector<16x128xi1>
    %206 = vector.broadcast %cst_105 : f32 to vector<16x128xf32>
    %207 = arith.select %205, %193, %206 : vector<16x128xi1>, vector<16x128xf32>
    %c0_106 = arith.constant 0 : index
    %c0_107 = arith.constant 0 : index
    %c0_108 = arith.constant 0 : index
    %208 = vector.load %arg13[%c0_106, %c0_107, %c0_108] : memref<8x128x128xf32, #tpu.memory_space<vmem>>, vector<1x128x128xf32>
    %209 = vector.shape_cast %208 : vector<1x128x128xf32> to vector<128x128xf32>
    %cst_109 = arith.constant dense<0.000000e+00> : vector<16x128xf32>
    %210 = tpu.matmul %207, %209, %cst_109 {dimension_numbers = #tpu.dot_dimension_numbers<[1], [0], [0], [1], [0, 0, 1, 1], [], []>} : vector<16x128xf32>, vector<128x128xf32>, vector<16x128xf32> -> vector<16x128xf32>
    %211 = arith.addf %192, %210 : vector<16x128xf32>
    %c4_110 = arith.constant 4 : index
    %c0_111 = arith.constant 0 : index
    %c0_112 = arith.constant 0 : index
    %212 = vector.load %arg13[%c4_110, %c0_111, %c0_112] : memref<8x128x128xf32, #tpu.memory_space<vmem>>, vector<1x128x128xf32>
    %213 = vector.shape_cast %212 : vector<1x128x128xf32> to vector<128x128xf32>
    %cst_113 = arith.constant dense<0.000000e+00> : vector<16x128xf32>
    %214 = tpu.matmul %156, %213, %cst_113 {dimension_numbers = #tpu.dot_dimension_numbers<[1], [0], [0], [1], [0, 0, 1, 1], [], []>} : vector<16x128xf32>, vector<128x128xf32>, vector<16x128xf32> -> vector<16x128xf32>
    %215 = arith.addf %211, %214 : vector<16x128xf32>
    %cst_114 = arith.constant 0.000000e+00 : f32
    %216 = vector.broadcast %cst_114 : f32 to vector<16x128xf32>
    %217 = arith.cmpf oge, %215, %216 : vector<16x128xf32>
    %cst_115 = arith.constant 1.000000e-01 : f32
    %218 = vector.broadcast %cst_115 : f32 to vector<16x128xf32>
    %219 = arith.mulf %218, %215 : vector<16x128xf32>
    %220 = arith.select %217, %215, %219 : vector<16x128xi1>, vector<16x128xf32>
    %cst_116 = arith.constant 0.000000e+00 : f32
    %221 = vector.broadcast %cst_116 : f32 to vector<16x128xf32>
    %c0_117 = arith.constant 0 : index
    %c0_118 = arith.constant 0 : index
    %222 = vector.load %arg14[%c0_117, %c0_118] : memref<1x128xf32, #tpu.memory_space<vmem>>, vector<1x128xf32>
    %223 = vector.broadcast %222 : vector<1x128xf32> to vector<16x128xf32>
    %224 = arith.addf %221, %223 : vector<16x128xf32>
    %c3_119 = arith.constant 3 : index
    %c0_120 = arith.constant 0 : index
    %c0_121 = arith.constant 0 : index
    %225 = vector.load %arg13[%c3_119, %c0_120, %c0_121] : memref<8x128x128xf32, #tpu.memory_space<vmem>>, vector<1x128x128xf32>
    %226 = vector.shape_cast %225 : vector<1x128x128xf32> to vector<128x128xf32>
    %cst_122 = arith.constant dense<0.000000e+00> : vector<16x128xf32>
    %227 = tpu.matmul %156, %226, %cst_122 {dimension_numbers = #tpu.dot_dimension_numbers<[1], [0], [0], [1], [0, 0, 1, 1], [], []>} : vector<16x128xf32>, vector<128x128xf32>, vector<16x128xf32> -> vector<16x128xf32>
    %228 = arith.addf %224, %227 : vector<16x128xf32>
    %c15_i32_123 = arith.constant 15 : i32
    %229 = tpu.dynamic_rotate %156 by %c15_i32_123 dim 0 : vector<16x128xf32>, i32 -> vector<16x128xf32>
    %230 = tpu.iota {dimensions = array<i32: 0>} : vector<16x1xi32>
    %c1_i32_124 = arith.constant 1 : i32
    %231 = vector.broadcast %c1_i32_124 : i32 to vector<16x1xi32>
    %232 = arith.addi %230, %231 : vector<16x1xi32>
    %c0_i32_125 = arith.constant 0 : i32
    %233 = vector.broadcast %c0_i32_125 : i32 to vector<16x1xi32>
    %234 = arith.cmpi sge, %232, %233 : vector<16x1xi32>
    %c1_i32_126 = arith.constant 1 : i32
    %235 = vector.broadcast %c1_i32_126 : i32 to vector<16x1xi32>
    %236 = arith.addi %230, %235 : vector<16x1xi32>
    %c16_i32_127 = arith.constant 16 : i32
    %237 = vector.broadcast %c16_i32_127 : i32 to vector<16x1xi32>
    %238 = arith.cmpi slt, %236, %237 : vector<16x1xi32>
    %239 = arith.andi %234, %238 : vector<16x1xi1>
    %cst_128 = arith.constant 0.000000e+00 : f32
    %240 = vector.shape_cast %239 : vector<16x1xi1> to vector<16x1xi1>
    %241 = vector.broadcast %240 : vector<16x1xi1> to vector<16x128xi1>
    %242 = vector.broadcast %cst_128 : f32 to vector<16x128xf32>
    %243 = arith.select %241, %229, %242 : vector<16x128xi1>, vector<16x128xf32>
    %c7 = arith.constant 7 : index
    %c0_129 = arith.constant 0 : index
    %c0_130 = arith.constant 0 : index
    %244 = vector.load %arg13[%c7, %c0_129, %c0_130] : memref<8x128x128xf32, #tpu.memory_space<vmem>>, vector<1x128x128xf32>
    %245 = vector.shape_cast %244 : vector<1x128x128xf32> to vector<128x128xf32>
    %cst_131 = arith.constant dense<0.000000e+00> : vector<16x128xf32>
    %246 = tpu.matmul %243, %245, %cst_131 {dimension_numbers = #tpu.dot_dimension_numbers<[1], [0], [0], [1], [0, 0, 1, 1], [], []>} : vector<16x128xf32>, vector<128x128xf32>, vector<16x128xf32> -> vector<16x128xf32>
    %247 = arith.addf %228, %246 : vector<16x128xf32>
    %cst_132 = arith.constant 0.000000e+00 : f32
    %248 = vector.broadcast %cst_132 : f32 to vector<16x128xf32>
    %249 = arith.cmpf oge, %247, %248 : vector<16x128xf32>
    %cst_133 = arith.constant 1.000000e-01 : f32
    %250 = vector.broadcast %cst_133 : f32 to vector<16x128xf32>
    %251 = arith.mulf %250, %247 : vector<16x128xf32>
    %252 = arith.select %249, %247, %251 : vector<16x128xi1>, vector<16x128xf32>
    %cst_134 = arith.constant 0.000000e+00 : f32
    %253 = vector.broadcast %cst_134 : f32 to vector<16x128xf32>
    %c0_135 = arith.constant 0 : index
    %c0_136 = arith.constant 0 : index
    %254 = vector.load %arg14[%c0_135, %c0_136] : memref<1x128xf32, #tpu.memory_space<vmem>>, vector<1x128xf32>
    %255 = vector.broadcast %254 : vector<1x128xf32> to vector<16x128xf32>
    %256 = arith.addf %253, %255 : vector<16x128xf32>
    %c2_137 = arith.constant 2 : index
    %c0_138 = arith.constant 0 : index
    %c0_139 = arith.constant 0 : index
    %257 = vector.load %arg13[%c2_137, %c0_138, %c0_139] : memref<8x128x128xf32, #tpu.memory_space<vmem>>, vector<1x128x128xf32>
    %258 = vector.shape_cast %257 : vector<1x128x128xf32> to vector<128x128xf32>
    %cst_140 = arith.constant dense<0.000000e+00> : vector<16x128xf32>
    %259 = tpu.matmul %156, %258, %cst_140 {dimension_numbers = #tpu.dot_dimension_numbers<[1], [0], [0], [1], [0, 0, 1, 1], [], []>} : vector<16x128xf32>, vector<128x128xf32>, vector<16x128xf32> -> vector<16x128xf32>
    %260 = arith.addf %256, %259 : vector<16x128xf32>
    %c15_i32_141 = arith.constant 15 : i32
    %261 = tpu.dynamic_rotate %156 by %c15_i32_141 dim 0 : vector<16x128xf32>, i32 -> vector<16x128xf32>
    %262 = tpu.iota {dimensions = array<i32: 0>} : vector<16x1xi32>
    %c1_i32_142 = arith.constant 1 : i32
    %263 = vector.broadcast %c1_i32_142 : i32 to vector<16x1xi32>
    %264 = arith.addi %262, %263 : vector<16x1xi32>
    %c0_i32_143 = arith.constant 0 : i32
    %265 = vector.broadcast %c0_i32_143 : i32 to vector<16x1xi32>
    %266 = arith.cmpi sge, %264, %265 : vector<16x1xi32>
    %c1_i32_144 = arith.constant 1 : i32
    %267 = vector.broadcast %c1_i32_144 : i32 to vector<16x1xi32>
    %268 = arith.addi %262, %267 : vector<16x1xi32>
    %c16_i32_145 = arith.constant 16 : i32
    %269 = vector.broadcast %c16_i32_145 : i32 to vector<16x1xi32>
    %270 = arith.cmpi slt, %268, %269 : vector<16x1xi32>
    %271 = arith.andi %266, %270 : vector<16x1xi1>
    %cst_146 = arith.constant 0.000000e+00 : f32
    %272 = vector.shape_cast %271 : vector<16x1xi1> to vector<16x1xi1>
    %273 = vector.broadcast %272 : vector<16x1xi1> to vector<16x128xi1>
    %274 = vector.broadcast %cst_146 : f32 to vector<16x128xf32>
    %275 = arith.select %273, %261, %274 : vector<16x128xi1>, vector<16x128xf32>
    %c6_147 = arith.constant 6 : index
    %c0_148 = arith.constant 0 : index
    %c0_149 = arith.constant 0 : index
    %276 = vector.load %arg13[%c6_147, %c0_148, %c0_149] : memref<8x128x128xf32, #tpu.memory_space<vmem>>, vector<1x128x128xf32>
    %277 = vector.shape_cast %276 : vector<1x128x128xf32> to vector<128x128xf32>
    %cst_150 = arith.constant dense<0.000000e+00> : vector<16x128xf32>
    %278 = tpu.matmul %275, %277, %cst_150 {dimension_numbers = #tpu.dot_dimension_numbers<[1], [0], [0], [1], [0, 0, 1, 1], [], []>} : vector<16x128xf32>, vector<128x128xf32>, vector<16x128xf32> -> vector<16x128xf32>
    %279 = arith.addf %260, %278 : vector<16x128xf32>
    %cst_151 = arith.constant 0.000000e+00 : f32
    %280 = vector.broadcast %cst_151 : f32 to vector<16x128xf32>
    %281 = arith.cmpf oge, %279, %280 : vector<16x128xf32>
    %cst_152 = arith.constant 1.000000e-01 : f32
    %282 = vector.broadcast %cst_152 : f32 to vector<16x128xf32>
    %283 = arith.mulf %282, %279 : vector<16x128xf32>
    %284 = arith.select %281, %279, %283 : vector<16x128xi1>, vector<16x128xf32>
    %cst_153 = arith.constant 0.000000e+00 : f32
    %285 = vector.broadcast %cst_153 : f32 to vector<16x128xf32>
    %c0_154 = arith.constant 0 : index
    %c0_155 = arith.constant 0 : index
    %286 = vector.load %arg16[%c0_154, %c0_155] : memref<1x128xf32, #tpu.memory_space<vmem>>, vector<1x128xf32>
    %287 = vector.broadcast %286 : vector<1x128xf32> to vector<16x128xf32>
    %288 = arith.addf %285, %287 : vector<16x128xf32>
    %c1_i32_156 = arith.constant 1 : i32
    %289 = tpu.dynamic_rotate %284 by %c1_i32_156 dim 0 : vector<16x128xf32>, i32 -> vector<16x128xf32>
    %290 = tpu.iota {dimensions = array<i32: 0>} : vector<16x1xi32>
    %c-1_i32_157 = arith.constant -1 : i32
    %291 = vector.broadcast %c-1_i32_157 : i32 to vector<16x1xi32>
    %292 = arith.addi %290, %291 : vector<16x1xi32>
    %c0_i32_158 = arith.constant 0 : i32
    %293 = vector.broadcast %c0_i32_158 : i32 to vector<16x1xi32>
    %294 = arith.cmpi sge, %292, %293 : vector<16x1xi32>
    %c-1_i32_159 = arith.constant -1 : i32
    %295 = vector.broadcast %c-1_i32_159 : i32 to vector<16x1xi32>
    %296 = arith.addi %290, %295 : vector<16x1xi32>
    %c16_i32_160 = arith.constant 16 : i32
    %297 = vector.broadcast %c16_i32_160 : i32 to vector<16x1xi32>
    %298 = arith.cmpi slt, %296, %297 : vector<16x1xi32>
    %299 = arith.andi %294, %298 : vector<16x1xi1>
    %cst_161 = arith.constant 0.000000e+00 : f32
    %300 = vector.shape_cast %299 : vector<16x1xi1> to vector<16x1xi1>
    %301 = vector.broadcast %300 : vector<16x1xi1> to vector<16x128xi1>
    %302 = vector.broadcast %cst_161 : f32 to vector<16x128xf32>
    %303 = arith.select %301, %289, %302 : vector<16x128xi1>, vector<16x128xf32>
    %c0_162 = arith.constant 0 : index
    %c0_163 = arith.constant 0 : index
    %c0_164 = arith.constant 0 : index
    %304 = vector.load %arg15[%c0_162, %c0_163, %c0_164] : memref<3x128x128xf32, #tpu.memory_space<vmem>>, vector<1x128x128xf32>
    %305 = vector.shape_cast %304 : vector<1x128x128xf32> to vector<128x128xf32>
    %cst_165 = arith.constant dense<0.000000e+00> : vector<16x128xf32>
    %306 = tpu.matmul %303, %305, %cst_165 {dimension_numbers = #tpu.dot_dimension_numbers<[1], [0], [0], [1], [0, 0, 1, 1], [], []>} : vector<16x128xf32>, vector<128x128xf32>, vector<16x128xf32> -> vector<16x128xf32>
    %307 = arith.addf %288, %306 : vector<16x128xf32>
    %c1_166 = arith.constant 1 : index
    %c0_167 = arith.constant 0 : index
    %c0_168 = arith.constant 0 : index
    %308 = vector.load %arg15[%c1_166, %c0_167, %c0_168] : memref<3x128x128xf32, #tpu.memory_space<vmem>>, vector<1x128x128xf32>
    %309 = vector.shape_cast %308 : vector<1x128x128xf32> to vector<128x128xf32>
    %cst_169 = arith.constant dense<0.000000e+00> : vector<16x128xf32>
    %310 = tpu.matmul %188, %309, %cst_169 {dimension_numbers = #tpu.dot_dimension_numbers<[1], [0], [0], [1], [0, 0, 1, 1], [], []>} : vector<16x128xf32>, vector<128x128xf32>, vector<16x128xf32> -> vector<16x128xf32>
    %311 = arith.addf %307, %310 : vector<16x128xf32>
    %c2_170 = arith.constant 2 : index
    %c0_171 = arith.constant 0 : index
    %c0_172 = arith.constant 0 : index
    %312 = vector.load %arg15[%c2_170, %c0_171, %c0_172] : memref<3x128x128xf32, #tpu.memory_space<vmem>>, vector<1x128x128xf32>
    %313 = vector.shape_cast %312 : vector<1x128x128xf32> to vector<128x128xf32>
    %cst_173 = arith.constant dense<0.000000e+00> : vector<16x128xf32>
    %314 = tpu.matmul %220, %313, %cst_173 {dimension_numbers = #tpu.dot_dimension_numbers<[1], [0], [0], [1], [0, 0, 1, 1], [], []>} : vector<16x128xf32>, vector<128x128xf32>, vector<16x128xf32> -> vector<16x128xf32>
    %315 = arith.addf %311, %314 : vector<16x128xf32>
    %cst_174 = arith.constant 0.000000e+00 : f32
    %316 = vector.broadcast %cst_174 : f32 to vector<16x128xf32>
    %317 = arith.cmpf oge, %315, %316 : vector<16x128xf32>
    %cst_175 = arith.constant 1.000000e-01 : f32
    %318 = vector.broadcast %cst_175 : f32 to vector<16x128xf32>
    %319 = arith.mulf %318, %315 : vector<16x128xf32>
    %320 = arith.select %317, %315, %319 : vector<16x128xi1>, vector<16x128xf32>
    %321 = arith.addf %188, %320 : vector<16x128xf32>
    %cst_176 = arith.constant 0.000000e+00 : f32
    %322 = vector.broadcast %cst_176 : f32 to vector<16x128xf32>
    %c0_177 = arith.constant 0 : index
    %c0_178 = arith.constant 0 : index
    %323 = vector.load %arg16[%c0_177, %c0_178] : memref<1x128xf32, #tpu.memory_space<vmem>>, vector<1x128xf32>
    %324 = vector.broadcast %323 : vector<1x128xf32> to vector<16x128xf32>
    %325 = arith.addf %322, %324 : vector<16x128xf32>
    %c0_179 = arith.constant 0 : index
    %c0_180 = arith.constant 0 : index
    %c0_181 = arith.constant 0 : index
    %326 = vector.load %arg15[%c0_179, %c0_180, %c0_181] : memref<3x128x128xf32, #tpu.memory_space<vmem>>, vector<1x128x128xf32>
    %327 = vector.shape_cast %326 : vector<1x128x128xf32> to vector<128x128xf32>
    %cst_182 = arith.constant dense<0.000000e+00> : vector<16x128xf32>
    %328 = tpu.matmul %188, %327, %cst_182 {dimension_numbers = #tpu.dot_dimension_numbers<[1], [0], [0], [1], [0, 0, 1, 1], [], []>} : vector<16x128xf32>, vector<128x128xf32>, vector<16x128xf32> -> vector<16x128xf32>
    %329 = arith.addf %325, %328 : vector<16x128xf32>
    %c1_183 = arith.constant 1 : index
    %c0_184 = arith.constant 0 : index
    %c0_185 = arith.constant 0 : index
    %330 = vector.load %arg15[%c1_183, %c0_184, %c0_185] : memref<3x128x128xf32, #tpu.memory_space<vmem>>, vector<1x128x128xf32>
    %331 = vector.shape_cast %330 : vector<1x128x128xf32> to vector<128x128xf32>
    %cst_186 = arith.constant dense<0.000000e+00> : vector<16x128xf32>
    %332 = tpu.matmul %220, %331, %cst_186 {dimension_numbers = #tpu.dot_dimension_numbers<[1], [0], [0], [1], [0, 0, 1, 1], [], []>} : vector<16x128xf32>, vector<128x128xf32>, vector<16x128xf32> -> vector<16x128xf32>
    %333 = arith.addf %329, %332 : vector<16x128xf32>
    %c2_187 = arith.constant 2 : index
    %c0_188 = arith.constant 0 : index
    %c0_189 = arith.constant 0 : index
    %334 = vector.load %arg15[%c2_187, %c0_188, %c0_189] : memref<3x128x128xf32, #tpu.memory_space<vmem>>, vector<1x128x128xf32>
    %335 = vector.shape_cast %334 : vector<1x128x128xf32> to vector<128x128xf32>
    %cst_190 = arith.constant dense<0.000000e+00> : vector<16x128xf32>
    %336 = tpu.matmul %252, %335, %cst_190 {dimension_numbers = #tpu.dot_dimension_numbers<[1], [0], [0], [1], [0, 0, 1, 1], [], []>} : vector<16x128xf32>, vector<128x128xf32>, vector<16x128xf32> -> vector<16x128xf32>
    %337 = arith.addf %333, %336 : vector<16x128xf32>
    %cst_191 = arith.constant 0.000000e+00 : f32
    %338 = vector.broadcast %cst_191 : f32 to vector<16x128xf32>
    %339 = arith.cmpf oge, %337, %338 : vector<16x128xf32>
    %cst_192 = arith.constant 1.000000e-01 : f32
    %340 = vector.broadcast %cst_192 : f32 to vector<16x128xf32>
    %341 = arith.mulf %340, %337 : vector<16x128xf32>
    %342 = arith.select %339, %337, %341 : vector<16x128xi1>, vector<16x128xf32>
    %343 = arith.addf %220, %342 : vector<16x128xf32>
    %cst_193 = arith.constant 0.000000e+00 : f32
    %344 = vector.broadcast %cst_193 : f32 to vector<16x128xf32>
    %c0_194 = arith.constant 0 : index
    %c0_195 = arith.constant 0 : index
    %345 = vector.load %arg16[%c0_194, %c0_195] : memref<1x128xf32, #tpu.memory_space<vmem>>, vector<1x128xf32>
    %346 = vector.broadcast %345 : vector<1x128xf32> to vector<16x128xf32>
    %347 = arith.addf %344, %346 : vector<16x128xf32>
    %c0_196 = arith.constant 0 : index
    %c0_197 = arith.constant 0 : index
    %c0_198 = arith.constant 0 : index
    %348 = vector.load %arg15[%c0_196, %c0_197, %c0_198] : memref<3x128x128xf32, #tpu.memory_space<vmem>>, vector<1x128x128xf32>
    %349 = vector.shape_cast %348 : vector<1x128x128xf32> to vector<128x128xf32>
    %cst_199 = arith.constant dense<0.000000e+00> : vector<16x128xf32>
    %350 = tpu.matmul %220, %349, %cst_199 {dimension_numbers = #tpu.dot_dimension_numbers<[1], [0], [0], [1], [0, 0, 1, 1], [], []>} : vector<16x128xf32>, vector<128x128xf32>, vector<16x128xf32> -> vector<16x128xf32>
    %351 = arith.addf %347, %350 : vector<16x128xf32>
    %c1_200 = arith.constant 1 : index
    %c0_201 = arith.constant 0 : index
    %c0_202 = arith.constant 0 : index
    %352 = vector.load %arg15[%c1_200, %c0_201, %c0_202] : memref<3x128x128xf32, #tpu.memory_space<vmem>>, vector<1x128x128xf32>
    %353 = vector.shape_cast %352 : vector<1x128x128xf32> to vector<128x128xf32>
    %cst_203 = arith.constant dense<0.000000e+00> : vector<16x128xf32>
    %354 = tpu.matmul %252, %353, %cst_203 {dimension_numbers = #tpu.dot_dimension_numbers<[1], [0], [0], [1], [0, 0, 1, 1], [], []>} : vector<16x128xf32>, vector<128x128xf32>, vector<16x128xf32> -> vector<16x128xf32>
    %355 = arith.addf %351, %354 : vector<16x128xf32>
    %c2_204 = arith.constant 2 : index
    %c0_205 = arith.constant 0 : index
    %c0_206 = arith.constant 0 : index
    %356 = vector.load %arg15[%c2_204, %c0_205, %c0_206] : memref<3x128x128xf32, #tpu.memory_space<vmem>>, vector<1x128x128xf32>
    %357 = vector.shape_cast %356 : vector<1x128x128xf32> to vector<128x128xf32>
    %cst_207 = arith.constant dense<0.000000e+00> : vector<16x128xf32>
    %358 = tpu.matmul %284, %357, %cst_207 {dimension_numbers = #tpu.dot_dimension_numbers<[1], [0], [0], [1], [0, 0, 1, 1], [], []>} : vector<16x128xf32>, vector<128x128xf32>, vector<16x128xf32> -> vector<16x128xf32>
    %359 = arith.addf %355, %358 : vector<16x128xf32>
    %cst_208 = arith.constant 0.000000e+00 : f32
    %360 = vector.broadcast %cst_208 : f32 to vector<16x128xf32>
    %361 = arith.cmpf oge, %359, %360 : vector<16x128xf32>
    %cst_209 = arith.constant 1.000000e-01 : f32
    %362 = vector.broadcast %cst_209 : f32 to vector<16x128xf32>
    %363 = arith.mulf %362, %359 : vector<16x128xf32>
    %364 = arith.select %361, %359, %363 : vector<16x128xi1>, vector<16x128xf32>
    %365 = arith.addf %252, %364 : vector<16x128xf32>
    %cst_210 = arith.constant 0.000000e+00 : f32
    %366 = vector.broadcast %cst_210 : f32 to vector<16x128xf32>
    %c0_211 = arith.constant 0 : index
    %c0_212 = arith.constant 0 : index
    %367 = vector.load %arg16[%c0_211, %c0_212] : memref<1x128xf32, #tpu.memory_space<vmem>>, vector<1x128xf32>
    %368 = vector.broadcast %367 : vector<1x128xf32> to vector<16x128xf32>
    %369 = arith.addf %366, %368 : vector<16x128xf32>
    %c0_213 = arith.constant 0 : index
    %c0_214 = arith.constant 0 : index
    %c0_215 = arith.constant 0 : index
    %370 = vector.load %arg15[%c0_213, %c0_214, %c0_215] : memref<3x128x128xf32, #tpu.memory_space<vmem>>, vector<1x128x128xf32>
    %371 = vector.shape_cast %370 : vector<1x128x128xf32> to vector<128x128xf32>
    %cst_216 = arith.constant dense<0.000000e+00> : vector<16x128xf32>
    %372 = tpu.matmul %252, %371, %cst_216 {dimension_numbers = #tpu.dot_dimension_numbers<[1], [0], [0], [1], [0, 0, 1, 1], [], []>} : vector<16x128xf32>, vector<128x128xf32>, vector<16x128xf32> -> vector<16x128xf32>
    %373 = arith.addf %369, %372 : vector<16x128xf32>
    %c1_217 = arith.constant 1 : index
    %c0_218 = arith.constant 0 : index
    %c0_219 = arith.constant 0 : index
    %374 = vector.load %arg15[%c1_217, %c0_218, %c0_219] : memref<3x128x128xf32, #tpu.memory_space<vmem>>, vector<1x128x128xf32>
    %375 = vector.shape_cast %374 : vector<1x128x128xf32> to vector<128x128xf32>
    %cst_220 = arith.constant dense<0.000000e+00> : vector<16x128xf32>
    %376 = tpu.matmul %284, %375, %cst_220 {dimension_numbers = #tpu.dot_dimension_numbers<[1], [0], [0], [1], [0, 0, 1, 1], [], []>} : vector<16x128xf32>, vector<128x128xf32>, vector<16x128xf32> -> vector<16x128xf32>
    %377 = arith.addf %373, %376 : vector<16x128xf32>
    %c15_i32_221 = arith.constant 15 : i32
    %378 = tpu.dynamic_rotate %188 by %c15_i32_221 dim 0 : vector<16x128xf32>, i32 -> vector<16x128xf32>
    %379 = tpu.iota {dimensions = array<i32: 0>} : vector<16x1xi32>
    %c1_i32_222 = arith.constant 1 : i32
    %380 = vector.broadcast %c1_i32_222 : i32 to vector<16x1xi32>
    %381 = arith.addi %379, %380 : vector<16x1xi32>
    %c0_i32_223 = arith.constant 0 : i32
    %382 = vector.broadcast %c0_i32_223 : i32 to vector<16x1xi32>
    %383 = arith.cmpi sge, %381, %382 : vector<16x1xi32>
    %c1_i32_224 = arith.constant 1 : i32
    %384 = vector.broadcast %c1_i32_224 : i32 to vector<16x1xi32>
    %385 = arith.addi %379, %384 : vector<16x1xi32>
    %c16_i32_225 = arith.constant 16 : i32
    %386 = vector.broadcast %c16_i32_225 : i32 to vector<16x1xi32>
    %387 = arith.cmpi slt, %385, %386 : vector<16x1xi32>
    %388 = arith.andi %383, %387 : vector<16x1xi1>
    %cst_226 = arith.constant 0.000000e+00 : f32
    %389 = vector.shape_cast %388 : vector<16x1xi1> to vector<16x1xi1>
    %390 = vector.broadcast %389 : vector<16x1xi1> to vector<16x128xi1>
    %391 = vector.broadcast %cst_226 : f32 to vector<16x128xf32>
    %392 = arith.select %390, %378, %391 : vector<16x128xi1>, vector<16x128xf32>
    %c2_227 = arith.constant 2 : index
    %c0_228 = arith.constant 0 : index
    %c0_229 = arith.constant 0 : index
    %393 = vector.load %arg15[%c2_227, %c0_228, %c0_229] : memref<3x128x128xf32, #tpu.memory_space<vmem>>, vector<1x128x128xf32>
    %394 = vector.shape_cast %393 : vector<1x128x128xf32> to vector<128x128xf32>
    %cst_230 = arith.constant dense<0.000000e+00> : vector<16x128xf32>
    %395 = tpu.matmul %392, %394, %cst_230 {dimension_numbers = #tpu.dot_dimension_numbers<[1], [0], [0], [1], [0, 0, 1, 1], [], []>} : vector<16x128xf32>, vector<128x128xf32>, vector<16x128xf32> -> vector<16x128xf32>
    %396 = arith.addf %377, %395 : vector<16x128xf32>
    %cst_231 = arith.constant 0.000000e+00 : f32
    %397 = vector.broadcast %cst_231 : f32 to vector<16x128xf32>
    %398 = arith.cmpf oge, %396, %397 : vector<16x128xf32>
    %cst_232 = arith.constant 1.000000e-01 : f32
    %399 = vector.broadcast %cst_232 : f32 to vector<16x128xf32>
    %400 = arith.mulf %399, %396 : vector<16x128xf32>
    %401 = arith.select %398, %396, %400 : vector<16x128xi1>, vector<16x128xf32>
    %402 = arith.addf %284, %401 : vector<16x128xf32>
    %c0_233 = arith.constant 0 : index
    %c0_234 = arith.constant 0 : index
    %403 = vector.load %arg17[%c0_233, %c0_234] : memref<7x128xf32, #tpu.memory_space<vmem>>, vector<7x128xf32>
    %cst_235 = arith.constant 0.000000e+00 : f32
    %404 = vector.broadcast %cst_235 : f32 to vector<16x1xf32>
    %c0_236 = arith.constant 0 : index
    %c0_237 = arith.constant 0 : index
    %405 = vector.load %arg18[%c0_236, %c0_237] : memref<1x1xf32, #tpu.memory_space<vmem>>, vector<1x1xf32>
    %406 = vector.broadcast %405 : vector<1x1xf32> to vector<16x1xf32>
    %407 = arith.addf %404, %406 : vector<16x1xf32>
    %c1_i32_238 = arith.constant 1 : i32
    %408 = tpu.dynamic_rotate %343 by %c1_i32_238 dim 0 : vector<16x128xf32>, i32 -> vector<16x128xf32>
    %409 = tpu.iota {dimensions = array<i32: 0>} : vector<16x1xi32>
    %c-1_i32_239 = arith.constant -1 : i32
    %410 = vector.broadcast %c-1_i32_239 : i32 to vector<16x1xi32>
    %411 = arith.addi %409, %410 : vector<16x1xi32>
    %c0_i32_240 = arith.constant 0 : i32
    %412 = vector.broadcast %c0_i32_240 : i32 to vector<16x1xi32>
    %413 = arith.cmpi sge, %411, %412 : vector<16x1xi32>
    %c-1_i32_241 = arith.constant -1 : i32
    %414 = vector.broadcast %c-1_i32_241 : i32 to vector<16x1xi32>
    %415 = arith.addi %409, %414 : vector<16x1xi32>
    %c16_i32_242 = arith.constant 16 : i32
    %416 = vector.broadcast %c16_i32_242 : i32 to vector<16x1xi32>
    %417 = arith.cmpi slt, %415, %416 : vector<16x1xi32>
    %418 = arith.andi %413, %417 : vector<16x1xi1>
    %cst_243 = arith.constant 0.000000e+00 : f32
    %419 = vector.shape_cast %418 : vector<16x1xi1> to vector<16x1xi1>
    %420 = vector.broadcast %419 : vector<16x1xi1> to vector<16x128xi1>
    %421 = vector.broadcast %cst_243 : f32 to vector<16x128xf32>
    %422 = arith.select %420, %408, %421 : vector<16x128xi1>, vector<16x128xf32>
    %423 = vector.extract_strided_slice %403 {offsets = [0, 0], sizes = [1, 128], strides = [1, 1]} : vector<7x128xf32> to vector<1x128xf32>
    %424 = vector.broadcast %423 : vector<1x128xf32> to vector<16x128xf32>
    %425 = arith.mulf %422, %424 : vector<16x128xf32>
    %cst_244 = arith.constant dense<0.000000e+00> : vector<16xf32>
    %426 = vector.multi_reduction <add>, %425, %cst_244 [1] : vector<16x128xf32> to vector<16xf32>
    %427 = vector.shape_cast %426 : vector<16xf32> to vector<16x1xf32>
    %428 = arith.addf %407, %427 : vector<16x1xf32>
    %c1_i32_245 = arith.constant 1 : i32
    %429 = tpu.dynamic_rotate %365 by %c1_i32_245 dim 0 : vector<16x128xf32>, i32 -> vector<16x128xf32>
    %430 = tpu.iota {dimensions = array<i32: 0>} : vector<16x1xi32>
    %c-1_i32_246 = arith.constant -1 : i32
    %431 = vector.broadcast %c-1_i32_246 : i32 to vector<16x1xi32>
    %432 = arith.addi %430, %431 : vector<16x1xi32>
    %c0_i32_247 = arith.constant 0 : i32
    %433 = vector.broadcast %c0_i32_247 : i32 to vector<16x1xi32>
    %434 = arith.cmpi sge, %432, %433 : vector<16x1xi32>
    %c-1_i32_248 = arith.constant -1 : i32
    %435 = vector.broadcast %c-1_i32_248 : i32 to vector<16x1xi32>
    %436 = arith.addi %430, %435 : vector<16x1xi32>
    %c16_i32_249 = arith.constant 16 : i32
    %437 = vector.broadcast %c16_i32_249 : i32 to vector<16x1xi32>
    %438 = arith.cmpi slt, %436, %437 : vector<16x1xi32>
    %439 = arith.andi %434, %438 : vector<16x1xi1>
    %cst_250 = arith.constant 0.000000e+00 : f32
    %440 = vector.shape_cast %439 : vector<16x1xi1> to vector<16x1xi1>
    %441 = vector.broadcast %440 : vector<16x1xi1> to vector<16x128xi1>
    %442 = vector.broadcast %cst_250 : f32 to vector<16x128xf32>
    %443 = arith.select %441, %429, %442 : vector<16x128xi1>, vector<16x128xf32>
    %444 = vector.extract_strided_slice %403 {offsets = [1, 0], sizes = [1, 128], strides = [1, 1]} : vector<7x128xf32> to vector<1x128xf32>
    %445 = vector.broadcast %444 : vector<1x128xf32> to vector<16x128xf32>
    %446 = arith.mulf %443, %445 : vector<16x128xf32>
    %cst_251 = arith.constant dense<0.000000e+00> : vector<16xf32>
    %447 = vector.multi_reduction <add>, %446, %cst_251 [1] : vector<16x128xf32> to vector<16xf32>
    %448 = vector.shape_cast %447 : vector<16xf32> to vector<16x1xf32>
    %449 = arith.addf %428, %448 : vector<16x1xf32>
    %c1_i32_252 = arith.constant 1 : i32
    %450 = tpu.dynamic_rotate %402 by %c1_i32_252 dim 0 : vector<16x128xf32>, i32 -> vector<16x128xf32>
    %451 = tpu.iota {dimensions = array<i32: 0>} : vector<16x1xi32>
    %c-1_i32_253 = arith.constant -1 : i32
    %452 = vector.broadcast %c-1_i32_253 : i32 to vector<16x1xi32>
    %453 = arith.addi %451, %452 : vector<16x1xi32>
    %c0_i32_254 = arith.constant 0 : i32
    %454 = vector.broadcast %c0_i32_254 : i32 to vector<16x1xi32>
    %455 = arith.cmpi sge, %453, %454 : vector<16x1xi32>
    %c-1_i32_255 = arith.constant -1 : i32
    %456 = vector.broadcast %c-1_i32_255 : i32 to vector<16x1xi32>
    %457 = arith.addi %451, %456 : vector<16x1xi32>
    %c16_i32_256 = arith.constant 16 : i32
    %458 = vector.broadcast %c16_i32_256 : i32 to vector<16x1xi32>
    %459 = arith.cmpi slt, %457, %458 : vector<16x1xi32>
    %460 = arith.andi %455, %459 : vector<16x1xi1>
    %cst_257 = arith.constant 0.000000e+00 : f32
    %461 = vector.shape_cast %460 : vector<16x1xi1> to vector<16x1xi1>
    %462 = vector.broadcast %461 : vector<16x1xi1> to vector<16x128xi1>
    %463 = vector.broadcast %cst_257 : f32 to vector<16x128xf32>
    %464 = arith.select %462, %450, %463 : vector<16x128xi1>, vector<16x128xf32>
    %465 = vector.extract_strided_slice %403 {offsets = [2, 0], sizes = [1, 128], strides = [1, 1]} : vector<7x128xf32> to vector<1x128xf32>
    %466 = vector.broadcast %465 : vector<1x128xf32> to vector<16x128xf32>
    %467 = arith.mulf %464, %466 : vector<16x128xf32>
    %cst_258 = arith.constant dense<0.000000e+00> : vector<16xf32>
    %468 = vector.multi_reduction <add>, %467, %cst_258 [1] : vector<16x128xf32> to vector<16xf32>
    %469 = vector.shape_cast %468 : vector<16xf32> to vector<16x1xf32>
    %470 = arith.addf %449, %469 : vector<16x1xf32>
    %471 = vector.extract_strided_slice %403 {offsets = [3, 0], sizes = [1, 128], strides = [1, 1]} : vector<7x128xf32> to vector<1x128xf32>
    %472 = vector.broadcast %471 : vector<1x128xf32> to vector<16x128xf32>
    %473 = arith.mulf %321, %472 : vector<16x128xf32>
    %cst_259 = arith.constant dense<0.000000e+00> : vector<16xf32>
    %474 = vector.multi_reduction <add>, %473, %cst_259 [1] : vector<16x128xf32> to vector<16xf32>
    %475 = vector.shape_cast %474 : vector<16xf32> to vector<16x1xf32>
    %476 = arith.addf %470, %475 : vector<16x1xf32>
    %477 = vector.extract_strided_slice %403 {offsets = [4, 0], sizes = [1, 128], strides = [1, 1]} : vector<7x128xf32> to vector<1x128xf32>
    %478 = vector.broadcast %477 : vector<1x128xf32> to vector<16x128xf32>
    %479 = arith.mulf %343, %478 : vector<16x128xf32>
    %cst_260 = arith.constant dense<0.000000e+00> : vector<16xf32>
    %480 = vector.multi_reduction <add>, %479, %cst_260 [1] : vector<16x128xf32> to vector<16xf32>
    %481 = vector.shape_cast %480 : vector<16xf32> to vector<16x1xf32>
    %482 = arith.addf %476, %481 : vector<16x1xf32>
    %483 = vector.extract_strided_slice %403 {offsets = [5, 0], sizes = [1, 128], strides = [1, 1]} : vector<7x128xf32> to vector<1x128xf32>
    %484 = vector.broadcast %483 : vector<1x128xf32> to vector<16x128xf32>
    %485 = arith.mulf %365, %484 : vector<16x128xf32>
    %cst_261 = arith.constant dense<0.000000e+00> : vector<16xf32>
    %486 = vector.multi_reduction <add>, %485, %cst_261 [1] : vector<16x128xf32> to vector<16xf32>
    %487 = vector.shape_cast %486 : vector<16xf32> to vector<16x1xf32>
    %488 = arith.addf %482, %487 : vector<16x1xf32>
    %489 = vector.extract_strided_slice %403 {offsets = [6, 0], sizes = [1, 128], strides = [1, 1]} : vector<7x128xf32> to vector<1x128xf32>
    %490 = vector.broadcast %489 : vector<1x128xf32> to vector<16x128xf32>
    %491 = arith.mulf %402, %490 : vector<16x128xf32>
    %cst_262 = arith.constant dense<0.000000e+00> : vector<16xf32>
    %492 = vector.multi_reduction <add>, %491, %cst_262 [1] : vector<16x128xf32> to vector<16xf32>
    %493 = vector.shape_cast %492 : vector<16xf32> to vector<16x1xf32>
    %494 = arith.addf %488, %493 : vector<16x1xf32>
    %495 = math.tanh %494 : vector<16x1xf32>
    %c0_263 = arith.constant 0 : index
    %c0_264 = arith.constant 0 : index
    %c0_265 = arith.constant 0 : index
    %496 = vector.load %arg20[%c0_263, %c0_264, %c0_265] : memref<1x16x4xf32, #tpu.memory_space<vmem>>, vector<1x16x1xf32>
    %497 = vector.shape_cast %496 : vector<1x16x1xf32> to vector<16x1xf32>
    %498 = vector.shape_cast %495 : vector<16x1xf32> to vector<1x16x1xf32>
    tpu.vector_store %arg20[%c0_263, %c0_264, %c0_265], %498 {strides = array<i32>} : memref<1x16x4xf32, #tpu.memory_space<vmem>>, vector<1x16x1xf32>,
    %cst_266 = arith.constant 0.000000e+00 : f32
    %499 = vector.broadcast %cst_266 : f32 to vector<16x1xf32>
    %c0_267 = arith.constant 0 : index
    %c0_268 = arith.constant 0 : index
    %500 = vector.load %arg18[%c0_267, %c0_268] : memref<1x1xf32, #tpu.memory_space<vmem>>, vector<1x1xf32>
    %501 = vector.broadcast %500 : vector<1x1xf32> to vector<16x1xf32>
    %502 = arith.addf %499, %501 : vector<16x1xf32>
    %c1_i32_269 = arith.constant 1 : i32
    %503 = tpu.dynamic_rotate %365 by %c1_i32_269 dim 0 : vector<16x128xf32>, i32 -> vector<16x128xf32>
    %504 = tpu.iota {dimensions = array<i32: 0>} : vector<16x1xi32>
    %c-1_i32_270 = arith.constant -1 : i32
    %505 = vector.broadcast %c-1_i32_270 : i32 to vector<16x1xi32>
    %506 = arith.addi %504, %505 : vector<16x1xi32>
    %c0_i32_271 = arith.constant 0 : i32
    %507 = vector.broadcast %c0_i32_271 : i32 to vector<16x1xi32>
    %508 = arith.cmpi sge, %506, %507 : vector<16x1xi32>
    %c-1_i32_272 = arith.constant -1 : i32
    %509 = vector.broadcast %c-1_i32_272 : i32 to vector<16x1xi32>
    %510 = arith.addi %504, %509 : vector<16x1xi32>
    %c16_i32_273 = arith.constant 16 : i32
    %511 = vector.broadcast %c16_i32_273 : i32 to vector<16x1xi32>
    %512 = arith.cmpi slt, %510, %511 : vector<16x1xi32>
    %513 = arith.andi %508, %512 : vector<16x1xi1>
    %cst_274 = arith.constant 0.000000e+00 : f32
    %514 = vector.shape_cast %513 : vector<16x1xi1> to vector<16x1xi1>
    %515 = vector.broadcast %514 : vector<16x1xi1> to vector<16x128xi1>
    %516 = vector.broadcast %cst_274 : f32 to vector<16x128xf32>
    %517 = arith.select %515, %503, %516 : vector<16x128xi1>, vector<16x128xf32>
    %518 = vector.extract_strided_slice %403 {offsets = [0, 0], sizes = [1, 128], strides = [1, 1]} : vector<7x128xf32> to vector<1x128xf32>
    %519 = vector.broadcast %518 : vector<1x128xf32> to vector<16x128xf32>
    %520 = arith.mulf %517, %519 : vector<16x128xf32>
    %cst_275 = arith.constant dense<0.000000e+00> : vector<16xf32>
    %521 = vector.multi_reduction <add>, %520, %cst_275 [1] : vector<16x128xf32> to vector<16xf32>
    %522 = vector.shape_cast %521 : vector<16xf32> to vector<16x1xf32>
    %523 = arith.addf %502, %522 : vector<16x1xf32>
    %c1_i32_276 = arith.constant 1 : i32
    %524 = tpu.dynamic_rotate %402 by %c1_i32_276 dim 0 : vector<16x128xf32>, i32 -> vector<16x128xf32>
    %525 = tpu.iota {dimensions = array<i32: 0>} : vector<16x1xi32>
    %c-1_i32_277 = arith.constant -1 : i32
    %526 = vector.broadcast %c-1_i32_277 : i32 to vector<16x1xi32>
    %527 = arith.addi %525, %526 : vector<16x1xi32>
    %c0_i32_278 = arith.constant 0 : i32
    %528 = vector.broadcast %c0_i32_278 : i32 to vector<16x1xi32>
    %529 = arith.cmpi sge, %527, %528 : vector<16x1xi32>
    %c-1_i32_279 = arith.constant -1 : i32
    %530 = vector.broadcast %c-1_i32_279 : i32 to vector<16x1xi32>
    %531 = arith.addi %525, %530 : vector<16x1xi32>
    %c16_i32_280 = arith.constant 16 : i32
    %532 = vector.broadcast %c16_i32_280 : i32 to vector<16x1xi32>
    %533 = arith.cmpi slt, %531, %532 : vector<16x1xi32>
    %534 = arith.andi %529, %533 : vector<16x1xi1>
    %cst_281 = arith.constant 0.000000e+00 : f32
    %535 = vector.shape_cast %534 : vector<16x1xi1> to vector<16x1xi1>
    %536 = vector.broadcast %535 : vector<16x1xi1> to vector<16x128xi1>
    %537 = vector.broadcast %cst_281 : f32 to vector<16x128xf32>
    %538 = arith.select %536, %524, %537 : vector<16x128xi1>, vector<16x128xf32>
    %539 = vector.extract_strided_slice %403 {offsets = [1, 0], sizes = [1, 128], strides = [1, 1]} : vector<7x128xf32> to vector<1x128xf32>
    %540 = vector.broadcast %539 : vector<1x128xf32> to vector<16x128xf32>
    %541 = arith.mulf %538, %540 : vector<16x128xf32>
    %cst_282 = arith.constant dense<0.000000e+00> : vector<16xf32>
    %542 = vector.multi_reduction <add>, %541, %cst_282 [1] : vector<16x128xf32> to vector<16xf32>
    %543 = vector.shape_cast %542 : vector<16xf32> to vector<16x1xf32>
    %544 = arith.addf %523, %543 : vector<16x1xf32>
    %545 = vector.extract_strided_slice %403 {offsets = [2, 0], sizes = [1, 128], strides = [1, 1]} : vector<7x128xf32> to vector<1x128xf32>
    %546 = vector.broadcast %545 : vector<1x128xf32> to vector<16x128xf32>
    %547 = arith.mulf %321, %546 : vector<16x128xf32>
    %cst_283 = arith.constant dense<0.000000e+00> : vector<16xf32>
    %548 = vector.multi_reduction <add>, %547, %cst_283 [1] : vector<16x128xf32> to vector<16xf32>
    %549 = vector.shape_cast %548 : vector<16xf32> to vector<16x1xf32>
    %550 = arith.addf %544, %549 : vector<16x1xf32>
    %551 = vector.extract_strided_slice %403 {offsets = [3, 0], sizes = [1, 128], strides = [1, 1]} : vector<7x128xf32> to vector<1x128xf32>
    %552 = vector.broadcast %551 : vector<1x128xf32> to vector<16x128xf32>
    %553 = arith.mulf %343, %552 : vector<16x128xf32>
    %cst_284 = arith.constant dense<0.000000e+00> : vector<16xf32>
    %554 = vector.multi_reduction <add>, %553, %cst_284 [1] : vector<16x128xf32> to vector<16xf32>
    %555 = vector.shape_cast %554 : vector<16xf32> to vector<16x1xf32>
    %556 = arith.addf %550, %555 : vector<16x1xf32>
    %557 = vector.extract_strided_slice %403 {offsets = [4, 0], sizes = [1, 128], strides = [1, 1]} : vector<7x128xf32> to vector<1x128xf32>
    %558 = vector.broadcast %557 : vector<1x128xf32> to vector<16x128xf32>
    %559 = arith.mulf %365, %558 : vector<16x128xf32>
    %cst_285 = arith.constant dense<0.000000e+00> : vector<16xf32>
    %560 = vector.multi_reduction <add>, %559, %cst_285 [1] : vector<16x128xf32> to vector<16xf32>
    %561 = vector.shape_cast %560 : vector<16xf32> to vector<16x1xf32>
    %562 = arith.addf %556, %561 : vector<16x1xf32>
    %563 = vector.extract_strided_slice %403 {offsets = [5, 0], sizes = [1, 128], strides = [1, 1]} : vector<7x128xf32> to vector<1x128xf32>
    %564 = vector.broadcast %563 : vector<1x128xf32> to vector<16x128xf32>
    %565 = arith.mulf %402, %564 : vector<16x128xf32>
    %cst_286 = arith.constant dense<0.000000e+00> : vector<16xf32>
    %566 = vector.multi_reduction <add>, %565, %cst_286 [1] : vector<16x128xf32> to vector<16xf32>
    %567 = vector.shape_cast %566 : vector<16xf32> to vector<16x1xf32>
    %568 = arith.addf %562, %567 : vector<16x1xf32>
    %c15_i32_287 = arith.constant 15 : i32
    %569 = tpu.dynamic_rotate %321 by %c15_i32_287 dim 0 : vector<16x128xf32>, i32 -> vector<16x128xf32>
    %570 = tpu.iota {dimensions = array<i32: 0>} : vector<16x1xi32>
    %c1_i32_288 = arith.constant 1 : i32
    %571 = vector.broadcast %c1_i32_288 : i32 to vector<16x1xi32>
    %572 = arith.addi %570, %571 : vector<16x1xi32>
    %c0_i32_289 = arith.constant 0 : i32
    %573 = vector.broadcast %c0_i32_289 : i32 to vector<16x1xi32>
    %574 = arith.cmpi sge, %572, %573 : vector<16x1xi32>
    %c1_i32_290 = arith.constant 1 : i32
    %575 = vector.broadcast %c1_i32_290 : i32 to vector<16x1xi32>
    %576 = arith.addi %570, %575 : vector<16x1xi32>
    %c16_i32_291 = arith.constant 16 : i32
    %577 = vector.broadcast %c16_i32_291 : i32 to vector<16x1xi32>
    %578 = arith.cmpi slt, %576, %577 : vector<16x1xi32>
    %579 = arith.andi %574, %578 : vector<16x1xi1>
    %cst_292 = arith.constant 0.000000e+00 : f32
    %580 = vector.shape_cast %579 : vector<16x1xi1> to vector<16x1xi1>
    %581 = vector.broadcast %580 : vector<16x1xi1> to vector<16x128xi1>
    %582 = vector.broadcast %cst_292 : f32 to vector<16x128xf32>
    %583 = arith.select %581, %569, %582 : vector<16x128xi1>, vector<16x128xf32>
    %584 = vector.extract_strided_slice %403 {offsets = [6, 0], sizes = [1, 128], strides = [1, 1]} : vector<7x128xf32> to vector<1x128xf32>
    %585 = vector.broadcast %584 : vector<1x128xf32> to vector<16x128xf32>
    %586 = arith.mulf %583, %585 : vector<16x128xf32>
    %cst_293 = arith.constant dense<0.000000e+00> : vector<16xf32>
    %587 = vector.multi_reduction <add>, %586, %cst_293 [1] : vector<16x128xf32> to vector<16xf32>
    %588 = vector.shape_cast %587 : vector<16xf32> to vector<16x1xf32>
    %589 = arith.addf %568, %588 : vector<16x1xf32>
    %590 = math.tanh %589 : vector<16x1xf32>
    %c0_294 = arith.constant 0 : index
    %c0_295 = arith.constant 0 : index
    %c1_296 = arith.constant 1 : index
    %591 = vector.load %arg20[%c0_294, %c0_295, %c1_296] : memref<1x16x4xf32, #tpu.memory_space<vmem>>, vector<1x16x1xf32>
    %592 = vector.shape_cast %591 : vector<1x16x1xf32> to vector<16x1xf32>
    %593 = vector.shape_cast %590 : vector<16x1xf32> to vector<1x16x1xf32>
    tpu.vector_store %arg20[%c0_294, %c0_295, %c1_296], %593 {strides = array<i32>} : memref<1x16x4xf32, #tpu.memory_space<vmem>>, vector<1x16x1xf32>,
    %cst_297 = arith.constant 0.000000e+00 : f32
    %594 = vector.broadcast %cst_297 : f32 to vector<16x1xf32>
    %c0_298 = arith.constant 0 : index
    %c0_299 = arith.constant 0 : index
    %595 = vector.load %arg18[%c0_298, %c0_299] : memref<1x1xf32, #tpu.memory_space<vmem>>, vector<1x1xf32>
    %596 = vector.broadcast %595 : vector<1x1xf32> to vector<16x1xf32>
    %597 = arith.addf %594, %596 : vector<16x1xf32>
    %c1_i32_300 = arith.constant 1 : i32
    %598 = tpu.dynamic_rotate %402 by %c1_i32_300 dim 0 : vector<16x128xf32>, i32 -> vector<16x128xf32>
    %599 = tpu.iota {dimensions = array<i32: 0>} : vector<16x1xi32>
    %c-1_i32_301 = arith.constant -1 : i32
    %600 = vector.broadcast %c-1_i32_301 : i32 to vector<16x1xi32>
    %601 = arith.addi %599, %600 : vector<16x1xi32>
    %c0_i32_302 = arith.constant 0 : i32
    %602 = vector.broadcast %c0_i32_302 : i32 to vector<16x1xi32>
    %603 = arith.cmpi sge, %601, %602 : vector<16x1xi32>
    %c-1_i32_303 = arith.constant -1 : i32
    %604 = vector.broadcast %c-1_i32_303 : i32 to vector<16x1xi32>
    %605 = arith.addi %599, %604 : vector<16x1xi32>
    %c16_i32_304 = arith.constant 16 : i32
    %606 = vector.broadcast %c16_i32_304 : i32 to vector<16x1xi32>
    %607 = arith.cmpi slt, %605, %606 : vector<16x1xi32>
    %608 = arith.andi %603, %607 : vector<16x1xi1>
    %cst_305 = arith.constant 0.000000e+00 : f32
    %609 = vector.shape_cast %608 : vector<16x1xi1> to vector<16x1xi1>
    %610 = vector.broadcast %609 : vector<16x1xi1> to vector<16x128xi1>
    %611 = vector.broadcast %cst_305 : f32 to vector<16x128xf32>
    %612 = arith.select %610, %598, %611 : vector<16x128xi1>, vector<16x128xf32>
    %613 = vector.extract_strided_slice %403 {offsets = [0, 0], sizes = [1, 128], strides = [1, 1]} : vector<7x128xf32> to vector<1x128xf32>
    %614 = vector.broadcast %613 : vector<1x128xf32> to vector<16x128xf32>
    %615 = arith.mulf %612, %614 : vector<16x128xf32>
    %cst_306 = arith.constant dense<0.000000e+00> : vector<16xf32>
    %616 = vector.multi_reduction <add>, %615, %cst_306 [1] : vector<16x128xf32> to vector<16xf32>
    %617 = vector.shape_cast %616 : vector<16xf32> to vector<16x1xf32>
    %618 = arith.addf %597, %617 : vector<16x1xf32>
    %619 = vector.extract_strided_slice %403 {offsets = [1, 0], sizes = [1, 128], strides = [1, 1]} : vector<7x128xf32> to vector<1x128xf32>
    %620 = vector.broadcast %619 : vector<1x128xf32> to vector<16x128xf32>
    %621 = arith.mulf %321, %620 : vector<16x128xf32>
    %cst_307 = arith.constant dense<0.000000e+00> : vector<16xf32>
    %622 = vector.multi_reduction <add>, %621, %cst_307 [1] : vector<16x128xf32> to vector<16xf32>
    %623 = vector.shape_cast %622 : vector<16xf32> to vector<16x1xf32>
    %624 = arith.addf %618, %623 : vector<16x1xf32>
    %625 = vector.extract_strided_slice %403 {offsets = [2, 0], sizes = [1, 128], strides = [1, 1]} : vector<7x128xf32> to vector<1x128xf32>
    %626 = vector.broadcast %625 : vector<1x128xf32> to vector<16x128xf32>
    %627 = arith.mulf %343, %626 : vector<16x128xf32>
    %cst_308 = arith.constant dense<0.000000e+00> : vector<16xf32>
    %628 = vector.multi_reduction <add>, %627, %cst_308 [1] : vector<16x128xf32> to vector<16xf32>
    %629 = vector.shape_cast %628 : vector<16xf32> to vector<16x1xf32>
    %630 = arith.addf %624, %629 : vector<16x1xf32>
    %631 = vector.extract_strided_slice %403 {offsets = [3, 0], sizes = [1, 128], strides = [1, 1]} : vector<7x128xf32> to vector<1x128xf32>
    %632 = vector.broadcast %631 : vector<1x128xf32> to vector<16x128xf32>
    %633 = arith.mulf %365, %632 : vector<16x128xf32>
    %cst_309 = arith.constant dense<0.000000e+00> : vector<16xf32>
    %634 = vector.multi_reduction <add>, %633, %cst_309 [1] : vector<16x128xf32> to vector<16xf32>
    %635 = vector.shape_cast %634 : vector<16xf32> to vector<16x1xf32>
    %636 = arith.addf %630, %635 : vector<16x1xf32>
    %637 = vector.extract_strided_slice %403 {offsets = [4, 0], sizes = [1, 128], strides = [1, 1]} : vector<7x128xf32> to vector<1x128xf32>
    %638 = vector.broadcast %637 : vector<1x128xf32> to vector<16x128xf32>
    %639 = arith.mulf %402, %638 : vector<16x128xf32>
    %cst_310 = arith.constant dense<0.000000e+00> : vector<16xf32>
    %640 = vector.multi_reduction <add>, %639, %cst_310 [1] : vector<16x128xf32> to vector<16xf32>
    %641 = vector.shape_cast %640 : vector<16xf32> to vector<16x1xf32>
    %642 = arith.addf %636, %641 : vector<16x1xf32>
    %c15_i32_311 = arith.constant 15 : i32
    %643 = tpu.dynamic_rotate %321 by %c15_i32_311 dim 0 : vector<16x128xf32>, i32 -> vector<16x128xf32>
    %644 = tpu.iota {dimensions = array<i32: 0>} : vector<16x1xi32>
    %c1_i32_312 = arith.constant 1 : i32
    %645 = vector.broadcast %c1_i32_312 : i32 to vector<16x1xi32>
    %646 = arith.addi %644, %645 : vector<16x1xi32>
    %c0_i32_313 = arith.constant 0 : i32
    %647 = vector.broadcast %c0_i32_313 : i32 to vector<16x1xi32>
    %648 = arith.cmpi sge, %646, %647 : vector<16x1xi32>
    %c1_i32_314 = arith.constant 1 : i32
    %649 = vector.broadcast %c1_i32_314 : i32 to vector<16x1xi32>
    %650 = arith.addi %644, %649 : vector<16x1xi32>
    %c16_i32_315 = arith.constant 16 : i32
    %651 = vector.broadcast %c16_i32_315 : i32 to vector<16x1xi32>
    %652 = arith.cmpi slt, %650, %651 : vector<16x1xi32>
    %653 = arith.andi %648, %652 : vector<16x1xi1>
    %cst_316 = arith.constant 0.000000e+00 : f32
    %654 = vector.shape_cast %653 : vector<16x1xi1> to vector<16x1xi1>
    %655 = vector.broadcast %654 : vector<16x1xi1> to vector<16x128xi1>
    %656 = vector.broadcast %cst_316 : f32 to vector<16x128xf32>
    %657 = arith.select %655, %643, %656 : vector<16x128xi1>, vector<16x128xf32>
    %658 = vector.extract_strided_slice %403 {offsets = [5, 0], sizes = [1, 128], strides = [1, 1]} : vector<7x128xf32> to vector<1x128xf32>
    %659 = vector.broadcast %658 : vector<1x128xf32> to vector<16x128xf32>
    %660 = arith.mulf %657, %659 : vector<16x128xf32>
    %cst_317 = arith.constant dense<0.000000e+00> : vector<16xf32>
    %661 = vector.multi_reduction <add>, %660, %cst_317 [1] : vector<16x128xf32> to vector<16xf32>
    %662 = vector.shape_cast %661 : vector<16xf32> to vector<16x1xf32>
    %663 = arith.addf %642, %662 : vector<16x1xf32>
    %c15_i32_318 = arith.constant 15 : i32
    %664 = tpu.dynamic_rotate %343 by %c15_i32_318 dim 0 : vector<16x128xf32>, i32 -> vector<16x128xf32>
    %665 = tpu.iota {dimensions = array<i32: 0>} : vector<16x1xi32>
    %c1_i32_319 = arith.constant 1 : i32
    %666 = vector.broadcast %c1_i32_319 : i32 to vector<16x1xi32>
    %667 = arith.addi %665, %666 : vector<16x1xi32>
    %c0_i32_320 = arith.constant 0 : i32
    %668 = vector.broadcast %c0_i32_320 : i32 to vector<16x1xi32>
    %669 = arith.cmpi sge, %667, %668 : vector<16x1xi32>
    %c1_i32_321 = arith.constant 1 : i32
    %670 = vector.broadcast %c1_i32_321 : i32 to vector<16x1xi32>
    %671 = arith.addi %665, %670 : vector<16x1xi32>
    %c16_i32_322 = arith.constant 16 : i32
    %672 = vector.broadcast %c16_i32_322 : i32 to vector<16x1xi32>
    %673 = arith.cmpi slt, %671, %672 : vector<16x1xi32>
    %674 = arith.andi %669, %673 : vector<16x1xi1>
    %cst_323 = arith.constant 0.000000e+00 : f32
    %675 = vector.shape_cast %674 : vector<16x1xi1> to vector<16x1xi1>
    %676 = vector.broadcast %675 : vector<16x1xi1> to vector<16x128xi1>
    %677 = vector.broadcast %cst_323 : f32 to vector<16x128xf32>
    %678 = arith.select %676, %664, %677 : vector<16x128xi1>, vector<16x128xf32>
    %679 = vector.extract_strided_slice %403 {offsets = [6, 0], sizes = [1, 128], strides = [1, 1]} : vector<7x128xf32> to vector<1x128xf32>
    %680 = vector.broadcast %679 : vector<1x128xf32> to vector<16x128xf32>
    %681 = arith.mulf %678, %680 : vector<16x128xf32>
    %cst_324 = arith.constant dense<0.000000e+00> : vector<16xf32>
    %682 = vector.multi_reduction <add>, %681, %cst_324 [1] : vector<16x128xf32> to vector<16xf32>
    %683 = vector.shape_cast %682 : vector<16xf32> to vector<16x1xf32>
    %684 = arith.addf %663, %683 : vector<16x1xf32>
    %685 = math.tanh %684 : vector<16x1xf32>
    %c0_325 = arith.constant 0 : index
    %c0_326 = arith.constant 0 : index
    %c2_327 = arith.constant 2 : index
    %686 = vector.load %arg20[%c0_325, %c0_326, %c2_327] : memref<1x16x4xf32, #tpu.memory_space<vmem>>, vector<1x16x1xf32>
    %687 = vector.shape_cast %686 : vector<1x16x1xf32> to vector<16x1xf32>
    %688 = vector.shape_cast %685 : vector<16x1xf32> to vector<1x16x1xf32>
    tpu.vector_store %arg20[%c0_325, %c0_326, %c2_327], %688 {strides = array<i32>} : memref<1x16x4xf32, #tpu.memory_space<vmem>>, vector<1x16x1xf32>,
    %cst_328 = arith.constant 0.000000e+00 : f32
    %689 = vector.broadcast %cst_328 : f32 to vector<16x1xf32>
    %c0_329 = arith.constant 0 : index
    %c0_330 = arith.constant 0 : index
    %690 = vector.load %arg18[%c0_329, %c0_330] : memref<1x1xf32, #tpu.memory_space<vmem>>, vector<1x1xf32>
    %691 = vector.broadcast %690 : vector<1x1xf32> to vector<16x1xf32>
    %692 = arith.addf %689, %691 : vector<16x1xf32>
    %693 = vector.extract_strided_slice %403 {offsets = [0, 0], sizes = [1, 128], strides = [1, 1]} : vector<7x128xf32> to vector<1x128xf32>
    %694 = vector.broadcast %693 : vector<1x128xf32> to vector<16x128xf32>
    %695 = arith.mulf %321, %694 : vector<16x128xf32>
    %cst_331 = arith.constant dense<0.000000e+00> : vector<16xf32>
    %696 = vector.multi_reduction <add>, %695, %cst_331 [1] : vector<16x128xf32> to vector<16xf32>
    %697 = vector.shape_cast %696 : vector<16xf32> to vector<16x1xf32>
    %698 = arith.addf %692, %697 : vector<16x1xf32>
    %699 = vector.extract_strided_slice %403 {offsets = [1, 0], sizes = [1, 128], strides = [1, 1]} : vector<7x128xf32> to vector<1x128xf32>
    %700 = vector.broadcast %699 : vector<1x128xf32> to vector<16x128xf32>
    %701 = arith.mulf %343, %700 : vector<16x128xf32>
    %cst_332 = arith.constant dense<0.000000e+00> : vector<16xf32>
    %702 = vector.multi_reduction <add>, %701, %cst_332 [1] : vector<16x128xf32> to vector<16xf32>
    %703 = vector.shape_cast %702 : vector<16xf32> to vector<16x1xf32>
    %704 = arith.addf %698, %703 : vector<16x1xf32>
    %705 = vector.extract_strided_slice %403 {offsets = [2, 0], sizes = [1, 128], strides = [1, 1]} : vector<7x128xf32> to vector<1x128xf32>
    %706 = vector.broadcast %705 : vector<1x128xf32> to vector<16x128xf32>
    %707 = arith.mulf %365, %706 : vector<16x128xf32>
    %cst_333 = arith.constant dense<0.000000e+00> : vector<16xf32>
    %708 = vector.multi_reduction <add>, %707, %cst_333 [1] : vector<16x128xf32> to vector<16xf32>
    %709 = vector.shape_cast %708 : vector<16xf32> to vector<16x1xf32>
    %710 = arith.addf %704, %709 : vector<16x1xf32>
    %711 = vector.extract_strided_slice %403 {offsets = [3, 0], sizes = [1, 128], strides = [1, 1]} : vector<7x128xf32> to vector<1x128xf32>
    %712 = vector.broadcast %711 : vector<1x128xf32> to vector<16x128xf32>
    %713 = arith.mulf %402, %712 : vector<16x128xf32>
    %cst_334 = arith.constant dense<0.000000e+00> : vector<16xf32>
    %714 = vector.multi_reduction <add>, %713, %cst_334 [1] : vector<16x128xf32> to vector<16xf32>
    %715 = vector.shape_cast %714 : vector<16xf32> to vector<16x1xf32>
    %716 = arith.addf %710, %715 : vector<16x1xf32>
    %c15_i32_335 = arith.constant 15 : i32
    %717 = tpu.dynamic_rotate %321 by %c15_i32_335 dim 0 : vector<16x128xf32>, i32 -> vector<16x128xf32>
    %718 = tpu.iota {dimensions = array<i32: 0>} : vector<16x1xi32>
    %c1_i32_336 = arith.constant 1 : i32
    %719 = vector.broadcast %c1_i32_336 : i32 to vector<16x1xi32>
    %720 = arith.addi %718, %719 : vector<16x1xi32>
    %c0_i32_337 = arith.constant 0 : i32
    %721 = vector.broadcast %c0_i32_337 : i32 to vector<16x1xi32>
    %722 = arith.cmpi sge, %720, %721 : vector<16x1xi32>
    %c1_i32_338 = arith.constant 1 : i32
    %723 = vector.broadcast %c1_i32_338 : i32 to vector<16x1xi32>
    %724 = arith.addi %718, %723 : vector<16x1xi32>
    %c16_i32_339 = arith.constant 16 : i32
    %725 = vector.broadcast %c16_i32_339 : i32 to vector<16x1xi32>
    %726 = arith.cmpi slt, %724, %725 : vector<16x1xi32>
    %727 = arith.andi %722, %726 : vector<16x1xi1>
    %cst_340 = arith.constant 0.000000e+00 : f32
    %728 = vector.shape_cast %727 : vector<16x1xi1> to vector<16x1xi1>
    %729 = vector.broadcast %728 : vector<16x1xi1> to vector<16x128xi1>
    %730 = vector.broadcast %cst_340 : f32 to vector<16x128xf32>
    %731 = arith.select %729, %717, %730 : vector<16x128xi1>, vector<16x128xf32>
    %732 = vector.extract_strided_slice %403 {offsets = [4, 0], sizes = [1, 128], strides = [1, 1]} : vector<7x128xf32> to vector<1x128xf32>
    %733 = vector.broadcast %732 : vector<1x128xf32> to vector<16x128xf32>
    %734 = arith.mulf %731, %733 : vector<16x128xf32>
    %cst_341 = arith.constant dense<0.000000e+00> : vector<16xf32>
    %735 = vector.multi_reduction <add>, %734, %cst_341 [1] : vector<16x128xf32> to vector<16xf32>
    %736 = vector.shape_cast %735 : vector<16xf32> to vector<16x1xf32>
    %737 = arith.addf %716, %736 : vector<16x1xf32>
    %c15_i32_342 = arith.constant 15 : i32
    %738 = tpu.dynamic_rotate %343 by %c15_i32_342 dim 0 : vector<16x128xf32>, i32 -> vector<16x128xf32>
    %739 = tpu.iota {dimensions = array<i32: 0>} : vector<16x1xi32>
    %c1_i32_343 = arith.constant 1 : i32
    %740 = vector.broadcast %c1_i32_343 : i32 to vector<16x1xi32>
    %741 = arith.addi %739, %740 : vector<16x1xi32>
    %c0_i32_344 = arith.constant 0 : i32
    %742 = vector.broadcast %c0_i32_344 : i32 to vector<16x1xi32>
    %743 = arith.cmpi sge, %741, %742 : vector<16x1xi32>
    %c1_i32_345 = arith.constant 1 : i32
    %744 = vector.broadcast %c1_i32_345 : i32 to vector<16x1xi32>
    %745 = arith.addi %739, %744 : vector<16x1xi32>
    %c16_i32_346 = arith.constant 16 : i32
    %746 = vector.broadcast %c16_i32_346 : i32 to vector<16x1xi32>
    %747 = arith.cmpi slt, %745, %746 : vector<16x1xi32>
    %748 = arith.andi %743, %747 : vector<16x1xi1>
    %cst_347 = arith.constant 0.000000e+00 : f32
    %749 = vector.shape_cast %748 : vector<16x1xi1> to vector<16x1xi1>
    %750 = vector.broadcast %749 : vector<16x1xi1> to vector<16x128xi1>
    %751 = vector.broadcast %cst_347 : f32 to vector<16x128xf32>
    %752 = arith.select %750, %738, %751 : vector<16x128xi1>, vector<16x128xf32>
    %753 = vector.extract_strided_slice %403 {offsets = [5, 0], sizes = [1, 128], strides = [1, 1]} : vector<7x128xf32> to vector<1x128xf32>
    %754 = vector.broadcast %753 : vector<1x128xf32> to vector<16x128xf32>
    %755 = arith.mulf %752, %754 : vector<16x128xf32>
    %cst_348 = arith.constant dense<0.000000e+00> : vector<16xf32>
    %756 = vector.multi_reduction <add>, %755, %cst_348 [1] : vector<16x128xf32> to vector<16xf32>
    %757 = vector.shape_cast %756 : vector<16xf32> to vector<16x1xf32>
    %758 = arith.addf %737, %757 : vector<16x1xf32>
    %c15_i32_349 = arith.constant 15 : i32
    %759 = tpu.dynamic_rotate %365 by %c15_i32_349 dim 0 : vector<16x128xf32>, i32 -> vector<16x128xf32>
    %760 = tpu.iota {dimensions = array<i32: 0>} : vector<16x1xi32>
    %c1_i32_350 = arith.constant 1 : i32
    %761 = vector.broadcast %c1_i32_350 : i32 to vector<16x1xi32>
    %762 = arith.addi %760, %761 : vector<16x1xi32>
    %c0_i32_351 = arith.constant 0 : i32
    %763 = vector.broadcast %c0_i32_351 : i32 to vector<16x1xi32>
    %764 = arith.cmpi sge, %762, %763 : vector<16x1xi32>
    %c1_i32_352 = arith.constant 1 : i32
    %765 = vector.broadcast %c1_i32_352 : i32 to vector<16x1xi32>
    %766 = arith.addi %760, %765 : vector<16x1xi32>
    %c16_i32_353 = arith.constant 16 : i32
    %767 = vector.broadcast %c16_i32_353 : i32 to vector<16x1xi32>
    %768 = arith.cmpi slt, %766, %767 : vector<16x1xi32>
    %769 = arith.andi %764, %768 : vector<16x1xi1>
    %cst_354 = arith.constant 0.000000e+00 : f32
    %770 = vector.shape_cast %769 : vector<16x1xi1> to vector<16x1xi1>
    %771 = vector.broadcast %770 : vector<16x1xi1> to vector<16x128xi1>
    %772 = vector.broadcast %cst_354 : f32 to vector<16x128xf32>
    %773 = arith.select %771, %759, %772 : vector<16x128xi1>, vector<16x128xf32>
    %774 = vector.extract_strided_slice %403 {offsets = [6, 0], sizes = [1, 128], strides = [1, 1]} : vector<7x128xf32> to vector<1x128xf32>
    %775 = vector.broadcast %774 : vector<1x128xf32> to vector<16x128xf32>
    %776 = arith.mulf %773, %775 : vector<16x128xf32>
    %cst_355 = arith.constant dense<0.000000e+00> : vector<16xf32>
    %777 = vector.multi_reduction <add>, %776, %cst_355 [1] : vector<16x128xf32> to vector<16xf32>
    %778 = vector.shape_cast %777 : vector<16xf32> to vector<16x1xf32>
    %779 = arith.addf %758, %778 : vector<16x1xf32>
    %780 = math.tanh %779 : vector<16x1xf32>
    %c0_356 = arith.constant 0 : index
    %c0_357 = arith.constant 0 : index
    %c3_358 = arith.constant 3 : index
    %781 = vector.load %arg20[%c0_356, %c0_357, %c3_358] : memref<1x16x4xf32, #tpu.memory_space<vmem>>, vector<1x16x1xf32>
    %782 = vector.shape_cast %781 : vector<1x16x1xf32> to vector<16x1xf32>
    %783 = vector.shape_cast %780 : vector<16x1xf32> to vector<1x16x1xf32>
    tpu.vector_store %arg20[%c0_356, %c0_357, %c3_358], %783 {strides = array<i32>} : memref<1x16x4xf32, #tpu.memory_space<vmem>>, vector<1x16x1xf32>,
    return
  }
  func.func @transform_0(%arg0: i32, %arg1: memref<2xi32, #tpu.memory_space<smem>>) -> (i32, i32, i32) {
    %c0_i32 = arith.constant 0 : i32
    %c0_i32_0 = arith.constant 0 : i32
    %c0_i32_1 = arith.constant 0 : i32
    return %arg0, %c0_i32, %c0_i32_0 : i32, i32, i32
  }
  func.func @transform_1(%arg0: i32, %arg1: memref<2xi32, #tpu.memory_space<smem>>) -> (i32, i32, i32) {
    %c0_i32 = arith.constant 0 : i32
    %c0_i32_0 = arith.constant 0 : i32
    %c0_i32_1 = arith.constant 0 : i32
    return %arg0, %c0_i32, %c0_i32_0 : i32, i32, i32
  }
  func.func @transform_2(%arg0: i32, %arg1: memref<2xi32, #tpu.memory_space<smem>>) -> (i32, i32, i32) {
    %0 = arith.index_cast %arg0 : i32 to index
    %1 = memref.load %arg1[%0] : memref<2xi32, #tpu.memory_space<smem>>
    %c0_i32 = arith.constant 0 : i32
    %c0_i32_0 = arith.constant 0 : i32
    %c0_i32_1 = arith.constant 0 : i32
    return %1, %c0_i32, %c0_i32_0 : i32, i32, i32
  }
  func.func @transform_3(%arg0: i32, %arg1: memref<2xi32, #tpu.memory_space<smem>>) -> (i32, i32) {
    %c0_i32 = arith.constant 0 : i32
    %c0_i32_0 = arith.constant 0 : i32
    %c0_i32_1 = arith.constant 0 : i32
    return %c0_i32, %c0_i32_0 : i32, i32
  }
  func.func @transform_4(%arg0: i32, %arg1: memref<2xi32, #tpu.memory_space<smem>>) -> (i32, i32) {
    %c0_i32 = arith.constant 0 : i32
    %c0_i32_0 = arith.constant 0 : i32
    %c0_i32_1 = arith.constant 0 : i32
    return %c0_i32, %c0_i32_0 : i32, i32
  }
  func.func @transform_5(%arg0: i32, %arg1: memref<2xi32, #tpu.memory_space<smem>>) -> (i32, i32) {
    %c0_i32 = arith.constant 0 : i32
    %c0_i32_0 = arith.constant 0 : i32
    %c0_i32_1 = arith.constant 0 : i32
    return %c0_i32, %c0_i32_0 : i32, i32
  }
  func.func @transform_6(%arg0: i32, %arg1: memref<2xi32, #tpu.memory_space<smem>>) -> (i32, i32) {
    %c0_i32 = arith.constant 0 : i32
    %c0_i32_0 = arith.constant 0 : i32
    %c0_i32_1 = arith.constant 0 : i32
    return %c0_i32, %c0_i32_0 : i32, i32
  }
  func.func @transform_7(%arg0: i32, %arg1: memref<2xi32, #tpu.memory_space<smem>>) -> (i32, i32) {
    %c0_i32 = arith.constant 0 : i32
    %c0_i32_0 = arith.constant 0 : i32
    %c0_i32_1 = arith.constant 0 : i32
    return %c0_i32, %c0_i32_0 : i32, i32
  }
  func.func @transform_8(%arg0: i32, %arg1: memref<2xi32, #tpu.memory_space<smem>>) -> (i32, i32) {
    %c0_i32 = arith.constant 0 : i32
    %c0_i32_0 = arith.constant 0 : i32
    %c0_i32_1 = arith.constant 0 : i32
    return %c0_i32, %c0_i32_0 : i32, i32
  }
  func.func @transform_9(%arg0: i32, %arg1: memref<2xi32, #tpu.memory_space<smem>>) -> (i32, i32, i32) {
    %c0_i32 = arith.constant 0 : i32
    %c0_i32_0 = arith.constant 0 : i32
    %c0_i32_1 = arith.constant 0 : i32
    %c0_i32_2 = arith.constant 0 : i32
    return %c0_i32, %c0_i32_0, %c0_i32_1 : i32, i32, i32
  }
  func.func @transform_10(%arg0: i32, %arg1: memref<2xi32, #tpu.memory_space<smem>>) -> (i32, i32) {
    %c0_i32 = arith.constant 0 : i32
    %c0_i32_0 = arith.constant 0 : i32
    %c0_i32_1 = arith.constant 0 : i32
    return %c0_i32, %c0_i32_0 : i32, i32
  }
  func.func @transform_11(%arg0: i32, %arg1: memref<2xi32, #tpu.memory_space<smem>>) -> (i32, i32, i32) {
    %c0_i32 = arith.constant 0 : i32
    %c0_i32_0 = arith.constant 0 : i32
    %c0_i32_1 = arith.constant 0 : i32
    %c0_i32_2 = arith.constant 0 : i32
    return %c0_i32, %c0_i32_0, %c0_i32_1 : i32, i32, i32
  }
  func.func @transform_12(%arg0: i32, %arg1: memref<2xi32, #tpu.memory_space<smem>>) -> (i32, i32) {
    %c0_i32 = arith.constant 0 : i32
    %c0_i32_0 = arith.constant 0 : i32
    %c0_i32_1 = arith.constant 0 : i32
    return %c0_i32, %c0_i32_0 : i32, i32
  }
  func.func @transform_13(%arg0: i32, %arg1: memref<2xi32, #tpu.memory_space<smem>>) -> (i32, i32, i32) {
    %c0_i32 = arith.constant 0 : i32
    %c0_i32_0 = arith.constant 0 : i32
    %c0_i32_1 = arith.constant 0 : i32
    %c0_i32_2 = arith.constant 0 : i32
    return %c0_i32, %c0_i32_0, %c0_i32_1 : i32, i32, i32
  }
  func.func @transform_14(%arg0: i32, %arg1: memref<2xi32, #tpu.memory_space<smem>>) -> (i32, i32) {
    %c0_i32 = arith.constant 0 : i32
    %c0_i32_0 = arith.constant 0 : i32
    %c0_i32_1 = arith.constant 0 : i32
    return %c0_i32, %c0_i32_0 : i32, i32
  }
  func.func @transform_15(%arg0: i32, %arg1: memref<2xi32, #tpu.memory_space<smem>>) -> (i32, i32) {
    %c0_i32 = arith.constant 0 : i32
    %c0_i32_0 = arith.constant 0 : i32
    %c0_i32_1 = arith.constant 0 : i32
    return %c0_i32, %c0_i32_0 : i32, i32
  }
  func.func @transform_16(%arg0: i32, %arg1: memref<2xi32, #tpu.memory_space<smem>>) -> (i32, i32) {
    %c0_i32 = arith.constant 0 : i32
    %c0_i32_0 = arith.constant 0 : i32
    %c0_i32_1 = arith.constant 0 : i32
    return %c0_i32, %c0_i32_0 : i32, i32
  }
  func.func @transform_17(%arg0: i32, %arg1: memref<2xi32, #tpu.memory_space<smem>>) -> (i32, i32, i32) {
    %c0_i32 = arith.constant 0 : i32
    %c0_i32_0 = arith.constant 0 : i32
    %c0_i32_1 = arith.constant 0 : i32
    return %arg0, %c0_i32, %c0_i32_0 : i32, i32, i32
  }
  func.func @transform_18(%arg0: i32, %arg1: memref<2xi32, #tpu.memory_space<smem>>) -> (i32, i32, i32) {
    %c0_i32 = arith.constant 0 : i32
    %c0_i32_0 = arith.constant 0 : i32
    %c0_i32_1 = arith.constant 0 : i32
    return %arg0, %c0_i32, %c0_i32_0 : i32, i32, i32
  }
}

</mosaic_0001>

<bundles_post_ra>
// kernel: decode_forward_pallas.1
= control target key start
LH: loop header
LB: loop body
LE: loop exit
PB: predicated region body
PF: predicated region fallthrough
CT: control target
= control target key end

     0   :  { %s8744_s0 = inlined_call_operand.vmem [shape: s32[2], index: 0, kind: input, shape index: {}]   ;;  %s8745_s1 = inlined_call_operand.vmem [shape: f32[2,16,1], index: 1, kind: input, shape index: {}]   ;;  %s8746_s2 = inlined_call_operand.vmem [shape: f32[2,16,8], index: 2, kind: input, shape index: {}]   ;;  %s8747_s3 = inlined_call_operand.vmem [shape: f32[10,1,4], index: 3, kind: input, shape index: {}]   ;;  %s8748_s4 = inlined_call_operand.vmem [shape: f32[1,128], index: 4, kind: input, shape index: {}]   ;;  %s8749_s5 = inlined_call_operand.vmem [shape: f32[8,128], index: 5, kind: input, shape index: {}]   ;;  %s8750_s6 = inlined_call_operand.vmem [shape: f32[4,128], index: 6, kind: input, shape index: {}]   ;;  %s8751_s7 = inlined_call_operand.vmem [shape: f32[1,128], index: 7, kind: input, shape index: {}]   ;;  %s8752_s8 = inlined_call_operand.vmem [shape: f32[128,128], index: 8, kind: input, shape index: {}]   ;;  %s8753_s9 = inlined_call_operand.vmem [shape: f32[1,128], index: 9, kind: input, shape index: {}]   ;;  %s8754_s10 = inlined_call_operand.vmem [shape: f32[7,128,128], index: 10, kind: input, shape index: {}]   ;;  %s8755_s11 = inlined_call_operand.vmem [shape: f32[1,128], index: 11, kind: input, shape index: {}]   ;;  %s8756_s12 = inlined_call_operand.vmem [shape: f32[8,128,128], index: 12, kind: input, shape index: {}]   ;;  %s8757_s13 = inlined_call_operand.vmem [shape: f32[1,128], index: 13, kind: input, shape index: {}]   ;;  %s8758_s14 = inlined_call_operand.vmem [shape: f32[3,128,128], index: 14, kind: input, shape index: {}]   ;;  %s8759_s15 = inlined_call_operand.vmem [shape: f32[1,128], index: 15, kind: input, shape index: {}]   ;;  %s8760_s16 = inlined_call_operand.vmem [shape: f32[7,128], index: 16, kind: input, shape index: {}]   ;;  %s8761_s18 = inlined_call_operand.hbm [shape: f32[2,16,128], index: 18, kind: output, shape index: {0}]   ;;  %s8762_s19 = inlined_call_operand.vmem [shape: f32[2,16,4], index: 19, kind: output, shape index: {1}]   ;;  %s8763_s17 = inlined_call_operand.<no memory space> [shape: f32[1,1], index: 17, kind: input, shape index: {}]  }
   0x1   :  { %8768 = sst [smem:[#allocation13_spill]] %s8744_s0  ;;  %v29_v0 = vstv %s8763_s17 }
   0x2   :  { %8769 = sst [smem:[#allocation14_spill]] %s8745_s1  ;;  %s8775_s20 = sld [smem:[#allocation13_spill]]  ;;  %30 = vst [vmem:[#allocation4] sm:$0x1] %v29_v0 }
   0x3   :  { %8770 = sst [smem:[#allocation15_spill]] %s8746_s2 }
   0x4   :  { %8771 = sst [smem:[#allocation16_spill]] %s8747_s3 }
   0x5   :  { %8772 = sst [smem:[#allocation17_spill]] %s8749_s5 }
   0x6   :  { %8773 = sst [smem:[#allocation18_spill]] %s8750_s6 }
   0x7   :  { %8774 = sst [smem:[#allocation19_spill]] %s8757_s13 }
   0x8   :  { %s25_s13 = sshll.u32 %s8775_s20, 4  ;;  %s26_s13 = int_to_ptr.vmem [resolvable:$true] %s25_s13 }
   0x9   :  { %s6846_s22 = scalar_lea.vmem %s26_s13, 16  ;;  %p6851_p1 = scmp.lt.s32.totalorder %s26_s13, %s26_s13 }
   0xa   :  { %p6847_p0 = scmp.ne.s32.totalorder %s26_s13, %s6846_s22  ;;  %p6852_p2 = scmp.lt.s32.totalorder %s6846_s22, %s6846_s22 }
   0xc   :  { %p6853_p3 = por %p6852_p2, %p6851_p1 }
   0xe   :  { %p6854_p4 = pnand %p6853_p3, %p6847_p0 }
  0x10   :  { %6857 = shalt.err (!%p6854_p4)  }
  0x11   :  { %s6924_s2 = smov [#allocation3]  }
  0x12   :  { %28 = dma.vmem_to_smem %s26_s13, 16, %s6924_s2, [#allocation2] }
  0x13   :  { %6902 = dma.done.wait [#allocation2], 16 }
  0x14   :  { %6903 = vsyncadd [#allocation2], 4294967280 }
  0x15   :  { %32 = sfence }
  0x16   :  { %33 = vsyncpa [#allocation6], 0 }
  0x17   :  { %35 = vsyncpa [#allocation6 + $0x1], 0  ;;  %s7040_s23 = smov 0   ;;  %s7042_s24 = smov 0  }
  0x18   :  { %s7044_s17 = smov 0   ;;  %s7046_s25 = smov 0  }
  0x19 LB: > { %8776 = sst [smem:[#allocation9_spill]] %s6918_s17  ;;  %s7061_s13 = sadd.s32 4294967295, %s6922_s25   ;;  %s6922_s25 = sphi %s7046_s25, %s8789_s25   ;;  %s6918_s17 = sphi %s7044_s17, %s8791_s17   ;;  %s6914_s24 = sphi %s7042_s24, %s8793_s24   ;;  %s6910_s23 = sphi %s7040_s23, %s8792_s23  }
  0x1a   : > { %s4046_s3 = sadd.s32 4294967294, %s6922_s25   ;;  %s7065_s26 = sadd.s32 1, %s6922_s25  }
  0x1b   : > { %8777 = sst [smem:[#allocation10_spill]] %s7065_s26  ;;  %s422_s27 = sadd.s32 1, %s6918_s17 }
  0x1c   : > { %s419_s28 = ssub.s32 %s6922_s25, %s7065_s26  ;;  %p432_p5 = scmp.ne.s32.totalorder %s6918_s17, %s6914_s24 }
  0x1d   : > { %p420_p6 = scmp.eq.s32.totalorder %s419_s28, 0  ;;  %p433_p7 = scmp.eq.s32.totalorder %s7061_s13, 1 }
  0x1e   : > { %p438_p8 = scmp.ne.s32.totalorder %s6914_s24, %s6910_s23  ;;  %p439_p9 = scmp.eq.s32.totalorder %s4046_s3, 1 }
  0x1f   : > { %s7076_s29 = scalar_select %p420_p6, %s6918_s17, %s422_s27  }
  0x20   : > { %p7078_p10 = por %p433_p7, %p432_p5  ;;  %p7082_p11 = por %p439_p9, %p438_p8 }
  0x21   : > { %8778 = sst [smem:[#allocation11_spill]] %s7076_s29  ;;  %p4049_p12 = scmp.ge.s32.totalorder %s6922_s25, 1 }
  0x22   : > { %s8780_s30 = scalar_select %p7082_p11, 1, 0 }
  0x23   : > { %p549_p13 = scmp.lt.s32.totalorder %s6922_s25, 3 }
  0x24   : > { %8781 = sst [smem:[#allocation12_spill]] %s8780_s30 }
  0x25   : > { %p550_p0 = pnand %p4049_p12, %p549_p13 }
  0x26   : > { %s8782_s5 = sld [smem:[#allocation17_spill]] (!%p550_p0)  ;;  %p617_p1 = scmp.lt.s32.totalorder (!%p550_p0), %s7061_s13, 1  ;;  %v6925_v3 = vmov (!%p550_p0), 0.0   ;;  %vm751_vm0 = vcmask (!%p550_p0), 1043456   ;;  %v842_v4 = vld [vmem:[%s8752_s8] sm:$0xff] (!%p550_p0)  ;;  %v843_v5 = vld [vmem:[%s8752_s8 + $0x8] sm:$0xff] (!%p550_p0)  ;;  %v825_v38 = vlaneseq (!%p550_p0) }
  0x27   : > { %553 = sbr.rel (%p550_p0) target bundleno = 2059 (0x80b), region = 88  ;;  %s8783_s6 = sld [smem:[#allocation18_spill]] (!%p550_p0)  ;;  %4846 = vmatprep.subr.mxu1 (!%p550_p0), %v6925_v3  ;;  %vm6926_vm1 = vmmov (!%p550_p0), 0   ;;  %v6927_v6 = vmov (!%p550_p0), 0   ;;  %v5831_v7 = vpack.c.bf16 (!%p550_p0), %v843_v5, %v842_v4  ;;  %vm661_vm2 = vcmask (!%p550_p0), 64512   ;;  %v844_v11 = vld [vmem:[%s8752_s8 + $0x10] sm:$0xff] (!%p550_p0) }
  0x28   : > { %s627_s2 = sld [smem:[#allocation3 + %s7061_s13]] (!%p550_p0)  ;;  %4848 = vmatprep.mubr.msk.f32.mxu1 (!%p550_p0), %vm6926_vm1, %v6925_v3  ;;  %6829 = vset.pattern.permute.xlu0 (!%p550_p0), %v6927_v6  ;;  %v845_v12 = vld [vmem:[%s8752_s8 + $0x18] sm:$0xff] (!%p550_p0)  ;;  %vm747_vm3 = vcmask (!%p550_p0), 31744   ;;  %v846_v16 = vld [vmem:[%s8752_s8 + $0x20] sm:$0xff] (!%p550_p0)  ;;  %v847_v17 = vld [vmem:[%s8752_s8 + $0x28] sm:$0xff] (!%p550_p0)  ;;  %v7164_v39 = vshrl.u32 (!%p550_p0), %v825_v38, 7 }
  0x29   : > { %s8784_s27 = sld [smem:[#allocation15_spill]] (!%p550_p0)  ;;  %s8785_s21 = sld [smem:[#allocation14_spill]] (!%p550_p0)  ;;  %v5835_v14 = vpack.c.bf16 (!%p550_p0), %v845_v12, %v844_v11  ;;  %v5839_v18 = vpack.c.bf16 (!%p550_p0), %v847_v17, %v846_v16  ;;  %v848_v19 = vld [vmem:[%s8752_s8 + $0x30] sm:$0xff] (!%p550_p0)  ;;  %v849_v20 = vld [vmem:[%s8752_s8 + $0x38] sm:$0xff] (!%p550_p0)  ;;  %v850_v22 = vld [vmem:[%s8752_s8 + $0x40] sm:$0xff] (!%p550_p0) }
  0x2a   : > { %v5843_v21 = vpack.c.bf16 (!%p550_p0), %v849_v20, %v848_v19  ;;  %v851_v23 = vld [vmem:[%s8752_s8 + $0x48] sm:$0xff] (!%p550_p0)  ;;  %v852_v25 = vld [vmem:[%s8752_s8 + $0x50] sm:$0xff] (!%p550_p0)  ;;  %v853_v26 = vld [vmem:[%s8752_s8 + $0x58] sm:$0xff] (!%p550_p0)  ;;  %v827_v46 = vsub.s32 (!%p550_p0), 0, %v7164_v39  ;;  %vm954_vm4 = vcmp.lt.s32.totalorder (!%p550_p0), %v7164_v39, 3  ;;  %vm1067_vm6 = vcmp.lt.s32.totalorder (!%p550_p0), %v7164_v39, 2 }
  0x2b   : > { %v5847_v24 = vpack.c.bf16 (!%p550_p0), %v851_v23, %v850_v22  ;;  %v5851_v27 = vpack.c.bf16 (!%p550_p0), %v853_v26, %v852_v25  ;;  %v854_v28 = vld [vmem:[%s8752_s8 + $0x60] sm:$0xff] (!%p550_p0)  ;;  %v855_v29 = vld [vmem:[%s8752_s8 + $0x68] sm:$0xff] (!%p550_p0)  ;;  %v856_v31 = vld [vmem:[%s8752_s8 + $0x70] sm:$0xff] (!%p550_p0)  ;;  %v1070_v25 = vadd.s32 (!%p550_p0), 4294967294, %v7164_v39  ;;  %vm1180_vm8 = vcmp.lt.s32.totalorder (!%p550_p0), %v7164_v39, 1  ;;  %s6928_s17 = smov (!%p550_p0), 1  }
  0x2c   : > { %v660_v1 = vld [vmem:[%s8782_s5] sm:$0xff] (!%p550_p0)  ;;  %v5855_v30 = vpack.c.bf16 (!%p550_p0), %v855_v29, %v854_v28  ;;  %v857_v32 = vld [vmem:[%s8752_s8 + $0x78] sm:$0xff] (!%p550_p0)  ;;  %v973_v35 = vld [vmem:[%s8754_s10 + $0x8] sm:$0xff] (!%p550_p0)  ;;  %vm1387_vm10 = vcmp.lt.s32.totalorder (!%p550_p0), %v7164_v39, 7  ;;  %vm1500_vm12 = vcmp.lt.s32.totalorder (!%p550_p0), %v7164_v39, 6  ;;  %vm1613_vm14 = vcmp.lt.s32.totalorder (!%p550_p0), %v7164_v39, 5 }
  0x2d   : > { %v746_v2 = vld [vmem:[%s8783_s6] sm:$0xf] (!%p550_p0)  ;;  %4841 = vmatprep.subr.mxu0 (!%p550_p0), %v660_v1  ;;  %s8786_s6 = sld [smem:[#allocation16_spill]] (!%p550_p0)  ;;  %v5859_v33 = vpack.c.bf16 (!%p550_p0), %v857_v32, %v856_v31  ;;  %v974_v57 = vld [vmem:[%s8754_s10 + $0x10] sm:$0xff] (!%p550_p0)  ;;  %v975_v58 = vld [vmem:[%s8754_s10 + $0x18] sm:$0xff] (!%p550_p0)  ;;  %vm1072_vm7 = vcmp.ge.s32.totalorder (!%p550_p0), %v1070_v25, 0 }
  0x2e   : > { %4842 = vmatpush3.msra.mxu0 %v660_v1  ;;  %s618_s28 = scalar_select %p617_p1, %s7061_s13, 1  ;;  %4847 = vmatpush3.msk.msra.mxu1 %vm751_vm0, %v746_v2  ;;  %v972_v34 = vld [vmem:[%s8754_s10] sm:$0xff]  ;;  %v5867_v61 = vpack.c.bf16 %v975_v58, %v974_v57  ;;  %v977_v63 = vld [vmem:[%s8754_s10 + $0x28] sm:$0xff]  ;;  %v978_v1 = vld [vmem:[%s8754_s10 + $0x30] sm:$0xff] }
  0x2f   : > { %5832 = vmatprep.subr.bf16.mxu1 %v5831_v7  ;;  %p628_p2 = scmp.lt.s32.totalorder %s627_s2, 9  ;;  %v5863_v36 = vpack.c.bf16 %v973_v35, %v972_v34  ;;  %v4057_v40 = vld [vmem:[%s8748_s4] ss:$0 sm:$0xff]  ;;  %v979_v2 = vld [vmem:[%s8754_s10 + $0x38] sm:$0xff]  ;;  %v981_v5 = vld [vmem:[%s8754_s10 + $0x48] sm:$0xff]  ;;  %s6929_s26 = smov 2  }
  0x30   : > { %s7103_s1 = sshll.u32 %s618_s28, 4  ;;  %v4062_v52 = vld [vmem:[%s8751_s7] ss:$0 sm:$0xff]  ;;  %v5875_v3 = vpack.c.bf16 %v979_v2, %v978_v1  ;;  %v985_v11 = vld [vmem:[%s8754_s10 + $0x68] sm:$0xff]  ;;  %v4069_v28 = vld [vmem:[%s8754_s10 + $0x98] sm:$0xff]  ;;  %s6930_s22 = smov 3  }
  0x31   : > { %s626_s5 = scalar_lea.vmem %s8784_s27, %s7103_s1  ;;  %s621_s29 = scalar_lea.vmem %s8785_s21, %s7103_s1  ;;  %v976_v62 = vld [vmem:[%s8754_s10 + $0x20] sm:$0xff]  ;;  %v4067_v17 = vld [vmem:[%s8754_s10 + $0x88] sm:$0xff] }
  0x32   : > { %v658_v8 = vld [vmem:[%s626_s5] sm:$0xff]  ;;  %v659_v9 = vld [vmem:[%s626_s5 + $0x8] sm:$0xff]  ;;  %s8795_s2 = smov (!%p628_p2, %s627_s2), 9  ;;  %v5871_v0 = vpack.c.bf16 %v977_v63, %v976_v62  ;;  %s8787_s21 = sld [smem:[#allocation19_spill]] }
  0x33   : > { %4843 = vmatprep.mubr.msk.f32.mxu0 %vm661_vm2, %v658_v8  ;;  %v637_v10 = vld [vmem:[%s621_s29] sm:$0xff]  ;;  %v638_v13 = vld [vmem:[%s621_s29 + $0x8] sm:$0xff]  ;;  %s630_s3 = scalar_lea.vmem %s8786_s6, %s8795_s2  ;;  %v983_v8 = vld [vmem:[%s8754_s10 + $0x58] sm:$0xff] }
  0x34   : > { %4844 = vmatmul.mubr.msk.f32.vlgmr.msra.gmra.mrb[0].mxu0 %vm661_vm2, %v659_v9  ;;  %642 = vperm.xlu0 %6829, %v637_v10   ;;  %v745_v15 = vld [vmem:[%s630_s3] sm:$0x1]  ;;  %s607_s3 = sand.u32 1, %s6914_s24   ;;  %v4084_v57 = vld [vmem:[%s8754_s10 + $0x108] sm:$0xff] }
  0x35   : > { %4849 = vmatmul.mubr.msk.f32.vlgmr.msra.gmra.mrb[0].mxu1 %vm747_vm3, %v745_v15  ;;  %v980_v4 = vld [vmem:[%s8754_s10 + $0x40] sm:$0xff]  ;;  %s4050_s27 = sshll.u32 %s607_s3, 4 }
  0x36   : > { %5834 = vmatpush3.bf16.msra.mxu1 %v5831_v7  ;;  %v5879_v6 = vpack.c.bf16 %v981_v5, %v980_v4  ;;  %v982_v7 = vld [vmem:[%s8754_s10 + $0x50] sm:$0xff]  ;;  %v984_v10 = vld [vmem:[%s8754_s10 + $0x60] sm:$0xff]  ;;  %s7243_s2 = scalar_lea.vmem [#allocation5], %s4050_s27  ;;  %s8691_s27 = scalar_lea.sflag [#allocation6], %s607_s3 }
  0x37   : > { %5836 = vmatprep.subr.bf16.mxu1 %v5835_v14  ;;  %v5883_v9 = vpack.c.bf16 %v983_v8, %v982_v7  ;;  %v5887_v12 = vpack.c.bf16 %v985_v11, %v984_v10  ;;  %v4066_v16 = vld [vmem:[%s8754_s10 + $0x80] sm:$0xff]  ;;  %v4090_v7 = vld [vmem:[%s8754_s10 + $0x138] sm:$0xff]  ;;  %v4092_v10 = vld [vmem:[%s8754_s10 + $0x148] sm:$0xff]  ;;  %s3935_s29 = sshll.u32 %s7243_s2, 4  ;;  %s8680_s29 = int_to_ptr.vmem [resolvable:$true] %s3935_s29 }
  0x38   : > { %647 = vperm.xlu0 %6829, %v638_v13   ;;  %v986_v13 = vld [vmem:[%s8754_s10 + $0x70] sm:$0xff]  ;;  %v4063_v19 = vld [vmem:[%s8753_s9] ss:$0 sm:$0xff]  ;;  %s6858_s20 = scalar_lea.vmem %s8680_s29, 256 }
  0x39   : > { %v4070_v35 = vld [vmem:[%s8754_s10 + $0xa0] sm:$0xff]  ;;  %p6859_p3 = scmp.ne.s32.totalorder %s8680_s29, %s6858_s20 }
  0x3a   : > { %5838 = vmatpush3.bf16.msra.mxu1 %v5835_v14  ;;  %v987_v14 = vld [vmem:[%s8754_s10 + $0x78] sm:$0xff]  ;;  %v4087_v2 = vld [vmem:[%s8754_s10 + $0x120] sm:$0xff] }
  0x3b   : > { %5840 = vmatprep.subr.bf16.mxu1 %v5839_v18  ;;  %v5891_v15 = vpack.c.bf16 %v987_v14, %v986_v13  ;;  %v4094_v13 = vld [vmem:[%s8754_s10 + $0x158] sm:$0xff]  ;;  %p6860_p4 = pnand %p6859_p3, %p7078_p10 }
  0x3d   : > { %p6861_p5 = pneg %p6860_p4 }
  0x3e   : > { %5842 = vmatpush3.bf16.msra.mxu1 %v5839_v18  ;;  %v5895_v18 = vpack.c.bf16 %v4067_v17, %v4066_v16  ;;  %v4096_v16 = vld [vmem:[%s8754_s10 + $0x168] sm:$0xff] }
  0x3f   : > { %5844 = vmatprep.subr.bf16.mxu1 %v5843_v21 }
  0x42   : > { %5846 = vmatpush3.bf16.msra.mxu1 %v5843_v21  ;;  %v958_v21 = vadd.s32 4294967293, %v7164_v39 }
  0x43   : > { %5848 = vmatprep.subr.bf16.mxu1 %v5847_v24 }
  0x44   : > { %vm960_vm5 = vcmp.ge.s32.totalorder %v958_v21, 0  ;;  %v4100_v21 = vld [vmem:[%s8754_s10 + $0x180] sm:$0xff] }
  0x46   : > { %5850 = vmatpush3.bf16.msra.mxu1 %v5847_v24 }
  0x47   : > { %5852 = vmatprep.subr.bf16.mxu1 %v5851_v27 }
  0x4a   : > { %5854 = vmatpush3.bf16.msra.mxu1 %v5851_v27  ;;  %v4068_v27 = vld [vmem:[%s8754_s10 + $0x90] sm:$0xff] }
  0x4b   : > { %5856 = vmatprep.subr.bf16.mxu1 %v5855_v30  ;;  %v5899_v34 = vpack.c.bf16 %v4069_v28, %v4068_v27  ;;  %v4103_v27 = vld [vmem:[%s8754_s10 + $0x198] sm:$0xff] }
  0x4e   : > { %5858 = vmatpush3.bf16.msra.mxu1 %v5855_v30 }
  0x4f   : > { %5860 = vmatprep.subr.bf16.mxu1 %v5859_v33 }
  0x52   : > { %5862 = vmatpush3.bf16.msra.mxu1 %v5859_v33 }
  0x53   : > { %5864 = vmatprep.subr.bf16.mxu1 %v5863_v36 }
  0xb3   : > { %v643_v37 = vpop.permute.xlu0 %642 }
  0xb4   : > { %v656_v44 = vmul.f32 %v4057_v40, %v643_v37 }
  0xb7   : > { %v648_v41 = vpop.permute.xlu0 %647 }
  0xb8   : > { %v657_v45 = vmul.f32 %v4057_v40, %v648_v41  ;;  %v4072_v40 = vld [vmem:[%s8754_s10 + $0xb0] sm:$0xff]  ;;  %v4073_v41 = vld [vmem:[%s8754_s10 + $0xb8] sm:$0xff] }
 0x107   : > { %v4845_v42 = vpop.f32.mrb[0].mxu0 }
 0x108   : > { %v734_v43 = vpop.f32.mrb[1].mxu0  ;;  %v821_v47 = vpop.f32.mrb[0].mxu1  ;;  %v744_v48 = vadd.f32 %v4845_v42, %v657_v45  ;;  %v5907_v42 = vpack.c.bf16 %v4073_v41, %v4072_v40  ;;  %v4172_v40 = vld [vmem:[%s8756_s12 + $0xa0] sm:$0xff]  ;;  %v4173_v41 = vld [vmem:[%s8756_s12 + $0xa8] sm:$0xff] }
 0x109   : > { %v743_v49 = vadd.f32 %v734_v43, %v656_v44  ;;  %v828_v50 = vrot.slane %v821_v47, %v827_v46  ;;  %v4850_v51 = vpop.f32.mrb[1].mxu1  ;;  %v4074_v43 = vld [vmem:[%s8754_s10 + $0xc0] sm:$0xff]  ;;  %v4075_v44 = vld [vmem:[%s8754_s10 + $0xc8] sm:$0xff]  ;;  %v4076_v47 = vld [vmem:[%s8754_s10 + $0xd0] sm:$0xff] }
 0x10a   : > { %v5911_v45 = vpack.c.bf16 %v4075_v44, %v4074_v43  ;;  %v4079_v51 = vld [vmem:[%s8754_s10 + $0xe8] sm:$0xff]  ;;  %v4107_v43 = vld [vmem:[%s8754_s10 + $0x1b8] sm:$0xff]  ;;  %v6095_v44 = vpack.c.bf16 %v4173_v41, %v4172_v40  ;;  %v4135_v40 = vld [vmem:[%s8754_s10 + $0x290] sm:$0xff] }
 0x10b   : > { %v829_v53 = vadd.f32 %v828_v50, %v743_v49  ;;  %v830_v54 = vadd.f32 %v828_v50, %v744_v48  ;;  %v4077_v48 = vld [vmem:[%s8754_s10 + $0xd8] sm:$0xff]  ;;  %v4078_v50 = vld [vmem:[%s8754_s10 + $0xe0] sm:$0xff] }
 0x10c   : > { %v5915_v49 = vpack.c.bf16 %v4077_v48, %v4076_v47  ;;  %v4174_v47 = vld [vmem:[%s8756_s12 + $0xb0] sm:$0xff]  ;;  %v4175_v48 = vld [vmem:[%s8756_s12 + $0xb8] sm:$0xff] }
 0x10d   : > { %v839_v55 = vadd.f32 %v4062_v52, %v830_v54  ;;  %v838_v56 = vadd.f32 %v4062_v52, %v829_v53  ;;  %v5919_v52 = vpack.c.bf16 %v4079_v51, %v4078_v50  ;;  %v4080_v53 = vld [vmem:[%s8754_s10 + $0xf0] sm:$0xff]  ;;  %v4081_v54 = vld [vmem:[%s8754_s10 + $0xf8] sm:$0xff]  ;;  %v4109_v50 = vld [vmem:[%s8754_s10 + $0x1c8] sm:$0xff]  ;;  %v6099_v51 = vpack.c.bf16 %v4175_v48, %v4174_v47 }
 0x10e   : > { %v4136_v41 = vld [vmem:[%s8754_s10 + $0x298] sm:$0xff]  ;;  %v4137_v47 = vld [vmem:[%s8754_s10 + $0x2a0] sm:$0xff]  ;;  %v4138_v48 = vld [vmem:[%s8754_s10 + $0x2a8] sm:$0xff] }
 0x10f   : > { %v841_v59 = vmax.f32 %v839_v55, 0.0  ;;  %v840_v60 = vmax.f32 %v838_v56, 0.0  ;;  %v5923_v55 = vpack.c.bf16 %v4081_v54, %v4080_v53  ;;  %v4083_v56 = vld [vmem:[%s8754_s10 + $0x100] sm:$0xff]  ;;  %v4177_v54 = vld [vmem:[%s8756_s12 + $0xc8] sm:$0xff] }
 0x110   : > { %v5927_v58 = vpack.c.bf16 %v4084_v57, %v4083_v56  ;;  %v4176_v53 = vld [vmem:[%s8756_s12 + $0xc0] sm:$0xff]  ;;  %v4111_v56 = vld [vmem:[%s8754_s10 + $0x1d8] sm:$0xff] }
 0x111   : > { %4883 = vmatprep.mubr.f32.mxu1 %v840_v60  ;;  %v4085_v60 = vld [vmem:[%s8754_s10 + $0x110] sm:$0xff]  ;;  %v6103_v57 = vpack.c.bf16 %v4177_v54, %v4176_v53  ;;  %v4141_v54 = vld [vmem:[%s8754_s10 + $0x2c0] sm:$0xff] }
 0x112   : > { %4884 = vmatmul.mubr.f32.vlgmr.msra.gmra.mrb[2].mxu1 %v841_v59  ;;  %v7298_v59 = vadd.s32 4294967295, %v7164_v39 }
 0x113   : > { %5866 = vmatpush3.bf16.msra.mxu1 %v5863_v36  ;;  %v4071_v36 = vld [vmem:[%s8754_s10 + $0xa8] sm:$0xff] }
 0x114   : > { %5868 = vmatprep.subr.bf16.mxu1 %v5867_v61  ;;  %v5903_v38 = vpack.c.bf16 %v4071_v36, %v4070_v35  ;;  %vm1185_vm9 = vcmp.ge.s32.totalorder %v7298_v59, 0  ;;  %v4171_v36 = vld [vmem:[%s8756_s12 + $0x98] sm:$0xff] }
 0x117   : > { %5870 = vmatpush3.bf16.msra.mxu1 %v5867_v61  ;;  %v4086_v61 = vld [vmem:[%s8754_s10 + $0x118] sm:$0xff] }
 0x118   : > { %5872 = vmatprep.subr.bf16.mxu1 %v5871_v0 }
 0x11b   : > { %5874 = vmatpush3.bf16.msra.mxu1 %v5871_v0  ;;  %v5931_v0 = vpack.c.bf16 %v4086_v61, %v4085_v60  ;;  %v4178_v60 = vld [vmem:[%s8756_s12 + $0xd0] sm:$0xff]  ;;  %v4179_v61 = vld [vmem:[%s8756_s12 + $0xd8] sm:$0xff] }
 0x11c   : > { %5876 = vmatprep.subr.bf16.mxu1 %v5875_v3 }
 0x11f   : > { %5878 = vmatpush3.bf16.msra.mxu1 %v5875_v3  ;;  %v4088_v3 = vld [vmem:[%s8754_s10 + $0x128] sm:$0xff] }
 0x120   : > { %5880 = vmatprep.subr.bf16.mxu1 %v5879_v6  ;;  %v5935_v5 = vpack.c.bf16 %v4088_v3, %v4087_v2  ;;  %v4114_v2 = vld [vmem:[%s8754_s10 + $0x1f0] sm:$0xff]  ;;  %v4115_v3 = vld [vmem:[%s8754_s10 + $0x1f8] sm:$0xff] }
 0x123   : > { %5882 = vmatpush3.bf16.msra.mxu1 %v5879_v6  ;;  %v4089_v6 = vld [vmem:[%s8754_s10 + $0x130] sm:$0xff] }
 0x124   : > { %5884 = vmatprep.subr.bf16.mxu1 %v5883_v9  ;;  %v5939_v8 = vpack.c.bf16 %v4090_v7, %v4089_v6  ;;  %v4117_v6 = vld [vmem:[%s8754_s10 + $0x208] sm:$0xff] }
 0x127   : > { %5886 = vmatpush3.bf16.msra.mxu1 %v5883_v9  ;;  %v4091_v9 = vld [vmem:[%s8754_s10 + $0x140] sm:$0xff] }
 0x128   : > { %5888 = vmatprep.subr.bf16.mxu1 %v5887_v12  ;;  %v5943_v11 = vpack.c.bf16 %v4092_v10, %v4091_v9  ;;  %v4119_v9 = vld [vmem:[%s8754_s10 + $0x218] sm:$0xff] }
 0x12b   : > { %5890 = vmatpush3.bf16.msra.mxu1 %v5887_v12  ;;  %v4093_v12 = vld [vmem:[%s8754_s10 + $0x150] sm:$0xff] }
 0x12c   : > { %5892 = vmatprep.subr.bf16.mxu1 %v5891_v15  ;;  %v5947_v14 = vpack.c.bf16 %v4094_v13, %v4093_v12  ;;  %v4120_v13 = vld [vmem:[%s8754_s10 + $0x220] sm:$0xff] }
 0x12f   : > { %5894 = vmatpush3.bf16.msra.mxu1 %v5891_v15  ;;  %v4095_v15 = vld [vmem:[%s8754_s10 + $0x160] sm:$0xff] }
 0x130   : > { %5896 = vmatprep.subr.bf16.mxu1 %v5895_v18  ;;  %v5951_v17 = vpack.c.bf16 %v4096_v16, %v4095_v15 }
 0x1e5   : > { %v4885_v20 = vpop.f32.mrb[2].mxu1 }
 0x1e6   : > { %v7230_v22 = vadd.f32 %v4885_v20, %v4063_v19  ;;  %v931_v23 = vpop.f32.mrb[3].mxu1 }
 0x1e7   : > { %v7232_v24 = vadd.f32 %v4063_v19, %v931_v23  ;;  %v4098_v19 = vld [vmem:[%s8754_s10 + $0x178] sm:$0xff]  ;;  %v4101_v23 = vld [vmem:[%s8754_s10 + $0x188] sm:$0xff] }
 0x1e8   : > { %v951_v26 = vrot.slane %v7230_v22, 5  ;;  %941 = vst [vmem:[%s7243_s2 + $0x8] sm:$0xff] %v7230_v22  ;;  %v1066_v31 = vrot.slane %v7230_v22, 6  ;;  %v1179_v63 = vrot.slane %v7230_v22, 7  ;;  %v5959_v25 = vpack.c.bf16 %v4101_v23, %v4100_v21  ;;  %v4125_v21 = vld [vmem:[%s8754_s10 + $0x248] sm:$0xff] }
 0x1e9   : > { %v950_v29 = vrot.slane %v7232_v24, 5  ;;  %v1065_v30 = vrot.slane %v7232_v24, 6  ;;  %940 = vst [vmem:[%s7243_s2] sm:$0xff] %v7232_v24  ;;  %v1178_v62 = vrot.slane %v7232_v24, 7  ;;  %v1385_v10 = vrot.slane %v7232_v24, 1  ;;  %s8687_s2 = scalar_lea.vmem %s8762_s19, %s7103_s1 }
 0x1eb   : > { %v956_v32 = vsel %vm954_vm4, %v951_v26, %v950_v29  ;;  %v955_v33 = vsel %vm954_vm4, %v950_v29, %v951_v26  ;;  %v1069_v37 = vsel %vm1067_vm6, %v1066_v31, %v1065_v30  ;;  %v1068_v1 = vsel %vm1067_vm6, %v1065_v30, %v1066_v31  ;;  %v4102_v26 = vld [vmem:[%s8754_s10 + $0x190] sm:$0xff]  ;;  %v4104_v30 = vld [vmem:[%s8754_s10 + $0x1a0] sm:$0xff]  ;;  %v4105_v31 = vld [vmem:[%s8754_s10 + $0x1a8] sm:$0xff] }
 0x1ec   : > { %4918 = vmatprep.mubr.msk.f32.mxu1 %vm960_vm5, %v956_v32  ;;  %v1182_v4 = vsel %vm1180_vm8, %v1179_v63, %v1178_v62  ;;  %v5963_v28 = vpack.c.bf16 %v4103_v27, %v4102_v26  ;;  %v1181_v29 = vsel %vm1180_vm8, %v1178_v62, %v1179_v63  ;;  %v4168_v32 = vld [vmem:[%s8756_s12 + $0x80] sm:$0xff]  ;;  %v4113_v63 = vld [vmem:[%s8754_s10 + $0x1e8] sm:$0xff]  ;;  %v4127_v26 = vld [vmem:[%s8754_s10 + $0x258] sm:$0xff] }
 0x1ed   : > { %4919 = vmatmul.mubr.f32.vlgmr.msra.gmra.mrb[4].mxu1 %v955_v33  ;;  %v4169_v33 = vld [vmem:[%s8756_s12 + $0x88] sm:$0xff]  ;;  %v4112_v62 = vld [vmem:[%s8754_s10 + $0x1e0] sm:$0xff] }
 0x1ee   : > { %5898 = vmatpush3.bf16.msra.mxu1 %v5895_v18  ;;  %4953 = vmatprep.mubr.msk.f32.mxu1 %vm1072_vm7, %v1069_v37  ;;  %v4097_v18 = vld [vmem:[%s8754_s10 + $0x170] sm:$0xff]  ;;  %v6087_v35 = vpack.c.bf16 %v4169_v33, %v4168_v32  ;;  %v5967_v37 = vpack.c.bf16 %v4105_v31, %v4104_v30  ;;  %v4131_v32 = vld [vmem:[%s8754_s10 + $0x278] sm:$0xff]  ;;  %v7494_v33 = vadd.s32 8, %v7164_v39 }
 0x1ef   : > { %5900 = vmatprep.subr.bf16.mxu1 %v5899_v34  ;;  %v5955_v20 = vpack.c.bf16 %v4098_v19, %v4097_v18  ;;  %v4123_v18 = vld [vmem:[%s8754_s10 + $0x238] sm:$0xff]  ;;  %v4130_v31 = vld [vmem:[%s8754_s10 + $0x270] sm:$0xff] }
 0x1f0   : > { %6088 = vmatprep.subr.bf16.mxu0 %v6087_v35 }
 0x1f1   : > { %6090 = vmatpush3.bf16.msra.mxu0 %v6087_v35  ;;  %v4133_v35 = vld [vmem:[%s8754_s10 + $0x280] sm:$0xff] }
 0x1f2   : > { %5902 = vmatpush3.bf16.msra.mxu1 %v5899_v34  ;;  %v4170_v34 = vld [vmem:[%s8756_s12 + $0x90] sm:$0xff] }
 0x1f3   : > { %5904 = vmatprep.subr.bf16.mxu1 %v5903_v38 }
 0x1f6   : > { %5906 = vmatpush3.bf16.msra.mxu1 %v5903_v38  ;;  %v6091_v38 = vpack.c.bf16 %v4171_v36, %v4170_v34  ;;  %v6019_v34 = vpack.c.bf16 %v4131_v32, %v4130_v31  ;;  %v4134_v36 = vld [vmem:[%s8754_s10 + $0x288] sm:$0xff]  ;;  %v1617_v32 = vadd.s32 3, %v7494_v33 }
 0x1f7   : > { %5908 = vmatprep.subr.bf16.mxu1 %v5907_v42 }
 0x1f8   : > { %6092 = vmatprep.subr.bf16.mxu0 %v6091_v38  ;;  %vm1621_vm15 = vcmp.lt.s32.totalorder %v1617_v32, 16  ;;  %v1948_v32 = vld [vmem:[%s8756_s12 + $0x50] sm:$0xff] }
 0x1f9   : > { %6094 = vmatpush3.bf16.msra.mxu0 %v6091_v38  ;;  %v6023_v38 = vpack.c.bf16 %v4134_v36, %v4133_v35  ;;  %v4180_v35 = vld [vmem:[%s8756_s12 + $0xe0] sm:$0xff]  ;;  %v4181_v36 = vld [vmem:[%s8756_s12 + $0xe8] sm:$0xff] }
 0x1fa   : > { %5910 = vmatpush3.bf16.msra.mxu1 %v5907_v42  ;;  %v4106_v42 = vld [vmem:[%s8754_s10 + $0x1b0] sm:$0xff]  ;;  %6096 = vmatprep.subr.bf16.mxu0 %v6095_v44 }
 0x1fb   : > { %5912 = vmatprep.subr.bf16.mxu1 %v5911_v45 }
 0x1fd   : > { %6098 = vmatpush3.bf16.msra.mxu0 %v6095_v44  ;;  %v6027_v44 = vpack.c.bf16 %v4136_v41, %v4135_v40  ;;  %v4183_v40 = vld [vmem:[%s8756_s12 + $0xf8] sm:$0xff] }
 0x1fe   : > { %5914 = vmatpush3.bf16.msra.mxu1 %v5911_v45  ;;  %v5971_v45 = vpack.c.bf16 %v4107_v43, %v4106_v42  ;;  %6100 = vmatprep.subr.bf16.mxu0 %v6099_v51  ;;  %v1498_v42 = vrot.slane %v7232_v24, 2  ;;  %v1499_v43 = vrot.slane %v7230_v22, 2 }
 0x1ff   : > { %5916 = vmatprep.subr.bf16.mxu1 %v5915_v49 }
 0x201   : > { %6102 = vmatpush3.bf16.msra.mxu0 %v6099_v51  ;;  %v4139_v51 = vld [vmem:[%s8754_s10 + $0x2b0] sm:$0xff] }
 0x202   : > { %5918 = vmatpush3.bf16.msra.mxu1 %v5915_v49  ;;  %v4108_v49 = vld [vmem:[%s8754_s10 + $0x1c0] sm:$0xff]  ;;  %6104 = vmatprep.subr.bf16.mxu0 %v6103_v57 }
 0x203   : > { %5920 = vmatprep.subr.bf16.mxu1 %v5919_v52 }
 0x205   : > { %6106 = vmatpush3.bf16.msra.mxu0 %v6103_v57  ;;  %v4143_v57 = vld [vmem:[%s8754_s10 + $0x2d0] sm:$0xff] }
 0x206   : > { %5922 = vmatpush3.bf16.msra.mxu1 %v5919_v52  ;;  %v5975_v52 = vpack.c.bf16 %v4109_v50, %v4108_v49  ;;  %v1501_v49 = vsel %vm1500_vm12, %v1498_v42, %v1499_v43  ;;  %v6031_v50 = vpack.c.bf16 %v4138_v48, %v4137_v47 }
 0x207   : > { %5924 = vmatprep.subr.bf16.mxu1 %v5923_v55 }
 0x20a   : > { %5926 = vmatpush3.bf16.msra.mxu1 %v5923_v55  ;;  %v4110_v55 = vld [vmem:[%s8754_s10 + $0x1d0] sm:$0xff] }
 0x20b   : > { %5928 = vmatprep.subr.bf16.mxu1 %v5927_v58 }
 0x20d   : > { %4954 = vmatmul.mubr.f32.vlgmr.msra.gmra.mrb[4].mxu1 %v1068_v1  ;;  %v5983_v1 = vpack.c.bf16 %v4113_v63, %v4112_v62  ;;  %v4146_v62 = vld [vmem:[%s8754_s10 + $0x2e8] sm:$0xff] }
 0x20e   : > { %5930 = vmatpush3.bf16.msra.mxu1 %v5927_v58  ;;  %4988 = vmatprep.mubr.msk.f32.mxu1 %vm1185_vm9, %v1182_v4  ;;  %v5979_v58 = vpack.c.bf16 %v4111_v56, %v4110_v55  ;;  %v5987_v4 = vpack.c.bf16 %v4115_v3, %v4114_v2  ;;  %v4142_v55 = vld [vmem:[%s8754_s10 + $0x2c8] sm:$0xff]  ;;  %v4150_v3 = vld [vmem:[%s8754_s10 + $0x300] sm:$0xff] }
 0x20f   : > { %5932 = vmatprep.subr.bf16.mxu1 %v5931_v0  ;;  %v6039_v56 = vpack.c.bf16 %v4142_v55, %v4141_v54 }
 0x212   : > { %5934 = vmatpush3.bf16.msra.mxu1 %v5931_v0  ;;  %v6107_v0 = vpack.c.bf16 %v4179_v61, %v4178_v60  ;;  %v4145_v61 = vld [vmem:[%s8754_s10 + $0x2e0] sm:$0xff] }
 0x213   : > { %5936 = vmatprep.subr.bf16.mxu1 %v5935_v5  ;;  %v6047_v63 = vpack.c.bf16 %v4146_v62, %v4145_v61 }
 0x214   : > { %6108 = vmatprep.subr.bf16.mxu0 %v6107_v0 }
 0x215   : > { %6110 = vmatpush3.bf16.msra.mxu0 %v6107_v0  ;;  %v4147_v0 = vld [vmem:[%s8754_s10 + $0x2f0] sm:$0xff] }
 0x216   : > { %5938 = vmatpush3.bf16.msra.mxu1 %v5935_v5  ;;  %v4116_v5 = vld [vmem:[%s8754_s10 + $0x200] sm:$0xff] }
 0x217   : > { %5940 = vmatprep.subr.bf16.mxu1 %v5939_v8  ;;  %v5991_v7 = vpack.c.bf16 %v4117_v6, %v4116_v5  ;;  %v1504_v5 = vadd.s32 2, %v7494_v33 }
 0x219   : > { %vm1508_vm13 = vcmp.lt.s32.totalorder %v1504_v5, 16  ;;  %v4193_v5 = vld [vmem:[%s8756_s12 + $0x2c0] sm:$0xff] }
 0x21a   : > { %5942 = vmatpush3.bf16.msra.mxu1 %v5939_v8  ;;  %v4118_v8 = vld [vmem:[%s8754_s10 + $0x210] sm:$0xff] }
 0x21b   : > { %5944 = vmatprep.subr.bf16.mxu1 %v5943_v11  ;;  %v5995_v12 = vpack.c.bf16 %v4119_v9, %v4118_v8  ;;  %v4153_v8 = vld [vmem:[%s8754_s10 + $0x318] sm:$0xff]  ;;  %v1611_v9 = vrot.slane %v7232_v24, 3 }
 0x21e   : > { %5946 = vmatpush3.bf16.msra.mxu1 %v5943_v11  ;;  %v1386_v11 = vrot.slane %v7230_v22, 1 }
 0x21f   : > { %5948 = vmatprep.subr.bf16.mxu1 %v5947_v14 }
 0x220   : > { %v1388_v15 = vsel %vm1387_vm10, %v1385_v10, %v1386_v11 }
 0x222   : > { %5950 = vmatpush3.bf16.msra.mxu1 %v5947_v14  ;;  %v4121_v14 = vld [vmem:[%s8754_s10 + $0x228] sm:$0xff] }
 0x223   : > { %5952 = vmatprep.subr.bf16.mxu1 %v5951_v17  ;;  %v5999_v16 = vpack.c.bf16 %v4121_v14, %v4120_v13  ;;  %v4154_v13 = vld [vmem:[%s8754_s10 + $0x320] sm:$0xff]  ;;  %v4155_v14 = vld [vmem:[%s8754_s10 + $0x328] sm:$0xff] }
 0x226   : > { %5954 = vmatpush3.bf16.msra.mxu1 %v5951_v17  ;;  %v4122_v17 = vld [vmem:[%s8754_s10 + $0x230] sm:$0xff] }
 0x227   : > { %5956 = vmatprep.subr.bf16.mxu1 %v5955_v20  ;;  %v6003_v19 = vpack.c.bf16 %v4123_v18, %v4122_v17  ;;  %v4158_v18 = vld [vmem:[%s8754_s10 + $0x340] sm:$0xff] }
 0x22a   : > { %5958 = vmatpush3.bf16.msra.mxu1 %v5955_v20  ;;  %v4124_v20 = vld [vmem:[%s8754_s10 + $0x240] sm:$0xff] }
 0x22b   : > { %5960 = vmatprep.subr.bf16.mxu1 %v5959_v25  ;;  %v6007_v23 = vpack.c.bf16 %v4125_v21, %v4124_v20  ;;  %v4160_v21 = vld [vmem:[%s8754_s10 + $0x350] sm:$0xff] }
 0x22d   : > { %4989 = vmatmul.mubr.f32.vlgmr.msra.gmra.mrb[4].mxu1 %v1181_v29  ;;  %v4129_v29 = vld [vmem:[%s8754_s10 + $0x268] sm:$0xff] }
 0x22e   : > { %5962 = vmatpush3.bf16.msra.mxu1 %v5959_v25  ;;  %5023 = vmatprep.mubr.f32.mxu1 %v7232_v24  ;;  %v4126_v25 = vld [vmem:[%s8754_s10 + $0x250] sm:$0xff]  ;;  %v6063_v24 = vpack.c.bf16 %v4155_v14, %v4154_v13 }
 0x22f   : > { %5964 = vmatprep.subr.bf16.mxu1 %v5963_v28  ;;  %v6011_v27 = vpack.c.bf16 %v4127_v26, %v4126_v25  ;;  %v4162_v26 = vld [vmem:[%s8754_s10 + $0x360] sm:$0xff]  ;;  %v4199_v14 = vld [vmem:[%s8756_s12 + $0x2f0] sm:$0xff] }
 0x232   : > { %5966 = vmatpush3.bf16.msra.mxu1 %v5963_v28  ;;  %v4128_v28 = vld [vmem:[%s8754_s10 + $0x260] sm:$0xff] }
 0x233   : > { %5968 = vmatprep.subr.bf16.mxu1 %v5967_v37  ;;  %v6015_v30 = vpack.c.bf16 %v4129_v29, %v4128_v28  ;;  %v4164_v29 = vld [vmem:[%s8754_s10 + $0x370] sm:$0xff] }
 0x236   : > { %5970 = vmatpush3.bf16.msra.mxu1 %v5967_v37  ;;  %v7503_v37 = vadd.s32 1, %v7494_v33  ;;  %v4182_v33 = vld [vmem:[%s8756_s12 + $0xf0] sm:$0xff] }
 0x237   : > { %5972 = vmatprep.subr.bf16.mxu1 %v5971_v45  ;;  %v6115_v41 = vpack.c.bf16 %v4183_v40, %v4182_v33  ;;  %v1952_v40 = vld [vmem:[%s8756_s12 + $0x70] sm:$0xff] }
 0x238   : > { %vm1395_vm11 = vcmp.lt.s32.totalorder %v7503_v37, 16 }
 0x23a   : > { %5974 = vmatpush3.bf16.msra.mxu1 %v5971_v45  ;;  %v1389_v45 = vsel %vm1387_vm10, %v1386_v11, %v1385_v10  ;;  %v1612_v10 = vrot.slane %v7230_v22, 3 }
 0x23b   : > { %5976 = vmatprep.subr.bf16.mxu1 %v5975_v52 }
 0x23e   : > { %5978 = vmatpush3.bf16.msra.mxu1 %v5975_v52  ;;  %v4140_v52 = vld [vmem:[%s8754_s10 + $0x2b8] sm:$0xff] }
 0x23f   : > { %5980 = vmatprep.subr.bf16.mxu1 %v5979_v58  ;;  %v6035_v53 = vpack.c.bf16 %v4140_v52, %v4139_v51 }
 0x242   : > { %5982 = vmatpush3.bf16.msra.mxu1 %v5979_v58  ;;  %v4144_v58 = vld [vmem:[%s8754_s10 + $0x2d8] sm:$0xff] }
 0x243   : > { %5984 = vmatprep.subr.bf16.mxu1 %v5983_v1  ;;  %v6043_v60 = vpack.c.bf16 %v4144_v58, %v4143_v57  ;;  %v4188_v57 = vld [vmem:[%s8756_s12 + $0x298] sm:$0xff] }
 0x246   : > { %5986 = vmatpush3.bf16.msra.mxu1 %v5983_v1  ;;  %v4148_v1 = vld [vmem:[%s8754_s10 + $0x2f8] sm:$0xff] }
 0x247   : > { %5988 = vmatprep.subr.bf16.mxu1 %v5987_v4  ;;  %v6051_v2 = vpack.c.bf16 %v4148_v1, %v4147_v0  ;;  %v4190_v0 = vld [vmem:[%s8756_s12 + $0x2a8] sm:$0xff] }
 0x24a   : > { %5990 = vmatpush3.bf16.msra.mxu1 %v5987_v4  ;;  %v4151_v4 = vld [vmem:[%s8754_s10 + $0x308] sm:$0xff] }
 0x24b   : > { %5992 = vmatprep.subr.bf16.mxu1 %v5991_v7  ;;  %v6055_v6 = vpack.c.bf16 %v4151_v4, %v4150_v3  ;;  %v4192_v3 = vld [vmem:[%s8756_s12 + $0x2b8] sm:$0xff] }
 0x24d   : > { %5024 = vmatmul.mubr.f32.vlgmr.msra.gmra.mrb[4].mxu1 %v7230_v22  ;;  %v1614_v22 = vsel %vm1613_vm14, %v1611_v9, %v1612_v10 }
 0x24e   : > { %5994 = vmatpush3.bf16.msra.mxu1 %v5991_v7  ;;  %5058 = vmatprep.mubr.f32.mxu1 %v1388_v15  ;;  %v4152_v7 = vld [vmem:[%s8754_s10 + $0x310] sm:$0xff] }
 0x24f   : > { %5996 = vmatprep.subr.bf16.mxu1 %v5995_v12  ;;  %v6059_v11 = vpack.c.bf16 %v4153_v8, %v4152_v7  ;;  %v4156_v15 = vld [vmem:[%s8754_s10 + $0x330] sm:$0xff] }
 0x250   : > { %v4195_v8 = vld [vmem:[%s8756_s12 + $0x2d0] sm:$0xff] }
 0x252   : > { %5998 = vmatpush3.bf16.msra.mxu1 %v5995_v12  ;;  %v1502_v12 = vsel %vm1500_vm12, %v1499_v43, %v1498_v42  ;;  %v4185_v42 = vld [vmem:[%s8756_s12 + $0x280] sm:$0xff]  ;;  %v4186_v43 = vld [vmem:[%s8756_s12 + $0x288] sm:$0xff] }
 0x253   : > { %6000 = vmatprep.subr.bf16.mxu1 %v5999_v16 }
 0x256   : > { %6002 = vmatpush3.bf16.msra.mxu1 %v5999_v16  ;;  %v4157_v16 = vld [vmem:[%s8754_s10 + $0x338] sm:$0xff] }
 0x257   : > { %6004 = vmatprep.subr.bf16.mxu1 %v6003_v19  ;;  %v6067_v17 = vpack.c.bf16 %v4157_v16, %v4156_v15  ;;  %v1938_v15 = vld [vmem:[%s8756_s12] sm:$0xff]  ;;  %v1939_v16 = vld [vmem:[%s8756_s12 + $0x8] sm:$0xff] }
 0x25a   : > { %6006 = vmatpush3.bf16.msra.mxu1 %v6003_v19  ;;  %v4159_v19 = vld [vmem:[%s8754_s10 + $0x348] sm:$0xff] }
 0x25b   : > { %6008 = vmatprep.subr.bf16.mxu1 %v6007_v23  ;;  %v6071_v20 = vpack.c.bf16 %v4159_v19, %v4158_v18  ;;  %v1940_v18 = vld [vmem:[%s8756_s12 + $0x10] sm:$0xff]  ;;  %v1941_v19 = vld [vmem:[%s8756_s12 + $0x18] sm:$0xff] }
 0x25e   : > { %6010 = vmatpush3.bf16.msra.mxu1 %v6007_v23  ;;  %v4161_v23 = vld [vmem:[%s8754_s10 + $0x358] sm:$0xff] }
 0x25f   : > { %6012 = vmatprep.subr.bf16.mxu1 %v6011_v27  ;;  %v6075_v25 = vpack.c.bf16 %v4161_v23, %v4160_v21  ;;  %v1942_v21 = vld [vmem:[%s8756_s12 + $0x20] sm:$0xff]  ;;  %v1943_v23 = vld [vmem:[%s8756_s12 + $0x28] sm:$0xff] }
 0x262   : > { %6014 = vmatpush3.bf16.msra.mxu1 %v6011_v27  ;;  %v4163_v27 = vld [vmem:[%s8754_s10 + $0x368] sm:$0xff] }
 0x263   : > { %6016 = vmatprep.subr.bf16.mxu1 %v6015_v30  ;;  %v6079_v28 = vpack.c.bf16 %v4163_v27, %v4162_v26  ;;  %v1944_v26 = vld [vmem:[%s8756_s12 + $0x30] sm:$0xff]  ;;  %v1945_v27 = vld [vmem:[%s8756_s12 + $0x38] sm:$0xff] }
 0x266   : > { %6018 = vmatpush3.bf16.msra.mxu1 %v6015_v30  ;;  %v4165_v30 = vld [vmem:[%s8754_s10 + $0x378] sm:$0xff] }
 0x267   : > { %6020 = vmatprep.subr.bf16.mxu1 %v6019_v34  ;;  %v6083_v31 = vpack.c.bf16 %v4165_v30, %v4164_v29  ;;  %v1946_v29 = vld [vmem:[%s8756_s12 + $0x40] sm:$0xff]  ;;  %v1947_v30 = vld [vmem:[%s8756_s12 + $0x48] sm:$0xff] }
 0x26a   : > { %6022 = vmatpush3.bf16.msra.mxu1 %v6019_v34  ;;  %v1615_v34 = vsel %vm1613_vm14, %v1612_v10, %v1611_v9  ;;  %v4196_v9 = vld [vmem:[%s8756_s12 + $0x2d8] sm:$0xff] }
 0x26b   : > { %6024 = vmatprep.subr.bf16.mxu1 %v6023_v38  ;;  %v6139_v10 = vpack.c.bf16 %v4196_v9, %v4195_v8  ;;  %v4219_v8 = vld [vmem:[%s8756_s12 + $0x188] sm:$0xff] }
 0x26d   : > { %5059 = vmatmul.mubr.msk.f32.vlgmr.msra.gmra.mrb[4].mxu1 %vm1395_vm11, %v1389_v45  ;;  %v4064_v45 = vld [vmem:[%s8755_s11] ss:$0 sm:$0xff] }
 0x26e   : > { %6026 = vmatpush3.bf16.msra.mxu1 %v6023_v38  ;;  %5093 = vmatprep.mubr.f32.mxu1 %v1501_v49  ;;  %v6111_v38 = vpack.c.bf16 %v4181_v36, %v4180_v35  ;;  %v1950_v36 = vld [vmem:[%s8756_s12 + $0x60] sm:$0xff] }
 0x26f   : > { %6028 = vmatprep.subr.bf16.mxu1 %v6027_v44 }
 0x270   : > { %6112 = vmatprep.subr.bf16.mxu0 %v6111_v38 }
 0x271   : > { %6114 = vmatpush3.bf16.msra.mxu0 %v6111_v38  ;;  %v1951_v38 = vld [vmem:[%s8756_s12 + $0x68] sm:$0xff] }
 0x272   : > { %6030 = vmatpush3.bf16.msra.mxu1 %v6027_v44  ;;  %6116 = vmatprep.subr.bf16.mxu0 %v6115_v41  ;;  %v6119_v44 = vpack.c.bf16 %v4186_v43, %v4185_v42  ;;  %v6175_v33 = vpack.c.bf16 %v1951_v38, %v1950_v36  ;;  %v4202_v43 = vld [vmem:[%s8756_s12 + $0x200] sm:$0xff] }
 0x273   : > { %6032 = vmatprep.subr.bf16.mxu1 %v6031_v50  ;;  %v2547_v38 = vld [vmem:[%s8758_s14 + $0x40] sm:$0xff] }
 0x275   : > { %6118 = vmatpush3.bf16.msra.mxu0 %v6115_v41  ;;  %v1953_v41 = vld [vmem:[%s8756_s12 + $0x78] sm:$0xff] }
 0x276   : > { %6034 = vmatpush3.bf16.msra.mxu1 %v6031_v50  ;;  %6120 = vmatprep.subr.bf16.mxu0 %v6119_v44  ;;  %v6179_v42 = vpack.c.bf16 %v1953_v41, %v1952_v40  ;;  %v4230_v41 = vld [vmem:[%s8756_s12 + $0x1e0] sm:$0xff] }
 0x277   : > { %6036 = vmatprep.subr.bf16.mxu1 %v6035_v53 }
 0x27a   : > { %6038 = vmatpush3.bf16.msra.mxu1 %v6035_v53 }
 0x27b   : > { %6040 = vmatprep.subr.bf16.mxu1 %v6039_v56 }
 0x27e   : > { %6042 = vmatpush3.bf16.msra.mxu1 %v6039_v56  ;;  %v4187_v56 = vld [vmem:[%s8756_s12 + $0x290] sm:$0xff] }
 0x27f   : > { %6044 = vmatprep.subr.bf16.mxu1 %v6043_v60  ;;  %v6123_v62 = vpack.c.bf16 %v4188_v57, %v4187_v56  ;;  %v4209_v56 = vld [vmem:[%s8756_s12 + $0x238] sm:$0xff] }
 0x282   : > { %6046 = vmatpush3.bf16.msra.mxu1 %v6043_v60 }
 0x283   : > { %6048 = vmatprep.subr.bf16.mxu1 %v6047_v63 }
 0x286   : > { %6050 = vmatpush3.bf16.msra.mxu1 %v6047_v63  ;;  %v4189_v63 = vld [vmem:[%s8756_s12 + $0x2a0] sm:$0xff] }
 0x287   : > { %6052 = vmatprep.subr.bf16.mxu1 %v6051_v2  ;;  %v6127_v1 = vpack.c.bf16 %v4190_v0, %v4189_v63  ;;  %v4213_v63 = vld [vmem:[%s8756_s12 + $0x258] sm:$0xff] }
 0x28a   : > { %6054 = vmatpush3.bf16.msra.mxu1 %v6051_v2  ;;  %v4191_v2 = vld [vmem:[%s8756_s12 + $0x2b0] sm:$0xff] }
 0x28b   : > { %6056 = vmatprep.subr.bf16.mxu1 %v6055_v6  ;;  %v6131_v4 = vpack.c.bf16 %v4192_v3, %v4191_v2  ;;  %v4215_v2 = vld [vmem:[%s8756_s12 + $0x268] sm:$0xff] }
 0x28d   : > { %5094 = vmatmul.mubr.msk.f32.vlgmr.msra.gmra.mrb[4].mxu1 %vm1508_vm13, %v1502_v12  ;;  %v4198_v12 = vld [vmem:[%s8756_s12 + $0x2e8] sm:$0xff] }
 0x28e   : > { %6058 = vmatpush3.bf16.msra.mxu1 %v6055_v6  ;;  %5128 = vmatprep.mubr.f32.mxu1 %v1614_v22  ;;  %v4194_v6 = vld [vmem:[%s8756_s12 + $0x2c8] sm:$0xff]  ;;  %v4200_v22 = vld [vmem:[%s8756_s12 + $0x2f8] sm:$0xff] }
 0x28f   : > { %6060 = vmatprep.subr.bf16.mxu1 %v6059_v11  ;;  %v6135_v7 = vpack.c.bf16 %v4194_v6, %v4193_v5  ;;  %v4217_v5 = vld [vmem:[%s8756_s12 + $0x278] sm:$0xff] }
 0x292   : > { %6062 = vmatpush3.bf16.msra.mxu1 %v6059_v11  ;;  %v4197_v11 = vld [vmem:[%s8756_s12 + $0x2e0] sm:$0xff] }
 0x293   : > { %6064 = vmatprep.subr.bf16.mxu1 %v6063_v24  ;;  %v6143_v13 = vpack.c.bf16 %v4198_v12, %v4197_v11  ;;  %v4221_v11 = vld [vmem:[%s8756_s12 + $0x198] sm:$0xff] }
 0x296   : > { %6066 = vmatpush3.bf16.msra.mxu1 %v6063_v24  ;;  %v6147_v24 = vpack.c.bf16 %v4200_v22, %v4199_v14  ;;  %v4223_v14 = vld [vmem:[%s8756_s12 + $0x1a8] sm:$0xff]  ;;  %v2539_v22 = vld [vmem:[%s8758_s14] sm:$0xff] }
 0x297   : > { %6068 = vmatprep.subr.bf16.mxu1 %v6067_v17 }
 0x29a   : > { %6070 = vmatpush3.bf16.msra.mxu1 %v6067_v17  ;;  %v6151_v17 = vpack.c.bf16 %v1939_v16, %v1938_v15  ;;  %v2541_v16 = vld [vmem:[%s8758_s14 + $0x10] sm:$0xff] }
 0x29b   : > { %6072 = vmatprep.subr.bf16.mxu1 %v6071_v20 }
 0x29e   : > { %6074 = vmatpush3.bf16.msra.mxu1 %v6071_v20  ;;  %v6155_v20 = vpack.c.bf16 %v1941_v19, %v1940_v18  ;;  %v4224_v19 = vld [vmem:[%s8756_s12 + $0x1b0] sm:$0xff] }
 0x29f   : > { %6076 = vmatprep.subr.bf16.mxu1 %v6075_v25 }
 0x2a2   : > { %6078 = vmatpush3.bf16.msra.mxu1 %v6075_v25  ;;  %v6159_v25 = vpack.c.bf16 %v1943_v23, %v1942_v21  ;;  %v2543_v23 = vld [vmem:[%s8758_s14 + $0x20] sm:$0xff] }
 0x2a3   : > { %6080 = vmatprep.subr.bf16.mxu1 %v6079_v28 }
 0x2a6   : > { %6082 = vmatpush3.bf16.msra.mxu1 %v6079_v28  ;;  %v6163_v28 = vpack.c.bf16 %v1945_v27, %v1944_v26  ;;  %v4226_v27 = vld [vmem:[%s8756_s12 + $0x1c0] sm:$0xff] }
 0x2a7   : > { %6084 = vmatprep.subr.bf16.mxu1 %v6083_v31 }
 0x2aa   : > { %6086 = vmatpush3.bf16.msra.mxu1 %v6083_v31  ;;  %v6167_v31 = vpack.c.bf16 %v1947_v30, %v1946_v29  ;;  %v2545_v30 = vld [vmem:[%s8758_s14 + $0x30] sm:$0xff] }
 0x2ad   : > { %5129 = vmatmul.mubr.msk.f32.vlgmr.msra.gmra.mrb[4].mxu1 %vm1621_vm15, %v1615_v34  ;;  %v1949_v34 = vld [vmem:[%s8756_s12 + $0x58] sm:$0xff] }
 0x2ae   : > { %v6171_v35 = vpack.c.bf16 %v1949_v34, %v1948_v32  ;;  %v4228_v34 = vld [vmem:[%s8756_s12 + $0x1d0] sm:$0xff] }
 0x380   : > { %v5130_v47 = vpop.f32.mrb[4].mxu1 }
 0x381   : > { %v6727_v48 = vadd.f32 %v5130_v47, %v4064_v45  ;;  %v1713_v49 = vpop.f32.mrb[5].mxu1  ;;  %v4204_v47 = vld [vmem:[%s8756_s12 + $0x210] sm:$0xff] }
 0x382   : > { %v6728_v50 = vadd.f32 %v4064_v45, %v1713_v49 }
 0x383   : > { %vm1725_vm0 = vcmp.ge.f32.partialorder %v6727_v48, 0.0  ;;  %v1727_v51 = vmul.f32 0.1, %v6727_v48 }
 0x384   : > { %vm1724_vm1 = vcmp.ge.f32.partialorder %v6728_v50, 0.0  ;;  %v1726_v52 = vmul.f32 0.1, %v6728_v50 }
 0x385   : > { %v7637_v53 = vsel %vm1725_vm0, %v6727_v48, %v1727_v51  ;;  %v4205_v48 = vld [vmem:[%s8756_s12 + $0x218] sm:$0xff]  ;;  %v4207_v51 = vld [vmem:[%s8756_s12 + $0x228] sm:$0xff] }
 0x386   : > { %v7639_v54 = vsel %vm1724_vm1, %v6728_v50, %v1726_v52  ;;  %v1739_v55 = vrot.slane %v7637_v53, 7  ;;  %v6187_v49 = vpack.c.bf16 %v4205_v48, %v4204_v47  ;;  %v4206_v50 = vld [vmem:[%s8756_s12 + $0x220] sm:$0xff]  ;;  %v4233_v47 = vld [vmem:[%s8756_s12 + $0x1f8] sm:$0xff]  ;;  %v2549_v48 = vld [vmem:[%s8758_s14 + $0x50] sm:$0xff] }
 0x387   : > { %v1738_v58 = vrot.slane %v7639_v54, 7  ;;  %v6191_v52 = vpack.c.bf16 %v4207_v51, %v4206_v50  ;;  %v4234_v51 = vld [vmem:[%s8756_s12 + $0x380] sm:$0xff] }
 0x389   : > { %v1741_v60 = vsel %vm1180_vm8, %v1739_v55, %v1738_v58  ;;  %v7653_v61 = vsel %vm1180_vm8, %v1738_v58, %v1739_v55  ;;  %v4208_v55 = vld [vmem:[%s8756_s12 + $0x230] sm:$0xff]  ;;  %v4210_v58 = vld [vmem:[%s8756_s12 + $0x240] sm:$0xff] }
 0x38a   : > { %5163 = vmatprep.mubr.msk.f32.mxu0 %vm1185_vm9, %v1741_v60  ;;  %v6195_v57 = vpack.c.bf16 %v4209_v56, %v4208_v55  ;;  %v4235_v55 = vld [vmem:[%s8756_s12 + $0x388] sm:$0xff]  ;;  %v2551_v56 = vld [vmem:[%s8758_s14 + $0x60] sm:$0xff] }
 0x38b   : > { %5164 = vmatmul.mubr.f32.vlgmr.msra.gmra.mrb[2].mxu0 %v7653_v61 }
 0x38c   : > { %6122 = vmatpush3.bf16.msra.mxu0 %v6119_v44  ;;  %5198 = vmatprep.mubr.f32.mxu0 %v7639_v54  ;;  %v4203_v44 = vld [vmem:[%s8756_s12 + $0x208] sm:$0xff] }
 0x38d   : > { %6124 = vmatprep.subr.bf16.mxu0 %v6123_v62  ;;  %v6183_v45 = vpack.c.bf16 %v4203_v44, %v4202_v43 }
 0x390   : > { %6126 = vmatpush3.bf16.msra.mxu0 %v6123_v62  ;;  %v4212_v62 = vld [vmem:[%s8756_s12 + $0x250] sm:$0xff] }
 0x391   : > { %6128 = vmatprep.subr.bf16.mxu0 %v6127_v1  ;;  %v6203_v0 = vpack.c.bf16 %v4213_v63, %v4212_v62  ;;  %v2554_v62 = vld [vmem:[%s8758_s14 + $0x78] sm:$0xff]  ;;  %v4236_v63 = vld [vmem:[%s8756_s12 + $0x390] sm:$0xff] }
 0x394   : > { %6130 = vmatpush3.bf16.msra.mxu0 %v6127_v1  ;;  %v4214_v1 = vld [vmem:[%s8756_s12 + $0x260] sm:$0xff] }
 0x395   : > { %6132 = vmatprep.subr.bf16.mxu0 %v6131_v4  ;;  %v6207_v3 = vpack.c.bf16 %v4215_v2, %v4214_v1  ;;  %v2225_v1 = vrot.slane %v7639_v54, 1  ;;  %v2226_v2 = vrot.slane %v7637_v53, 1 }
 0x398   : > { %6134 = vmatpush3.bf16.msra.mxu0 %v6131_v4  ;;  %v4216_v4 = vld [vmem:[%s8756_s12 + $0x270] sm:$0xff] }
 0x399   : > { %6136 = vmatprep.subr.bf16.mxu0 %v6135_v7  ;;  %v6211_v6 = vpack.c.bf16 %v4217_v5, %v4216_v4  ;;  %v4238_v5 = vld [vmem:[%s8756_s12 + $0x3a0] sm:$0xff] }
 0x39c   : > { %6138 = vmatpush3.bf16.msra.mxu0 %v6135_v7  ;;  %v4218_v7 = vld [vmem:[%s8756_s12 + $0x180] sm:$0xff] }
 0x39d   : > { %6140 = vmatprep.subr.bf16.mxu0 %v6139_v10  ;;  %v6215_v9 = vpack.c.bf16 %v4219_v8, %v4218_v7  ;;  %v7948_v7 = vsel %vm1387_vm10, %v2225_v1, %v2226_v2  ;;  %v4286_v8 = vld [vmem:[%s8758_s14 + $0x80] sm:$0xff] }
 0x3a0   : > { %6142 = vmatpush3.bf16.msra.mxu0 %v6139_v10  ;;  %v4220_v10 = vld [vmem:[%s8756_s12 + $0x190] sm:$0xff] }
 0x3a1   : > { %6144 = vmatprep.subr.bf16.mxu0 %v6143_v13  ;;  %v6219_v12 = vpack.c.bf16 %v4221_v11, %v4220_v10 }
 0x3a4   : > { %6146 = vmatpush3.bf16.msra.mxu0 %v6143_v13  ;;  %v4222_v13 = vld [vmem:[%s8756_s12 + $0x1a0] sm:$0xff] }
 0x3a5   : > { %6148 = vmatprep.subr.bf16.mxu0 %v6147_v24  ;;  %v6223_v18 = vpack.c.bf16 %v4223_v14, %v4222_v13  ;;  %v4241_v13 = vld [vmem:[%s8756_s12 + $0x3b8] sm:$0xff] }
 0x3a8   : > { %6150 = vmatpush3.bf16.msra.mxu0 %v6147_v24  ;;  %v2540_v24 = vld [vmem:[%s8758_s14 + $0x8] sm:$0xff] }
 0x3a9   : > { %6152 = vmatprep.subr.bf16.mxu0 %v6151_v17  ;;  %v7822_v15 = vpack.c.bf16 %v2540_v24, %v2539_v22  ;;  %v4242_v22 = vld [vmem:[%s8756_s12 + $0x3c0] sm:$0xff]  ;;  %v4243_v24 = vld [vmem:[%s8756_s12 + $0x3c8] sm:$0xff] }
 0x3ab   : > { %5199 = vmatmul.mubr.f32.vlgmr.msra.gmra.mrb[2].mxu0 %v7637_v53  ;;  %6344 = vmatprep.subr.bf16.mxu1 %v7822_v15 }
 0x3ac   : > { %6154 = vmatpush3.bf16.msra.mxu0 %v6151_v17  ;;  %5233 = vmatprep.mubr.msk.f32.mxu0 %vm1185_vm9, %v1741_v60  ;;  %v4211_v60 = vld [vmem:[%s8756_s12 + $0x248] sm:$0xff]  ;;  %v2542_v17 = vld [vmem:[%s8758_s14 + $0x18] sm:$0xff] }
 0x3ad   : > { %6156 = vmatprep.subr.bf16.mxu0 %v6155_v20  ;;  %v7836_v21 = vpack.c.bf16 %v2542_v17, %v2541_v16  ;;  %6346 = vmatpush3.bf16.msra.mxu1 %v7822_v15  ;;  %v6263_v16 = vpack.c.bf16 %v4243_v24, %v4242_v22  ;;  %v4244_v17 = vld [vmem:[%s8756_s12 + $0x3d0] sm:$0xff] }
 0x3ae   : > { %v4277_v24 = vld [vmem:[%s8756_s12 + $0x350] sm:$0xff] }
 0x3af   : > { %6348 = vmatprep.subr.bf16.mxu1 %v7836_v21 }
 0x3b0   : > { %6158 = vmatpush3.bf16.msra.mxu0 %v6155_v20  ;;  %v4225_v20 = vld [vmem:[%s8756_s12 + $0x1b8] sm:$0xff] }
 0x3b1   : > { %6160 = vmatprep.subr.bf16.mxu0 %v6159_v25  ;;  %v6227_v26 = vpack.c.bf16 %v4225_v20, %v4224_v19  ;;  %6350 = vmatpush3.bf16.msra.mxu1 %v7836_v21  ;;  %v4246_v20 = vld [vmem:[%s8756_s12 + $0x3e0] sm:$0xff] }
 0x3b4   : > { %6162 = vmatpush3.bf16.msra.mxu0 %v6159_v25  ;;  %v2544_v25 = vld [vmem:[%s8758_s14 + $0x28] sm:$0xff] }
 0x3b5   : > { %6164 = vmatprep.subr.bf16.mxu0 %v6163_v28  ;;  %v7853_v29 = vpack.c.bf16 %v2544_v25, %v2543_v23  ;;  %v4247_v23 = vld [vmem:[%s8756_s12 + $0x3e8] sm:$0xff] }
 0x3b6   : > { %v6271_v25 = vpack.c.bf16 %v4247_v23, %v4246_v20  ;;  %v4281_v23 = vld [vmem:[%s8756_s12 + $0x370] sm:$0xff] }
 0x3b7   : > { %6352 = vmatprep.subr.bf16.mxu1 %v7853_v29 }
 0x3b8   : > { %6166 = vmatpush3.bf16.msra.mxu0 %v6163_v28  ;;  %v4227_v28 = vld [vmem:[%s8756_s12 + $0x1c8] sm:$0xff]  ;;  %6354 = vmatpush3.bf16.msra.mxu1 %v7853_v29 }
 0x3b9   : > { %6168 = vmatprep.subr.bf16.mxu0 %v6167_v31  ;;  %v6231_v32 = vpack.c.bf16 %v4227_v28, %v4226_v27  ;;  %v4249_v27 = vld [vmem:[%s8756_s12 + $0x3f8] sm:$0xff] }
 0x3bc   : > { %6170 = vmatpush3.bf16.msra.mxu0 %v6167_v31  ;;  %v2546_v31 = vld [vmem:[%s8758_s14 + $0x38] sm:$0xff] }
 0x3bd   : > { %6172 = vmatprep.subr.bf16.mxu0 %v6171_v35  ;;  %v7869_v36 = vpack.c.bf16 %v2546_v31, %v2545_v30  ;;  %v4251_v30 = vld [vmem:[%s8756_s12 + $0x100] sm:$0xff]  ;;  %v4252_v31 = vld [vmem:[%s8756_s12 + $0x108] sm:$0xff] }
 0x3bf   : > { %6356 = vmatprep.subr.bf16.mxu1 %v7869_v36 }
 0x3c0   : > { %6174 = vmatpush3.bf16.msra.mxu0 %v6171_v35  ;;  %v4229_v35 = vld [vmem:[%s8756_s12 + $0x1d8] sm:$0xff]  ;;  %6358 = vmatpush3.bf16.msra.mxu1 %v7869_v36 }
 0x3c1   : > { %6176 = vmatprep.subr.bf16.mxu0 %v6175_v33  ;;  %v6235_v40 = vpack.c.bf16 %v4229_v35, %v4228_v34  ;;  %v4253_v34 = vld [vmem:[%s8756_s12 + $0x110] sm:$0xff]  ;;  %v4254_v35 = vld [vmem:[%s8756_s12 + $0x118] sm:$0xff] }
 0x3c4   : > { %6178 = vmatpush3.bf16.msra.mxu0 %v6175_v33  ;;  %v2548_v33 = vld [vmem:[%s8758_s14 + $0x48] sm:$0xff] }
 0x3c5   : > { %6180 = vmatprep.subr.bf16.mxu0 %v6179_v42  ;;  %v7885_v43 = vpack.c.bf16 %v2548_v33, %v2547_v38  ;;  %v6283_v38 = vpack.c.bf16 %v4254_v35, %v4253_v34  ;;  %v8005_v33 = vsel %vm1387_vm10, %v2226_v2, %v2225_v1  ;;  %v4268_v1 = vld [vmem:[%s8756_s12 + $0x308] sm:$0xff] }
 0x3c7   : > { %6360 = vmatprep.subr.bf16.mxu1 %v7885_v43 }
 0x3c8   : > { %6182 = vmatpush3.bf16.msra.mxu0 %v6179_v42  ;;  %v4231_v42 = vld [vmem:[%s8756_s12 + $0x1e8] sm:$0xff]  ;;  %6362 = vmatpush3.bf16.msra.mxu1 %v7885_v43 }
 0x3c9   : > { %6184 = vmatprep.subr.bf16.mxu0 %v6183_v45  ;;  %v6239_v44 = vpack.c.bf16 %v4231_v42, %v4230_v41  ;;  %v4256_v41 = vld [vmem:[%s8756_s12 + $0x128] sm:$0xff] }
 0x3cb   : > { %5234 = vmatmul.mubr.f32.vlgmr.msra.gmra.mrb[4].mxu0 %v7653_v61  ;;  %v6199_v61 = vpack.c.bf16 %v4211_v60, %v4210_v58  ;;  %v6247_v60 = vpack.c.bf16 %v4235_v55, %v4234_v51  ;;  %v4262_v51 = vld [vmem:[%s8756_s12 + $0x158] sm:$0xff] }
 0x3cc   : > { %6186 = vmatpush3.bf16.msra.mxu0 %v6183_v45  ;;  %5268 = vmatprep.mubr.f32.mxu0 %v7639_v54  ;;  %v4232_v45 = vld [vmem:[%s8756_s12 + $0x1f0] sm:$0xff] }
 0x3cd   : > { %6188 = vmatprep.subr.bf16.mxu0 %v6187_v49  ;;  %v6243_v50 = vpack.c.bf16 %v4233_v47, %v4232_v45  ;;  %v4258_v45 = vld [vmem:[%s8756_s12 + $0x138] sm:$0xff] }
 0x3d0   : > { %6190 = vmatpush3.bf16.msra.mxu0 %v6187_v49  ;;  %v2550_v49 = vld [vmem:[%s8758_s14 + $0x58] sm:$0xff] }
 0x3d1   : > { %6192 = vmatprep.subr.bf16.mxu0 %v6191_v52 }
 0x3d4   : > { %6194 = vmatpush3.bf16.msra.mxu0 %v6191_v52  ;;  %v7905_v52 = vpack.c.bf16 %v2550_v49, %v2549_v48  ;;  %v4259_v48 = vld [vmem:[%s8756_s12 + $0x140] sm:$0xff] }
 0x3d5   : > { %6196 = vmatprep.subr.bf16.mxu0 %v6195_v57 }
 0x3d6   : > { %6364 = vmatprep.subr.bf16.mxu1 %v7905_v52 }
 0x3d7   : > { %6366 = vmatpush3.bf16.msra.mxu1 %v7905_v52 }
 0x3d8   : > { %6198 = vmatpush3.bf16.msra.mxu0 %v6195_v57  ;;  %v2552_v57 = vld [vmem:[%s8758_s14 + $0x68] sm:$0xff] }
 0x3d9   : > { %6200 = vmatprep.subr.bf16.mxu0 %v6199_v61  ;;  %v7916_v58 = vpack.c.bf16 %v2552_v57, %v2551_v56  ;;  %v4263_v56 = vld [vmem:[%s8756_s12 + $0x160] sm:$0xff]  ;;  %v4264_v57 = vld [vmem:[%s8756_s12 + $0x168] sm:$0xff] }
 0x3db   : > { %6368 = vmatprep.subr.bf16.mxu1 %v7916_v58 }
 0x3dc   : > { %6202 = vmatpush3.bf16.msra.mxu0 %v6199_v61  ;;  %v2553_v61 = vld [vmem:[%s8758_s14 + $0x70] sm:$0xff]  ;;  %6370 = vmatpush3.bf16.msra.mxu1 %v7916_v58 }
 0x3dd   : > { %6204 = vmatprep.subr.bf16.mxu0 %v6203_v0 }
 0x3e0   : > { %6206 = vmatpush3.bf16.msra.mxu0 %v6203_v0  ;;  %v4237_v0 = vld [vmem:[%s8756_s12 + $0x398] sm:$0xff] }
 0x3e1   : > { %6208 = vmatprep.subr.bf16.mxu0 %v6207_v3  ;;  %v6251_v4 = vpack.c.bf16 %v4237_v0, %v4236_v63  ;;  %v4267_v0 = vld [vmem:[%s8756_s12 + $0x300] sm:$0xff] }
 0x3e2   : > { %v6311_v2 = vpack.c.bf16 %v4268_v1, %v4267_v0  ;;  %v4300_v0 = vld [vmem:[%s8758_s14 + $0xf0] sm:$0xff]  ;;  %v4301_v1 = vld [vmem:[%s8758_s14 + $0xf8] sm:$0xff] }
 0x3e4   : > { %6210 = vmatpush3.bf16.msra.mxu0 %v6207_v3  ;;  %v7935_v3 = vpack.c.bf16 %v2554_v62, %v2553_v61  ;;  %v4265_v61 = vld [vmem:[%s8756_s12 + $0x170] sm:$0xff]  ;;  %v4266_v62 = vld [vmem:[%s8756_s12 + $0x178] sm:$0xff] }
 0x3e5   : > { %6212 = vmatprep.subr.bf16.mxu0 %v6211_v6  ;;  %v6307_v63 = vpack.c.bf16 %v4266_v62, %v4265_v61  ;;  %v4298_v61 = vld [vmem:[%s8758_s14 + $0xe0] sm:$0xff]  ;;  %v4299_v62 = vld [vmem:[%s8758_s14 + $0xe8] sm:$0xff] }
 0x3e6   : > { %6372 = vmatprep.subr.bf16.mxu1 %v7935_v3 }
 0x3e7   : > { %6374 = vmatpush3.bf16.msra.mxu1 %v7935_v3 }
 0x3e8   : > { %6214 = vmatpush3.bf16.msra.mxu0 %v6211_v6  ;;  %v4239_v6 = vld [vmem:[%s8756_s12 + $0x3a8] sm:$0xff] }
 0x3e9   : > { %6216 = vmatprep.subr.bf16.mxu0 %v6215_v9  ;;  %v6255_v11 = vpack.c.bf16 %v4239_v6, %v4238_v5  ;;  %v4270_v5 = vld [vmem:[%s8756_s12 + $0x318] sm:$0xff] }
 0x3eb   : > { %5269 = vmatmul.mubr.f32.vlgmr.msra.gmra.mrb[4].mxu0 %v7637_v53 }
 0x3ec   : > { %6218 = vmatpush3.bf16.msra.mxu0 %v6215_v9  ;;  %5303 = vmatprep.mubr.f32.mxu0 %v7639_v54  ;;  %v4287_v9 = vld [vmem:[%s8758_s14 + $0x88] sm:$0xff] }
 0x3ed   : > { %6220 = vmatprep.subr.bf16.mxu0 %v6219_v12  ;;  %v7957_v10 = vpack.c.bf16 %v4287_v9, %v4286_v8  ;;  %v4271_v8 = vld [vmem:[%s8756_s12 + $0x320] sm:$0xff]  ;;  %v4272_v9 = vld [vmem:[%s8756_s12 + $0x328] sm:$0xff] }
 0x3ef   : > { %6376 = vmatprep.subr.bf16.mxu1 %v7957_v10 }
 0x3f0   : > { %6222 = vmatpush3.bf16.msra.mxu0 %v6219_v12  ;;  %v4240_v12 = vld [vmem:[%s8756_s12 + $0x3b0] sm:$0xff] }
 0x3f1   : > { %6224 = vmatprep.subr.bf16.mxu0 %v6223_v18  ;;  %v6259_v14 = vpack.c.bf16 %v4241_v13, %v4240_v12  ;;  %v4273_v12 = vld [vmem:[%s8756_s12 + $0x330] sm:$0xff]  ;;  %v4274_v13 = vld [vmem:[%s8756_s12 + $0x338] sm:$0xff] }
 0x3f4   : > { %6226 = vmatpush3.bf16.msra.mxu0 %v6223_v18  ;;  %v4245_v18 = vld [vmem:[%s8756_s12 + $0x3d8] sm:$0xff] }
 0x3f5   : > { %6228 = vmatprep.subr.bf16.mxu0 %v6227_v26  ;;  %v6267_v19 = vpack.c.bf16 %v4245_v18, %v4244_v17  ;;  %v4279_v18 = vld [vmem:[%s8756_s12 + $0x360] sm:$0xff] }
 0x3f8   : > { %6230 = vmatpush3.bf16.msra.mxu0 %v6227_v26  ;;  %v4248_v26 = vld [vmem:[%s8756_s12 + $0x3f0] sm:$0xff] }
 0x3f9   : > { %6232 = vmatprep.subr.bf16.mxu0 %v6231_v32  ;;  %v6275_v28 = vpack.c.bf16 %v4249_v27, %v4248_v26  ;;  %v8113_v27 = vld [vmem:[%s8787_s21] ss:$0 sm:$0xff]  ;;  %s4331_s21 = sshll.u32 %s7061_s13, 8 }
 0x3fa   : > { %s8678_s5 = scalar_lea.hbm %s8761_s18, %s4331_s21  ;;  %s6931_s21 = smov [#allocation5]  }
 0x3fb   : > { %s6862_s30 = sshll.u32 %s6931_s21, 4  ;;  %s6863_s30 = int_to_ptr.vmem [resolvable:$false] %s6862_s30 }
 0x3fc   : > { %6234 = vmatpush3.bf16.msra.mxu0 %v6231_v32  ;;  %v6279_v32 = vpack.c.bf16 %v4252_v31, %v4251_v30  ;;  %s6864_s28 = scalar_lea.vmem %s6863_s30, 512  ;;  %p6865_p6 = scmp.lt.s32.totalorder %s8680_s29, %s6863_s30 }
 0x3fd   : > { %6236 = vmatprep.subr.bf16.mxu0 %v6235_v40  ;;  %p6866_p7 = scmp.lt.s32.totalorder %s6864_s28, %s6858_s20 }
 0x3ff   : > { %p6867_p8 = por %p6866_p7, %p6865_p6 }
 0x400   : > { %6238 = vmatpush3.bf16.msra.mxu0 %v6235_v40  ;;  %v4255_v40 = vld [vmem:[%s8756_s12 + $0x120] sm:$0xff] }
 0x401   : > { %6240 = vmatprep.subr.bf16.mxu0 %v6239_v44  ;;  %v6287_v42 = vpack.c.bf16 %v4256_v41, %v4255_v40  ;;  %v4289_v40 = vld [vmem:[%s8758_s14 + $0x98] sm:$0xff]  ;;  %p6868_p9 = pnand %p6867_p8, %p6861_p5 }
 0x404   : > { %6242 = vmatpush3.bf16.msra.mxu0 %v6239_v44  ;;  %v4257_v44 = vld [vmem:[%s8756_s12 + $0x130] sm:$0xff] }
 0x405   : > { %6244 = vmatprep.subr.bf16.mxu0 %v6243_v50  ;;  %v6291_v47 = vpack.c.bf16 %v4258_v45, %v4257_v44  ;;  %v4290_v44 = vld [vmem:[%s8758_s14 + $0xa0] sm:$0xff]  ;;  %v4291_v45 = vld [vmem:[%s8758_s14 + $0xa8] sm:$0xff] }
 0x408   : > { %6246 = vmatpush3.bf16.msra.mxu0 %v6243_v50  ;;  %v4261_v50 = vld [vmem:[%s8756_s12 + $0x150] sm:$0xff] }
 0x409   : > { %6248 = vmatprep.subr.bf16.mxu0 %v6247_v60  ;;  %v6299_v55 = vpack.c.bf16 %v4262_v51, %v4261_v50  ;;  %v4294_v50 = vld [vmem:[%s8758_s14 + $0xc0] sm:$0xff]  ;;  %v4295_v51 = vld [vmem:[%s8758_s14 + $0xc8] sm:$0xff] }
 0x40b   : > { %5304 = vmatmul.mubr.f32.vlgmr.msra.gmra.mrb[6].mxu0 %v7637_v53 }
 0x40c   : > { %6250 = vmatpush3.bf16.msra.mxu0 %v6247_v60  ;;  %5338 = vmatprep.mubr.f32.mxu0 %v7948_v7  ;;  %v6303_v60 = vpack.c.bf16 %v4264_v57, %v4263_v56  ;;  %v4296_v56 = vld [vmem:[%s8758_s14 + $0xd0] sm:$0xff]  ;;  %v4297_v57 = vld [vmem:[%s8758_s14 + $0xd8] sm:$0xff] }
 0x40d   : > { %6252 = vmatprep.subr.bf16.mxu0 %v6251_v4 }
 0x410   : > { %6254 = vmatpush3.bf16.msra.mxu0 %v6251_v4  ;;  %v4269_v4 = vld [vmem:[%s8756_s12 + $0x310] sm:$0xff] }
 0x411   : > { %6256 = vmatprep.subr.bf16.mxu0 %v6255_v11  ;;  %v6315_v6 = vpack.c.bf16 %v4270_v5, %v4269_v4  ;;  %v4302_v4 = vld [vmem:[%s8758_s14 + $0x100] sm:$0xff]  ;;  %v4303_v5 = vld [vmem:[%s8758_s14 + $0x108] sm:$0xff] }
 0x414   : > { %6258 = vmatpush3.bf16.msra.mxu0 %v6255_v11  ;;  %v6319_v11 = vpack.c.bf16 %v4272_v9, %v4271_v8 }
 0x415   : > { %6260 = vmatprep.subr.bf16.mxu0 %v6259_v14 }
 0x418   : > { %6262 = vmatpush3.bf16.msra.mxu0 %v6259_v14  ;;  %v6323_v14 = vpack.c.bf16 %v4274_v13, %v4273_v12 }
 0x419   : > { %6264 = vmatprep.subr.bf16.mxu0 %v6263_v16 }
 0x41c   : > { %6266 = vmatpush3.bf16.msra.mxu0 %v6263_v16  ;;  %v4278_v16 = vld [vmem:[%s8756_s12 + $0x358] sm:$0xff] }
 0x41d   : > { %6268 = vmatprep.subr.bf16.mxu0 %v6267_v19  ;;  %v6331_v17 = vpack.c.bf16 %v4278_v16, %v4277_v24 }
 0x420   : > { %6270 = vmatpush3.bf16.msra.mxu0 %v6267_v19  ;;  %v4280_v19 = vld [vmem:[%s8756_s12 + $0x368] sm:$0xff] }
 0x421   : > { %6272 = vmatprep.subr.bf16.mxu0 %v6271_v25  ;;  %v6335_v20 = vpack.c.bf16 %v4280_v19, %v4279_v18  ;;  %v4307_v18 = vld [vmem:[%s8758_s14 + $0x128] sm:$0xff] }
 0x424   : > { %6274 = vmatpush3.bf16.msra.mxu0 %v6271_v25  ;;  %v4282_v25 = vld [vmem:[%s8756_s12 + $0x378] sm:$0xff] }
 0x425   : > { %6276 = vmatprep.subr.bf16.mxu0 %v6275_v28  ;;  %v6339_v26 = vpack.c.bf16 %v4282_v25, %v4281_v23  ;;  %v4309_v23 = vld [vmem:[%s8758_s14 + $0x138] sm:$0xff] }
 0x428   : > { %6278 = vmatpush3.bf16.msra.mxu0 %v6275_v28 }
 0x429   : > { %6280 = vmatprep.subr.bf16.mxu0 %v6279_v32 }
 0x42b   : > { %5339 = vmatmul.mubr.msk.f32.vlgmr.msra.gmra.mrb[6].mxu0 %vm1395_vm11, %v8005_v33 }
 0x42c   : > { %6282 = vmatpush3.bf16.msra.mxu0 %v6279_v32  ;;  %5373 = vmatprep.mubr.f32.mxu0 %v7639_v54  ;;  %v4260_v54 = vld [vmem:[%s8756_s12 + $0x148] sm:$0xff] }
 0x42d   : > { %6284 = vmatprep.subr.bf16.mxu0 %v6283_v38  ;;  %v6295_v49 = vpack.c.bf16 %v4260_v54, %v4259_v48  ;;  %v4292_v48 = vld [vmem:[%s8758_s14 + $0xb0] sm:$0xff]  ;;  %v4293_v54 = vld [vmem:[%s8758_s14 + $0xb8] sm:$0xff] }
 0x430   : > { %6286 = vmatpush3.bf16.msra.mxu0 %v6283_v38 }
 0x431   : > { %6288 = vmatprep.subr.bf16.mxu0 %v6287_v42 }
 0x434   : > { %6290 = vmatpush3.bf16.msra.mxu0 %v6287_v42 }
 0x435   : > { %6292 = vmatprep.subr.bf16.mxu0 %v6291_v47 }
 0x438   : > { %6294 = vmatpush3.bf16.msra.mxu0 %v6291_v47  ;;  %v8146_v47 = vpack.c.bf16 %v4291_v45, %v4290_v44  ;;  %v4316_v44 = vld [vmem:[%s8758_s14 + $0x170] sm:$0xff]  ;;  %v4317_v45 = vld [vmem:[%s8758_s14 + $0x178] sm:$0xff] }
 0x439   : > { %6296 = vmatprep.subr.bf16.mxu0 %v6295_v49 }
 0x43c   : > { %6298 = vmatpush3.bf16.msra.mxu0 %v6295_v49  ;;  %v8156_v49 = vpack.c.bf16 %v4293_v54, %v4292_v48  ;;  %v8284_v48 = vpack.c.bf16 %v4317_v45, %v4316_v44 }
 0x43d   : > { %6300 = vmatprep.subr.bf16.mxu0 %v6299_v55 }
 0x440   : > { %6302 = vmatpush3.bf16.msra.mxu0 %v6299_v55  ;;  %v8166_v55 = vpack.c.bf16 %v4295_v51, %v4294_v50 }
 0x441   : > { %6304 = vmatprep.subr.bf16.mxu0 %v6303_v60 }
 0x444   : > { %6306 = vmatpush3.bf16.msra.mxu0 %v6303_v60  ;;  %v8176_v60 = vpack.c.bf16 %v4297_v57, %v4296_v56 }
 0x445   : > { %6308 = vmatprep.subr.bf16.mxu0 %v6307_v63 }
 0x448   : > { %6310 = vmatpush3.bf16.msra.mxu0 %v6307_v63  ;;  %v8186_v63 = vpack.c.bf16 %v4299_v62, %v4298_v61 }
 0x449   : > { %6312 = vmatprep.subr.bf16.mxu0 %v6311_v2 }
 0x44b   : > { %5374 = vmatmul.mubr.f32.vlgmr.msra.gmra.mrb[8].mxu0 %v7637_v53  ;;  %v4275_v53 = vld [vmem:[%s8756_s12 + $0x340] sm:$0xff] }
 0x44c   : > { %6314 = vmatpush3.bf16.msra.mxu0 %v6311_v2  ;;  %5408 = vmatprep.mubr.f32.mxu0 %v7948_v7  ;;  %v4276_v7 = vld [vmem:[%s8756_s12 + $0x348] sm:$0xff]  ;;  %v8196_v2 = vpack.c.bf16 %v4301_v1, %v4300_v0 }
 0x44d   : > { %6316 = vmatprep.subr.bf16.mxu0 %v6315_v6  ;;  %v6327_v22 = vpack.c.bf16 %v4276_v7, %v4275_v53  ;;  %v4305_v53 = vld [vmem:[%s8758_s14 + $0x118] sm:$0xff] }
 0x450   : > { %6318 = vmatpush3.bf16.msra.mxu0 %v6315_v6  ;;  %v8206_v6 = vpack.c.bf16 %v4303_v5, %v4302_v4 }
 0x451   : > { %6320 = vmatprep.subr.bf16.mxu0 %v6319_v11 }
 0x454   : > { %6322 = vmatpush3.bf16.msra.mxu0 %v6319_v11 }
 0x455   : > { %6324 = vmatprep.subr.bf16.mxu0 %v6323_v14 }
 0x458   : > { %6326 = vmatpush3.bf16.msra.mxu0 %v6323_v14  ;;  %v4304_v14 = vld [vmem:[%s8758_s14 + $0x110] sm:$0xff] }
 0x459   : > { %6328 = vmatprep.subr.bf16.mxu0 %v6327_v22  ;;  %v8220_v24 = vpack.c.bf16 %v4305_v53, %v4304_v14 }
 0x45c   : > { %6330 = vmatpush3.bf16.msra.mxu0 %v6327_v22 }
 0x45d   : > { %6332 = vmatprep.subr.bf16.mxu0 %v6331_v17 }
 0x460   : > { %6334 = vmatpush3.bf16.msra.mxu0 %v6331_v17  ;;  %v4306_v17 = vld [vmem:[%s8758_s14 + $0x120] sm:$0xff] }
 0x461   : > { %6336 = vmatprep.subr.bf16.mxu0 %v6335_v20  ;;  %v8234_v19 = vpack.c.bf16 %v4307_v18, %v4306_v17 }
 0x464   : > { %6338 = vmatpush3.bf16.msra.mxu0 %v6335_v20  ;;  %v4308_v20 = vld [vmem:[%s8758_s14 + $0x130] sm:$0xff] }
 0x465   : > { %6340 = vmatprep.subr.bf16.mxu0 %v6339_v26  ;;  %v8244_v25 = vpack.c.bf16 %v4309_v23, %v4308_v20 }
 0x468   : > { %6342 = vmatpush3.bf16.msra.mxu0 %v6339_v26  ;;  %v4310_v26 = vld [vmem:[%s8758_s14 + $0x140] sm:$0xff] }
 0x469   : > { %6440 = vmatprep.subr.bf16.mxu0 %v7822_v15 }
 0x46b   : > { %5409 = vmatmul.mubr.msk.f32.vlgmr.msra.gmra.mrb[8].mxu0 %vm1395_vm11, %v8005_v33  ;;  %v4288_v33 = vld [vmem:[%s8758_s14 + $0x90] sm:$0xff] }
 0x46c   : > { %6442 = vmatpush3.bf16.msra.mxu0 %v7822_v15  ;;  %v8133_v41 = vpack.c.bf16 %v4289_v40, %v4288_v33  ;;  %v4315_v33 = vld [vmem:[%s8758_s14 + $0x168] sm:$0xff] }
 0x46d   : > { %6444 = vmatprep.subr.bf16.mxu0 %v7836_v21 }
 0x470   : > { %6446 = vmatpush3.bf16.msra.mxu0 %v7836_v21 }
 0x471   : > { %6448 = vmatprep.subr.bf16.mxu0 %v7853_v29 }
 0x474   : > { %6450 = vmatpush3.bf16.msra.mxu0 %v7853_v29 }
 0x475   : > { %6452 = vmatprep.subr.bf16.mxu0 %v7869_v36 }
 0x478   : > { %6454 = vmatpush3.bf16.msra.mxu0 %v7869_v36 }
 0x479   : > { %6456 = vmatprep.subr.bf16.mxu0 %v7885_v43 }
 0x47c   : > { %6458 = vmatpush3.bf16.msra.mxu0 %v7885_v43 }
 0x47d   : > { %6460 = vmatprep.subr.bf16.mxu0 %v7905_v52 }
 0x47e   : > { %v5200_v28 = vpop.f32.mrb[2].mxu0 }
 0x47f   : > { %v1921_v30 = vpop.f32.mrb[3].mxu0  ;;  %v6729_v32 = vadd.f32 %v5200_v28, %v8113_v27  ;;  %v4311_v28 = vld [vmem:[%s8758_s14 + $0x148] sm:$0xff] }
 0x480   : > { %v6730_v31 = vadd.f32 %v8113_v27, %v1921_v30  ;;  %6462 = vmatpush3.bf16.msra.mxu0 %v7905_v52  ;;  %v8254_v30 = vpack.c.bf16 %v4311_v28, %v4310_v26  ;;  %v3616_v26 = vsub.s32 3, %v7164_v39 }
 0x481   : > { %6464 = vmatprep.subr.bf16.mxu0 %v7916_v58  ;;  %v1935_v38 = vmul.f32 0.1, %v6729_v32  ;;  %vm1933_vm3 = vcmp.ge.f32.partialorder %v6729_v32, 0.0 }
 0x482   : > { %vm1932_vm2 = vcmp.ge.f32.partialorder %v6730_v31, 0.0  ;;  %v1934_v34 = vmul.f32 0.1, %v6730_v31 }
 0x483   : > { %v8135_v42 = vsel %vm1933_vm3, %v6729_v32, %v1935_v38  ;;  %v4313_v32 = vld [vmem:[%s8758_s14 + $0x158] sm:$0xff]  ;;  %v4314_v38 = vld [vmem:[%s8758_s14 + $0x160] sm:$0xff] }
 0x484   : > { %6466 = vmatpush3.bf16.msra.mxu0 %v7916_v58  ;;  %v8121_v35 = vsel %vm1932_vm2, %v6730_v31, %v1934_v34  ;;  %v4312_v31 = vld [vmem:[%s8758_s14 + $0x150] sm:$0xff]  ;;  %v8274_v40 = vpack.c.bf16 %v4315_v33, %v4314_v38 }
 0x485   : > { %5548 = vmatprep.mubr.f32.mxu0 %v8121_v35  ;;  %6468 = vmatprep.subr.bf16.mxu0 %v7935_v3  ;;  %v8264_v34 = vpack.c.bf16 %v4313_v32, %v4312_v31 }
 0x488   : > { %6470 = vmatpush3.bf16.msra.mxu0 %v7935_v3 }
 0x489   : > { %6472 = vmatprep.subr.bf16.mxu0 %v7957_v10 }
 0x48b   : > { %5549 = vmatmul.mubr.f32.vlgmr.msra.gmra.mrb[10].mxu0 %v8135_v42 }
 0x48c   : > { %6474 = vmatpush3.bf16.msra.mxu0 %v7957_v10 }
 0x48d   : > { %6476 = vmatprep.subr.bf16.mxu0 %v8133_v41 }
 0x490   : > { %6478 = vmatpush3.bf16.msra.mxu0 %v8133_v41 }
 0x491   : > { %6480 = vmatprep.subr.bf16.mxu0 %v8146_v47 }
 0x494   : > { %6482 = vmatpush3.bf16.msra.mxu0 %v8146_v47 }
 0x495   : > { %6484 = vmatprep.subr.bf16.mxu0 %v8156_v49 }
 0x498   : > { %6486 = vmatpush3.bf16.msra.mxu0 %v8156_v49 }
 0x499   : > { %6488 = vmatprep.subr.bf16.mxu0 %v8166_v55 }
 0x49c   : > { %6490 = vmatpush3.bf16.msra.mxu0 %v8166_v55 }
 0x49d   : > { %6492 = vmatprep.subr.bf16.mxu0 %v8176_v60 }
 0x4a0   : > { %6494 = vmatpush3.bf16.msra.mxu0 %v8176_v60 }
 0x4a1   : > { %6496 = vmatprep.subr.bf16.mxu0 %v8186_v63 }
 0x4a4   : > { %6498 = vmatpush3.bf16.msra.mxu0 %v8186_v63 }
 0x4a5   : > { %6500 = vmatprep.subr.bf16.mxu0 %v8196_v2 }
 0x4a8   : > { %6502 = vmatpush3.bf16.msra.mxu0 %v8196_v2 }
 0x4a9   : > { %6504 = vmatprep.subr.bf16.mxu0 %v8206_v6 }
 0x4be   : > { %v5270_v8 = vpop.f32.mrb[4].mxu0 }
 0x4bf   : > { %v6731_v9 = vadd.f32 %v5270_v8, %v8113_v27  ;;  %v2114_v11 = vpop.f32.mrb[5].mxu0 }
 0x4c0   : > { %v6732_v12 = vadd.f32 %v8113_v27, %v2114_v11 }
 0x4c1   : > { %v2128_v13 = vmul.f32 0.1, %v6731_v9  ;;  %vm2126_vm4 = vcmp.ge.f32.partialorder %v6731_v9, 0.0 }
 0x4c2   : > { %vm2125_vm5 = vcmp.ge.f32.partialorder %v6732_v12, 0.0  ;;  %v2127_v7 = vmul.f32 0.1, %v6732_v12 }
 0x4c3   : > { %v8223_v16 = vsel %vm2126_vm4, %v6731_v9, %v2128_v13  ;;  %v3461_v13 = vrot.slane %v8135_v42, 1 }
 0x4c4   : > { %v8218_v22 = vsel %vm2125_vm5, %v6732_v12, %v2127_v7  ;;  %v3460_v12 = vrot.slane %v8121_v35, 1 }
 0x4c5   : > { %5583 = vmatprep.mubr.f32.mxu0 %v8218_v22 }
 0x4c6   : > { %5584 = vmatmul.mubr.f32.vlgmr.msra.gmra.mrb[10].mxu0 %v8223_v16  ;;  %v3462_v17 = vsel %vm1387_vm10, %v3460_v12, %v3461_v13  ;;  %v3463_v23 = vsel %vm1387_vm10, %v3461_v13, %v3460_v12 }
 0x4c7   : > { %6506 = vmatpush3.bf16.msra.mxu0 %v8206_v6 }
 0x4c8   : > { %6508 = vmatprep.subr.bf16.mxu0 %v8220_v24 }
 0x4cb   : > { %6510 = vmatpush3.bf16.msra.mxu0 %v8220_v24 }
 0x4cc   : > { %6512 = vmatprep.subr.bf16.mxu0 %v8234_v19 }
 0x4cf   : > { %6514 = vmatpush3.bf16.msra.mxu0 %v8234_v19 }
 0x4d0   : > { %6516 = vmatprep.subr.bf16.mxu0 %v8244_v25 }
 0x4d3   : > { %6518 = vmatpush3.bf16.msra.mxu0 %v8244_v25 }
 0x4d4   : > { %6520 = vmatprep.subr.bf16.mxu0 %v8254_v30 }
 0x4d7   : > { %6522 = vmatpush3.bf16.msra.mxu0 %v8254_v30 }
 0x4d8   : > { %6524 = vmatprep.subr.bf16.mxu0 %v8264_v34 }
 0x4db   : > { %6526 = vmatpush3.bf16.msra.mxu0 %v8264_v34 }
 0x4dc   : > { %6528 = vmatprep.subr.bf16.mxu0 %v8274_v40 }
 0x4df   : > { %6530 = vmatpush3.bf16.msra.mxu0 %v8274_v40 }
 0x4e0   : > { %6532 = vmatprep.subr.bf16.mxu0 %v8284_v48 }
 0x4e3   : > { %6534 = vmatpush3.bf16.msra.mxu0 %v8284_v48 }
 0x4e4   : > { %6632 = vmatprep.subr.bf16.mxu0 %v7822_v15 }
 0x4fe   : > { %v5340_v54 = vpop.f32.mrb[6].mxu0 }
 0x4ff   : > { %v6733_v50 = vadd.f32 %v5340_v54, %v8113_v27  ;;  %v2314_v51 = vpop.f32.mrb[7].mxu0 }
 0x500   : > { %v6734_v56 = vadd.f32 %v8113_v27, %v2314_v51 }
 0x501   : > { %v2328_v57 = vmul.f32 0.1, %v6733_v50  ;;  %vm2326_vm6 = vcmp.ge.f32.partialorder %v6733_v50, 0.0 }
 0x502   : > { %vm2325_vm7 = vcmp.ge.f32.partialorder %v6734_v56, 0.0  ;;  %v2327_v61 = vmul.f32 0.1, %v6734_v56 }
 0x503   : > { %v8295_v0 = vsel %vm2326_vm6, %v6733_v50, %v2328_v57 }
 0x504   : > { %v8292_v62 = vsel %vm2325_vm7, %v6734_v56, %v2327_v61 }
 0x505   : > { %5618 = vmatprep.mubr.f32.mxu0 %v8292_v62 }
 0x506   : > { %5619 = vmatmul.mubr.f32.vlgmr.msra.gmra.mrb[10].mxu0 %v8295_v0 }
 0x507   : > { %6634 = vmatpush3.bf16.msra.mxu0 %v7822_v15  ;;  %5758 = vmatprep.mubr.f32.mxu0 %v8292_v62 }
 0x508   : > { %6636 = vmatprep.subr.bf16.mxu0 %v7836_v21 }
 0x50b   : > { %6638 = vmatpush3.bf16.msra.mxu0 %v7836_v21 }
 0x50c   : > { %6640 = vmatprep.subr.bf16.mxu0 %v7853_v29 }
 0x50f   : > { %6642 = vmatpush3.bf16.msra.mxu0 %v7853_v29 }
 0x510   : > { %6644 = vmatprep.subr.bf16.mxu0 %v7869_v36 }
 0x513   : > { %6646 = vmatpush3.bf16.msra.mxu0 %v7869_v36 }
 0x514   : > { %6648 = vmatprep.subr.bf16.mxu0 %v7885_v43 }
 0x517   : > { %6650 = vmatpush3.bf16.msra.mxu0 %v7885_v43 }
 0x518   : > { %6652 = vmatprep.subr.bf16.mxu0 %v7905_v52 }
 0x51b   : > { %6654 = vmatpush3.bf16.msra.mxu0 %v7905_v52 }
 0x51c   : > { %6656 = vmatprep.subr.bf16.mxu0 %v7916_v58 }
 0x51f   : > { %6658 = vmatpush3.bf16.msra.mxu0 %v7916_v58 }
 0x520   : > { %6660 = vmatprep.subr.bf16.mxu0 %v7935_v3 }
 0x523   : > { %6662 = vmatpush3.bf16.msra.mxu0 %v7935_v3 }
 0x524   : > { %6664 = vmatprep.subr.bf16.mxu0 %v7957_v10 }
 0x526   : > { %5759 = vmatmul.mubr.f32.vlgmr.msra.gmra.mrb[12].mxu0 %v8295_v0 }
 0x527   : > { %6666 = vmatpush3.bf16.msra.mxu0 %v7957_v10 }
 0x528   : > { %6668 = vmatprep.subr.bf16.mxu0 %v8133_v41 }
 0x52b   : > { %6670 = vmatpush3.bf16.msra.mxu0 %v8133_v41 }
 0x52c   : > { %6672 = vmatprep.subr.bf16.mxu0 %v8146_v47 }
 0x52f   : > { %6674 = vmatpush3.bf16.msra.mxu0 %v8146_v47 }
 0x530   : > { %6676 = vmatprep.subr.bf16.mxu0 %v8156_v49 }
 0x533   : > { %6678 = vmatpush3.bf16.msra.mxu0 %v8156_v49 }
 0x534   : > { %6680 = vmatprep.subr.bf16.mxu0 %v8166_v55 }
 0x537   : > { %6682 = vmatpush3.bf16.msra.mxu0 %v8166_v55 }
 0x538   : > { %6684 = vmatprep.subr.bf16.mxu0 %v8176_v60 }
 0x53b   : > { %6686 = vmatpush3.bf16.msra.mxu0 %v8176_v60 }
 0x53c   : > { %6688 = vmatprep.subr.bf16.mxu0 %v8186_v63 }
 0x53e   : > { %v5410_v1 = vpop.f32.mrb[8].mxu0 }
 0x53f   : > { %v6735_v4 = vadd.f32 %v5410_v1, %v8113_v27  ;;  %6690 = vmatpush3.bf16.msra.mxu0 %v8186_v63  ;;  %v2508_v5 = vpop.f32.mrb[9].mxu0 }
 0x540   : > { %v6736_v8 = vadd.f32 %v8113_v27, %v2508_v5  ;;  %6692 = vmatprep.subr.bf16.mxu0 %v8196_v2 }
 0x541   : > { %vm2520_vm12 = vcmp.ge.f32.partialorder %v6735_v4, 0.0  ;;  %v2522_v9 = vmul.f32 0.1, %v6735_v4 }
 0x542   : > { %vm2519_vm13 = vcmp.ge.f32.partialorder %v6736_v8, 0.0  ;;  %v2521_v11 = vmul.f32 0.1, %v6736_v8 }
 0x543   : > { %6694 = vmatpush3.bf16.msra.mxu0 %v8196_v2  ;;  %v8335_v14 = vsel %vm2520_vm12, %v6735_v4, %v2522_v9 }
 0x544   : > { %v8337_v53 = vsel %vm2519_vm13, %v6736_v8, %v2521_v11  ;;  %6696 = vmatprep.subr.bf16.mxu0 %v8206_v6  ;;  %v2534_v27 = vrot.slane %v8335_v14, 7 }
 0x545   : > { %v2533_v7 = vrot.slane %v8337_v53, 7  ;;  %5793 = vmatprep.mubr.f32.mxu0 %v8337_v53 }
 0x546   : > { %5794 = vmatmul.mubr.f32.vlgmr.msra.gmra.mrb[12].mxu0 %v8335_v14 }
 0x547   : > { %6698 = vmatpush3.bf16.msra.mxu0 %v8206_v6  ;;  %5828 = vmatprep.mubr.f32.mxu0 %v3462_v17  ;;  %v2536_v18 = vsel %vm1180_vm8, %v2534_v27, %v2533_v7  ;;  %v2535_v20 = vsel %vm1180_vm8, %v2533_v7, %v2534_v27 }
 0x548   : > { %5443 = vmatprep.mubr.msk.f32.mxu1 %vm1185_vm9, %v2536_v18  ;;  %6700 = vmatprep.subr.bf16.mxu0 %v8220_v24 }
 0x549   : > { %5444 = vmatmul.mubr.f32.vlgmr.msra.gmra.mrb[6].mxu1 %v2535_v20 }
 0x54a   : > { %6378 = vmatpush3.bf16.msra.mxu1 %v7957_v10  ;;  %5478 = vmatprep.mubr.f32.mxu1 %v8121_v35 }
 0x54b   : > { %6702 = vmatpush3.bf16.msra.mxu0 %v8220_v24  ;;  %6380 = vmatprep.subr.bf16.mxu1 %v8133_v41 }
 0x54c   : > { %6704 = vmatprep.subr.bf16.mxu0 %v8234_v19 }
 0x54e   : > { %6382 = vmatpush3.bf16.msra.mxu1 %v8133_v41 }
 0x54f   : > { %6706 = vmatpush3.bf16.msra.mxu0 %v8234_v19  ;;  %6384 = vmatprep.subr.bf16.mxu1 %v8146_v47 }
 0x550   : > { %6708 = vmatprep.subr.bf16.mxu0 %v8244_v25 }
 0x552   : > { %6386 = vmatpush3.bf16.msra.mxu1 %v8146_v47 }
 0x553   : > { %6710 = vmatpush3.bf16.msra.mxu0 %v8244_v25  ;;  %6388 = vmatprep.subr.bf16.mxu1 %v8156_v49 }
 0x554   : > { %6712 = vmatprep.subr.bf16.mxu0 %v8254_v30 }
 0x556   : > { %6390 = vmatpush3.bf16.msra.mxu1 %v8156_v49 }
 0x557   : > { %6714 = vmatpush3.bf16.msra.mxu0 %v8254_v30  ;;  %6392 = vmatprep.subr.bf16.mxu1 %v8166_v55 }
 0x558   : > { %6716 = vmatprep.subr.bf16.mxu0 %v8264_v34 }
 0x55a   : > { %6394 = vmatpush3.bf16.msra.mxu1 %v8166_v55 }
 0x55b   : > { %6718 = vmatpush3.bf16.msra.mxu0 %v8264_v34  ;;  %6396 = vmatprep.subr.bf16.mxu1 %v8176_v60 }
 0x55c   : > { %6720 = vmatprep.subr.bf16.mxu0 %v8274_v40 }
 0x55e   : > { %6398 = vmatpush3.bf16.msra.mxu1 %v8176_v60 }
 0x55f   : > { %6722 = vmatpush3.bf16.msra.mxu0 %v8274_v40  ;;  %6400 = vmatprep.subr.bf16.mxu1 %v8186_v63 }
 0x560   : > { %6724 = vmatprep.subr.bf16.mxu0 %v8284_v48 }
 0x562   : > { %6402 = vmatpush3.bf16.msra.mxu1 %v8186_v63 }
 0x563   : > { %6726 = vmatpush3.bf16.msra.mxu0 %v8284_v48  ;;  %6404 = vmatprep.subr.bf16.mxu1 %v8196_v2 }
 0x566   : > { %6406 = vmatpush3.bf16.msra.mxu1 %v8196_v2  ;;  %5829 = vmatmul.mubr.msk.f32.vlgmr.msra.gmra.mrb[12].mxu0 %vm1395_vm11, %v3463_v23 }
 0x567   : > { %6408 = vmatprep.subr.bf16.mxu1 %v8206_v6 }
 0x569   : > { %5479 = vmatmul.mubr.f32.vlgmr.msra.gmra.mrb[6].mxu1 %v8135_v42 }
 0x56a   : > { %6410 = vmatpush3.bf16.msra.mxu1 %v8206_v6  ;;  %5513 = vmatprep.mubr.f32.mxu1 %v8218_v22 }
 0x56b   : > { %6412 = vmatprep.subr.bf16.mxu1 %v8220_v24 }
 0x56e   : > { %6414 = vmatpush3.bf16.msra.mxu1 %v8220_v24 }
 0x56f   : > { %6416 = vmatprep.subr.bf16.mxu1 %v8234_v19 }
 0x572   : > { %6418 = vmatpush3.bf16.msra.mxu1 %v8234_v19 }
 0x573   : > { %6420 = vmatprep.subr.bf16.mxu1 %v8244_v25 }
 0x576   : > { %6422 = vmatpush3.bf16.msra.mxu1 %v8244_v25 }
 0x577   : > { %6424 = vmatprep.subr.bf16.mxu1 %v8254_v30 }
 0x57a   : > { %6426 = vmatpush3.bf16.msra.mxu1 %v8254_v30 }
 0x57b   : > { %6428 = vmatprep.subr.bf16.mxu1 %v8264_v34 }
 0x57e   : > { %6430 = vmatpush3.bf16.msra.mxu1 %v8264_v34 }
 0x57f   : > { %6432 = vmatprep.subr.bf16.mxu1 %v8274_v40 }
 0x582   : > { %6434 = vmatpush3.bf16.msra.mxu1 %v8274_v40 }
 0x583   : > { %6436 = vmatprep.subr.bf16.mxu1 %v8284_v48 }
 0x586   : > { %6438 = vmatpush3.bf16.msra.mxu1 %v8284_v48 }
 0x587   : > { %6536 = vmatprep.subr.bf16.mxu1 %v7822_v15 }
 0x589   : > { %5514 = vmatmul.mubr.f32.vlgmr.msra.gmra.mrb[6].mxu1 %v8223_v16 }
 0x58a   : > { %6538 = vmatpush3.bf16.msra.mxu1 %v7822_v15  ;;  %5653 = vmatprep.mubr.f32.mxu1 %v8218_v22  ;;  %v8455_v15 = vld [vmem:[%s8759_s15] ss:$0 sm:$0xff] }
 0x58b   : > { %6540 = vmatprep.subr.bf16.mxu1 %v7836_v21 }
 0x58e   : > { %6542 = vmatpush3.bf16.msra.mxu1 %v7836_v21  ;;  %v3628_v21 = vsub.s32 4, %v7164_v39 }
 0x58f   : > { %6544 = vmatprep.subr.bf16.mxu1 %v7853_v29 }
 0x592   : > { %6546 = vmatpush3.bf16.msra.mxu1 %v7853_v29 }
 0x593   : > { %6548 = vmatprep.subr.bf16.mxu1 %v7869_v36 }
 0x596   : > { %6550 = vmatpush3.bf16.msra.mxu1 %v7869_v36  ;;  %v8461_v36 = vld [vmem:[%s8760_s16] sm:$0x7f] }
 0x597   : > { %6552 = vmatprep.subr.bf16.mxu1 %v7885_v43  ;;  %v8503_v45 = vrot.slane %v8461_v36, %v3616_v26  ;;  %v8526_v1 = vrot.slane %v8461_v36, %v827_v46 }
 0x59a   : > { %6554 = vmatpush3.bf16.msra.mxu1 %v7885_v43  ;;  %v3586_v43 = vsub.s32 1, %v7164_v39 }
 0x59b   : > { %6556 = vmatprep.subr.bf16.mxu1 %v7905_v52 }
 0x59e   : > { %6558 = vmatpush3.bf16.msra.mxu1 %v7905_v52 }
 0x59f   : > { %6560 = vmatprep.subr.bf16.mxu1 %v7916_v58 }
 0x5a2   : > { %6562 = vmatpush3.bf16.msra.mxu1 %v7916_v58 }
 0x5a3   : > { %6564 = vmatprep.subr.bf16.mxu1 %v7935_v3 }
 0x5a6   : > { %6566 = vmatpush3.bf16.msra.mxu1 %v7935_v3 }
 0x5a7   : > { %6568 = vmatprep.subr.bf16.mxu1 %v7957_v10 }
 0x5a9   : > { %5654 = vmatmul.mubr.f32.vlgmr.msra.gmra.mrb[8].mxu1 %v8223_v16 }
 0x5aa   : > { %6570 = vmatpush3.bf16.msra.mxu1 %v7957_v10  ;;  %5688 = vmatprep.mubr.f32.mxu1 %v8292_v62 }
 0x5ab   : > { %6572 = vmatprep.subr.bf16.mxu1 %v8133_v41 }
 0x5ae   : > { %6574 = vmatpush3.bf16.msra.mxu1 %v8133_v41  ;;  %v8469_v41 = vrot.slane %v8461_v36, %v3628_v21 }
 0x5af   : > { %6576 = vmatprep.subr.bf16.mxu1 %v8146_v47 }
 0x5b2   : > { %6578 = vmatpush3.bf16.msra.mxu1 %v8146_v47 }
 0x5b3   : > { %6580 = vmatprep.subr.bf16.mxu1 %v8156_v49 }
 0x5b6   : > { %6582 = vmatpush3.bf16.msra.mxu1 %v8156_v49  ;;  %v8472_v49 = vrot.slane %v8461_v36, %v3586_v43 }
 0x5b7   : > { %6584 = vmatprep.subr.bf16.mxu1 %v8166_v55 }
 0x5ba   : > { %6586 = vmatpush3.bf16.msra.mxu1 %v8166_v55  ;;  %v3604_v55 = vsub.s32 2, %v7164_v39 }
 0x5bb   : > { %6588 = vmatprep.subr.bf16.mxu1 %v8176_v60 }
 0x5be   : > { %6590 = vmatpush3.bf16.msra.mxu1 %v8176_v60  ;;  %v3652_v60 = vsub.s32 6, %v7164_v39 }
 0x5bf   : > { %6592 = vmatprep.subr.bf16.mxu1 %v8186_v63 }
 0x5c0   : > { %v8486_v28 = vrot.slane %v8461_v36, %v3652_v60 }
 0x5c2   : > { %6594 = vmatpush3.bf16.msra.mxu1 %v8186_v63 }
 0x5c3   : > { %6596 = vmatprep.subr.bf16.mxu1 %v8196_v2 }
 0x5c6   : > { %6598 = vmatpush3.bf16.msra.mxu1 %v8196_v2 }
 0x5c7   : > { %6600 = vmatprep.subr.bf16.mxu1 %v8206_v6 }
 0x5c9   : > { %5689 = vmatmul.mubr.f32.vlgmr.msra.gmra.mrb[8].mxu1 %v8295_v0 }
 0x5ca   : > { %6602 = vmatpush3.bf16.msra.mxu1 %v8206_v6  ;;  %5723 = vmatprep.mubr.f32.mxu1 %v8337_v53 }
 0x5cb   : > { %6604 = vmatprep.subr.bf16.mxu1 %v8220_v24 }
 0x5ce   : > { %6606 = vmatpush3.bf16.msra.mxu1 %v8220_v24 }
 0x5cf   : > { %6608 = vmatprep.subr.bf16.mxu1 %v8234_v19 }
 0x5d2   : > { %6610 = vmatpush3.bf16.msra.mxu1 %v8234_v19 }
 0x5d3   : > { %6612 = vmatprep.subr.bf16.mxu1 %v8244_v25 }
 0x5d6   : > { %6614 = vmatpush3.bf16.msra.mxu1 %v8244_v25  ;;  %v8482_v25 = vrot.slane %v8461_v36, %v3604_v55 }
 0x5d7   : > { %6616 = vmatprep.subr.bf16.mxu1 %v8254_v30 }
 0x5d9   : > { %v5620_v29 = vpop.f32.mrb[10].mxu0 }
 0x5da   : > { %v6739_v52 = vadd.f32 %v5620_v29, %v8455_v15  ;;  %6618 = vmatpush3.bf16.msra.mxu1 %v8254_v30  ;;  %v3048_v58 = vpop.f32.mrb[11].mxu0 }
 0x5db   : > { %v6740_v3 = vadd.f32 %v8455_v15, %v3048_v58  ;;  %6620 = vmatprep.subr.bf16.mxu1 %v8264_v34  ;;  %v3640_v58 = vsub.s32 5, %v7164_v39 }
 0x5dc   : > { %vm3060_vm14 = vcmp.ge.f32.partialorder %v6739_v52, 0.0  ;;  %v3062_v10 = vmul.f32 0.1, %v6739_v52 }
 0x5dd   : > { %vm3059_vm15 = vcmp.ge.f32.partialorder %v6740_v3, 0.0  ;;  %v3061_v47 = vmul.f32 0.1, %v6740_v3  ;;  %v8553_v60 = vrot.slane %v8461_v36, %v3640_v58 }
 0x5de   : > { %v3064_v63 = vsel %vm3060_vm14, %v6739_v52, %v3062_v10  ;;  %6622 = vmatpush3.bf16.msra.mxu1 %v8264_v34 }
 0x5df   : > { %v3066_v2 = vadd.f32 %v3064_v63, %v8223_v16  ;;  %v3063_v6 = vsel %vm3059_vm15, %v6740_v3, %v3061_v47  ;;  %6624 = vmatprep.subr.bf16.mxu1 %v8274_v40 }
 0x5e0   : > { %v3065_v24 = vadd.f32 %v3063_v6, %v8218_v22 }
 0x5e1   : > { %v3631_v19 = vmul.f32 %v8469_v41, %v3066_v2  ;;  %v3561_v31 = vrot.slane %v3066_v2, 7  ;;  %v3807_v32 = vrot.slane %v3066_v2, 1  ;;  %v3850_v34 = vmul.f32 %v8472_v49, %v3066_v2 }
 0x5e2   : > { %6626 = vmatpush3.bf16.msra.mxu1 %v8274_v40  ;;  %v3849_v30 = vmul.f32 %v8472_v49, %v3065_v24  ;;  %v3560_v16 = vrot.slane %v3065_v24, 7  ;;  %v3806_v22 = vrot.slane %v3065_v24, 1  ;;  %v3774_v54 = vmul.f32 %v8482_v25, %v3065_v24 }
 0x5e3   : > { %3634 = vadd.xlane.f32.xlu1 %v3631_v19  ;;  %6628 = vmatprep.subr.bf16.mxu1 %v8284_v48  ;;  %v3699_v57 = vmul.f32 %v8503_v45, %v3065_v24  ;;  %v3700_v61 = vmul.f32 %v8503_v45, %v3066_v2  ;;  %v3630_v4 = vmul.f32 %v8469_v41, %v3065_v24 }
 0x5e4   : > { %3851 = vadd.xlane.f32.xlu0 %v3849_v30  ;;  %v3562_v38 = vsel %vm1180_vm8, %v3560_v16, %v3561_v31  ;;  %v3563_v33 = vsel %vm1180_vm8, %v3561_v31, %v3560_v16  ;;  %v8498_v40 = vsel %vm1387_vm10, %v3806_v22, %v3807_v32  ;;  %v3809_v44 = vsel %vm1387_vm10, %v3807_v32, %v3806_v22 }
 0x5e5   : > { %v8509_v50 = vsel %vm1395_vm11, %v3809_v44, 0.0  ;;  %v8513_v51 = vmul.f32 %v8498_v40, %v8486_v28  ;;  %v3571_v5 = vmul.f32 %v8526_v1, %v3562_v38  ;;  %v3564_v8 = vsel %vm1185_vm9, %v3563_v33, 0.0 }
 0x5e6   : > { %6630 = vmatpush3.bf16.msra.mxu1 %v8284_v48  ;;  %v8517_v56 = vmul.f32 %v8509_v50, %v8486_v28  ;;  %v3775_v48 = vmul.f32 %v8482_v25, %v3066_v2  ;;  %v3570_v9 = vmul.f32 %v8526_v1, %v3564_v8  ;;  %v3881_v59 = vmul.f32 %v8498_v40, %v8553_v60 }
 0x5e7   : > { %3853 = vadd.xlane.f32.xlu1 %v3850_v34 }
 0x5e8   : > { %3776 = vadd.xlane.f32.xlu0 %v3774_v54 }
 0x5e9   : > { %5724 = vmatmul.mubr.f32.vlgmr.msra.gmra.mrb[8].mxu1 %v8335_v14 }
 0x5eb   : > { %3778 = vadd.xlane.f32.xlu1 %v3775_v48 }
 0x5ec   : > { %3701 = vadd.xlane.f32.xlu0 %v3699_v57 }
 0x5ef   : > { %3703 = vadd.xlane.f32.xlu1 %v3700_v61 }
 0x5f3   : > { %3632 = vadd.xlane.f32.xlu1 %v3630_v4 }
 0x5f7   : > { %3574 = vadd.xlane.f32.xlu1 %v3571_v5 }
 0x5fb   : > { %3572 = vadd.xlane.f32.xlu1 %v3570_v9 }
 0x639   : > { %v5830_v11 = vpop.f32.mrb[12].mxu0 }
 0x63a   : > { %v6743_v12 = vadd.f32 %v5830_v11, %v8455_v15  ;;  %v3532_v13 = vpop.f32.mrb[13].mxu0 }
 0x63b   : > { %v6744_v27 = vadd.f32 %v8455_v15, %v3532_v13 }
 0x63c   : > { %vm3544_vm0 = vcmp.ge.f32.partialorder %v6743_v12, 0.0  ;;  %v3546_v46 = vmul.f32 0.1, %v6743_v12 }
 0x63d   : > { %vm3543_vm1 = vcmp.ge.f32.partialorder %v6744_v27, 0.0  ;;  %v3545_v7 = vmul.f32 0.1, %v6744_v27 }
 0x63e   : > { %v3548_v17 = vsel %vm3544_vm0, %v6743_v12, %v3546_v46 }
 0x63f   : > { %v3550_v18 = vadd.f32 %v3548_v17, %v8335_v14  ;;  %v3547_v20 = vsel %vm3543_vm1, %v6744_v27, %v3545_v7 }
 0x640   : > { %v3549_v23 = vadd.f32 %v3547_v20, %v8337_v53 }
 0x641   : > { %v3866_v21 = vmul.f32 %v8503_v45, %v3550_v18  ;;  %v3597_v29 = vrot.slane %v3550_v18, 7  ;;  %v8544_v10 = vmul.f32 %v8486_v28, %v3550_v18  ;;  %v3791_v47 = vmul.f32 %v8469_v41, %v3550_v18 }
 0x642   : > { %v3865_v43 = vmul.f32 %v8503_v45, %v3549_v23  ;;  %v3596_v52 = vrot.slane %v3549_v23, 7  ;;  %v8541_v3 = vmul.f32 %v8486_v28, %v3549_v23  ;;  %v3790_v55 = vmul.f32 %v8469_v41, %v3549_v23 }
 0x643   : > { %3869 = vadd.xlane.f32.xlu1 %v3866_v21  ;;  %v3716_v63 = vmul.f32 %v8553_v60, %v3550_v18  ;;  %v3715_v2 = vmul.f32 %v8553_v60, %v3549_v23 }
 0x644   : > { %3867 = vadd.xlane.f32.xlu0 %v3865_v43  ;;  %v3598_v14 = vsel %vm1180_vm8, %v3596_v52, %v3597_v29  ;;  %v3599_v53 = vsel %vm1180_vm8, %v3597_v29, %v3596_v52 }
 0x645   : > { %v3600_v6 = vsel %vm1185_vm9, %v3599_v53, 0.0  ;;  %v3607_v24 = vmul.f32 %v8482_v25, %v3598_v14  ;;  %v3759_v36 = vmul.f32 %v3598_v14, %v8526_v1  ;;  %v3684_v30 = vmul.f32 %v3598_v14, %v8472_v49 }
 0x646   : > { %v3758_v19 = vmul.f32 %v3600_v6, %v8526_v1  ;;  %v3683_v26 = vmul.f32 %v3600_v6, %v8472_v49  ;;  %v3606_v16 = vmul.f32 %v8482_v25, %v3600_v6 }
 0x647   : > { %3794 = vadd.xlane.f32.xlu1 %v3791_v47 }
 0x648   : > { %3792 = vadd.xlane.f32.xlu0 %v3790_v55 }
 0x64b   : > { %3719 = vadd.xlane.f32.xlu1 %v3716_v63 }
 0x64c   : > { %3717 = vadd.xlane.f32.xlu0 %v3715_v2 }
 0x64f   : > { %3610 = vadd.xlane.f32.xlu1 %v3607_v24 }
 0x650   : > { %3760 = vadd.xlane.f32.xlu0 %v3758_v19 }
 0x653   : > { %3762 = vadd.xlane.f32.xlu1 %v3759_v36 }
 0x654   : > { %3685 = vadd.xlane.f32.xlu0 %v3683_v26 }
 0x657   : > { %3687 = vadd.xlane.f32.xlu1 %v3684_v30 }
 0x65b   : > { %3608 = vadd.xlane.f32.xlu1 %v3606_v16 }
 0x65c   : > { %v5515_v31 = vpop.f32.mrb[6].mxu1 }
 0x65d   : > { %v6737_v22 = vadd.f32 %v5515_v31, %v8455_v15  ;;  %v2809_v32 = vpop.f32.mrb[7].mxu1 }
 0x65e   : > { %v6738_v34 = vadd.f32 %v8455_v15, %v2809_v32 }
 0x65f   : > { %vm2821_vm2 = vcmp.ge.f32.partialorder %v6737_v22, 0.0  ;;  %v2823_v38 = vmul.f32 0.1, %v6737_v22 }
 0x660   : > { %vm2820_vm3 = vcmp.ge.f32.partialorder %v6738_v34, 0.0  ;;  %v2822_v33 = vmul.f32 0.1, %v6738_v34 }
 0x661   : > { %v2825_v44 = vsel %vm2821_vm2, %v6737_v22, %v2823_v38 }
 0x662   : > { %v2827_v54 = vadd.f32 %v2825_v44, %v8135_v42  ;;  %v2824_v48 = vsel %vm2820_vm3, %v6738_v34, %v2822_v33 }
 0x663   : > { %v2826_v57 = vadd.f32 %v2824_v48, %v8121_v35 }
 0x664   : > { %v3619_v61 = vmul.f32 %v8503_v45, %v2827_v54  ;;  %v3724_v8 = vrot.slane %v2827_v54, 1  ;;  %v3842_v9 = vmul.f32 %v8526_v1, %v2827_v54  ;;  %v3767_v46 = vmul.f32 %v8472_v49, %v2827_v54 }
 0x665   : > { %v3841_v4 = vmul.f32 %v8526_v1, %v2826_v57  ;;  %v3723_v5 = vrot.slane %v2826_v57, 1  ;;  %v3766_v42 = vmul.f32 %v8472_v49, %v2826_v57  ;;  %v3691_v7 = vmul.f32 %v8482_v25, %v2826_v57 }
 0x666   : > { %3622 = vadd.xlane.f32.xlu1 %v3619_v61  ;;  %v3692_v17 = vmul.f32 %v8482_v25, %v2827_v54  ;;  %v3618_v20 = vmul.f32 %v8503_v45, %v2826_v57 }
 0x667   : > { %3843 = vadd.xlane.f32.xlu0 %v3841_v4  ;;  %v3725_v11 = vsel %vm1387_vm10, %v3723_v5, %v3724_v8  ;;  %v3726_v12 = vsel %vm1387_vm10, %v3724_v8, %v3723_v5 }
 0x668   : > { %v3728_v35 = vsel %vm1395_vm11, %v3726_v12, 0.0  ;;  %v8580_v13 = vmul.f32 %v3725_v11, %v8486_v28  ;;  %v3873_v18 = vmul.f32 %v3725_v11, %v8469_v41  ;;  %v3798_v23 = vmul.f32 %v3725_v11, %v8553_v60 }
 0x669   : > { %v8583_v27 = vmul.f32 %v3728_v35, %v8486_v28  ;;  %v3874_v21 = vmul.f32 %v3728_v35, %v8469_v41  ;;  %v3799_v29 = vmul.f32 %v3728_v35, %v8553_v60 }
 0x66a   : > { %3845 = vadd.xlane.f32.xlu1 %v3842_v9 }
 0x66b   : > { %3768 = vadd.xlane.f32.xlu0 %v3766_v42 }
 0x66e   : > { %3770 = vadd.xlane.f32.xlu1 %v3767_v46 }
 0x66f   : > { %3693 = vadd.xlane.f32.xlu0 %v3691_v7 }
 0x672   : > { %3695 = vadd.xlane.f32.xlu1 %v3692_v17 }
 0x673   : > { %3875 = vadd.xlane.f32.xlu0 %v3873_v18 }
 0x676   : > { %3620 = vadd.xlane.f32.xlu1 %v3618_v20 }
 0x677   : > { %3800 = vadd.xlane.f32.xlu0 %v3798_v23 }
 0x67a   : > { %3877 = vadd.xlane.f32.xlu1 %v3874_v21 }
 0x67e   : > { %3802 = vadd.xlane.f32.xlu1 %v3799_v29 }
 0x6bc   : > { %v5725_v43 = vpop.f32.mrb[8].mxu1 }
 0x6bd   : > { %v6741_v52 = vadd.f32 %v5725_v43, %v8455_v15  ;;  %v3287_v58 = vpop.f32.mrb[9].mxu1 }
 0x6be   : > { %v6742_v14 = vadd.f32 %v8455_v15, %v3287_v58 }
 0x6bf   : > { %vm3299_vm4 = vcmp.ge.f32.partialorder %v6741_v52, 0.0  ;;  %v3301_v53 = vmul.f32 0.1, %v6741_v52 }
 0x6c0   : > { %vm3298_vm5 = vcmp.ge.f32.partialorder %v6742_v14, 0.0  ;;  %v3300_v47 = vmul.f32 0.1, %v6742_v14 }
 0x6c1   : > { %v3303_v55 = vsel %vm3299_vm4, %v6741_v52, %v3301_v53 }
 0x6c2   : > { %v3305_v63 = vadd.f32 %v3303_v55, %v8295_v0  ;;  %v3302_v2 = vsel %vm3298_vm5, %v6742_v14, %v3300_v47 }
 0x6c3   : > { %v3304_v6 = vadd.f32 %v3302_v2, %v8292_v62 }
 0x6c4   : > { %v3858_v24 = vmul.f32 %v8482_v25, %v3305_v63  ;;  %v3579_v19 = vrot.slane %v3305_v63, 7  ;;  %v3890_v16 = vrot.slane %v3305_v63, 1  ;;  %v3783_v15 = vmul.f32 %v8503_v45, %v3305_v63 }
 0x6c5   : > { %v3857_v36 = vmul.f32 %v8482_v25, %v3304_v6  ;;  %v3578_v26 = vrot.slane %v3304_v6, 7  ;;  %v3889_v30 = vrot.slane %v3304_v6, 1  ;;  %v3782_v25 = vmul.f32 %v8503_v45, %v3304_v6 }
 0x6c6   : > { %3861 = vadd.xlane.f32.xlu1 %v3858_v24  ;;  %v3708_v33 = vmul.f32 %v8469_v41, %v3305_v63  ;;  %v3707_v44 = vmul.f32 %v8469_v41, %v3304_v6  ;;  %v3642_v45 = vmul.f32 %v8553_v60, %v3304_v6  ;;  %v8622_v41 = vpop.xlane.xlu1 %3634  ;;  %v3643_v61 = vmul.f32 %v8553_v60, %v3305_v63 }
 0x6c7   : > { %3859 = vadd.xlane.f32.xlu0 %v3857_v36  ;;  %v3581_v31 = vsel %vm1180_vm8, %v3579_v19, %v3578_v26  ;;  %v3580_v0 = vsel %vm1180_vm8, %v3578_v26, %v3579_v19  ;;  %v3891_v62 = vsel %vm1387_vm10, %v3889_v30, %v3890_v16  ;;  %v3892_v22 = vsel %vm1387_vm10, %v3890_v16, %v3889_v30  ;;  %v4319_v30 = vld [vmem:[#allocation4] ss:$0 sm:$0xff] }
 0x6c8   : > { %v3895_v32 = vmul.f32 %v3891_v62, %v8486_v28  ;;  %v3894_v34 = vsel %vm1395_vm11, %v3892_v22, 0.0  ;;  %v3582_v39 = vsel %vm1185_vm9, %v3581_v31, 0.0  ;;  %v3589_v37 = vmul.f32 %v8472_v49, %v3580_v0 }
 0x6c9   : > { %v3896_v38 = vmul.f32 %v3894_v34, %v8486_v28  ;;  %v3588_v54 = vmul.f32 %v8472_v49, %v3582_v39  ;;  %v3675_v48 = vmul.f32 %v3582_v39, %v8526_v1  ;;  %v3676_v28 = vmul.f32 %v3580_v0, %v8526_v1 }
 0x6ca   : > { %3786 = vadd.xlane.f32.xlu1 %v3783_v15  ;;  %v3882_v49 = vmul.f32 %v8509_v50, %v8553_v60  ;;  %v8630_v57 = vpop.xlane.xlu1 %3853  ;;  %vm3664_vm8 = vcmask 7168  }
 0x6cb   : > { %3784 = vadd.xlane.f32.xlu0 %v3782_v25 }
 0x6ce   : > { %3711 = vadd.xlane.f32.xlu1 %v3708_v33  ;;  %v3779_v1 = vpop.xlane.xlu1 %3778 }
 0x6cf   : > { %3709 = vadd.xlane.f32.xlu0 %v3707_v44 }
 0x6d2   : > { %3644 = vadd.xlane.f32.xlu1 %v3642_v45  ;;  %v8635_v40 = vpop.xlane.xlu1 %3703 }
 0x6d3   : > { %3590 = vadd.xlane.f32.xlu0 %v3588_v54 }
 0x6d6   : > { %3592 = vadd.xlane.f32.xlu1 %v3589_v37  ;;  %v8639_v50 = vpop.xlane.xlu1 %3632 }
 0x6d7   : > { %3677 = vadd.xlane.f32.xlu0 %v3675_v48 }
 0x6da   : > { %3679 = vadd.xlane.f32.xlu1 %v3676_v28  ;;  %v3575_v4 = vpop.xlane.xlu1 %3574 }
 0x6db   : > { %3731 = vadd.xlane.f32.xlu0 %v8580_v13 }
 0x6de   : > { %3733 = vadd.xlane.f32.xlu1 %v8583_v27  ;;  %v3573_v5 = vpop.xlane.xlu1 %3572 }
 0x6df   : > { %3883 = vadd.xlane.f32.xlu0 %v3881_v59  ;;  %v3576_v33 = vadd.f32 %v4319_v30, %v3573_v5 }
 0x6e2   : > { %3885 = vadd.xlane.f32.xlu1 %v3882_v49  ;;  %v8641_v8 = vpop.xlane.xlu1 %3869 }
 0x6e3   : > { %3814 = vadd.xlane.f32.xlu0 %v8513_v51 }
 0x6e6   : > { %3816 = vadd.xlane.f32.xlu1 %v8517_v56  ;;  %v8643_v51 = vpop.xlane.xlu1 %3794  ;;  %v3852_v56 = vpop.xlane.xlu0 %3851 }
 0x6e7   : > { %3897 = vadd.xlane.f32.xlu0 %v3895_v32 }
 0x6ea   : > { %3899 = vadd.xlane.f32.xlu1 %v3896_v38  ;;  %v8645_v9 = vpop.xlane.xlu1 %3719  ;;  %v3777_v60 = vpop.xlane.xlu0 %3776 }
 0x6eb   : > { %3646 = vadd.xlane.f32.xlu0 %v3643_v61  ;;  %v3577_v61 = vadd.f32 %v4319_v30, %v3575_v4 }
 0x6ee   : > { %3656 = vadd.xlane.f32.xlu1 %v8541_v3  ;;  %v8647_v11 = vpop.xlane.xlu1 %3610  ;;  %v3702_v12 = vpop.xlane.xlu0 %3701 }
 0x6ef   : > { %3658 = vadd.xlane.f32.xlu0 %v8544_v10 }
 0x6f2   : > { %v3763_v42 = vpop.xlane.xlu1 %3762  ;;  %v3868_v35 = vpop.xlane.xlu0 %3867 }
 0x6f3   : > { %v3765_v16 = vadd.f32 %v4319_v30, %v3763_v42 }
 0x6f6   : > { %v3688_v3 = vpop.xlane.xlu1 %3687  ;;  %v8649_v13 = vpop.xlane.xlu0 %3792 }
 0x6fa   : > { %v3609_v10 = vpop.xlane.xlu1 %3608  ;;  %v8651_v27 = vpop.xlane.xlu0 %3717 }
 0x6fe   : > { %v8653_v46 = vpop.xlane.xlu1 %3622  ;;  %v3761_v7 = vpop.xlane.xlu0 %3760 }
 0x6ff   : > { %v3764_v22 = vadd.f32 %v4319_v30, %v3761_v7 }
 0x702   : > { %v3846_v17 = vpop.xlane.xlu1 %3845  ;;  %v3686_v18 = vpop.xlane.xlu0 %3685 }
 0x703   : > { %v3848_v7 = vadd.f32 %v4319_v30, %v3846_v17 }
 0x706   : > { %v3771_v20 = vpop.xlane.xlu1 %3770  ;;  %v3844_v23 = vpop.xlane.xlu0 %3843 }
 0x707   : > { %v3847_v31 = vadd.f32 %v4319_v30, %v3844_v23  ;;  %v3773_v0 = vadd.f32 %v3771_v20, %v3765_v16 }
 0x709   : > { %v3855_v44 = vadd.f32 %v3852_v56, %v3847_v31  ;;  %v3781_v39 = vadd.f32 %v3779_v1, %v3773_v0 }
 0x70a   : > { %v3696_v21 = vpop.xlane.xlu1 %3695  ;;  %v3769_v29 = vpop.xlane.xlu0 %3768 }
 0x70b   : > { %v3772_v32 = vadd.f32 %v3769_v29, %v3764_v22 }
 0x70d   : > { %v3780_v42 = vadd.f32 %v3777_v60, %v3772_v32 }
 0x70e   : > { %v3621_v43 = vpop.xlane.xlu1 %3620  ;;  %v3694_v52 = vpop.xlane.xlu0 %3693 }
 0x712   : > { %v8655_v58 = vpop.xlane.xlu1 %3877  ;;  %v3876_v14 = vpop.xlane.xlu0 %3875 }
 0x716   : > { %v3803_v53 = vpop.xlane.xlu1 %3802  ;;  %v3801_v47 = vpop.xlane.xlu0 %3800 }
 0x753   : > { %v3862_v55 = vpop.xlane.xlu1 %3861 }
 0x754   : > { %v3860_v63 = vpop.xlane.xlu0 %3859 }
 0x755   : > { %v3863_v48 = vadd.f32 %v3860_v63, %v3855_v44 }
 0x757   : > { %v3787_v2 = vpop.xlane.xlu1 %3786  ;;  %v3871_v22 = vadd.f32 %v3868_v35, %v3863_v48 }
 0x758   : > { %v3785_v6 = vpop.xlane.xlu0 %3784  ;;  %v3789_v28 = vadd.f32 %v3787_v2, %v3781_v39 }
 0x75a   : > { %v3797_v5 = vadd.f32 %v8643_v51, %v3789_v28 }
 0x75b   : > { %v3712_v24 = vpop.xlane.xlu1 %3711 }
 0x75c   : > { %v3710_v19 = vpop.xlane.xlu0 %3709  ;;  %v3805_v35 = vadd.f32 %v3803_v53, %v3797_v5 }
 0x75f   : > { %v8657_v36 = vpop.xlane.xlu1 %3644 }
 0x760   : > { %v3591_v26 = vpop.xlane.xlu0 %3590 }
 0x761   : > { %v3594_v59 = vadd.f32 %v3591_v26, %v3576_v33 }
 0x763   : > { %v3593_v15 = vpop.xlane.xlu1 %3592  ;;  %v3612_v1 = vadd.f32 %v3609_v10, %v3594_v59 }
 0x764   : > { %v3678_v62 = vpop.xlane.xlu0 %3677  ;;  %v3595_v29 = vadd.f32 %v3593_v15, %v3577_v61 }
 0x765   : > { %v3681_v25 = vadd.f32 %v4319_v30, %v3678_v62  ;;  %v3788_v62 = vadd.f32 %v3785_v6, %v3780_v42  ;;  %v3624_v17 = vadd.f32 %v3621_v43, %v3612_v1 }
 0x766   : > { %v3613_v60 = vadd.f32 %v8647_v11, %v3595_v29 }
 0x767   : > { %v3689_v34 = vadd.f32 %v3686_v18, %v3681_v25  ;;  %v3680_v38 = vpop.xlane.xlu1 %3679  ;;  %v3796_v4 = vadd.f32 %v8649_v13, %v3788_v62  ;;  %v3636_v11 = vadd.f32 %v8639_v50, %v3624_v17 }
 0x768   : > { %v3682_v45 = vadd.f32 %v4319_v30, %v3680_v38  ;;  %v3732_v54 = vpop.xlane.xlu0 %3731 }
 0x769   : > { %v3697_v37 = vadd.f32 %v3694_v52, %v3689_v34  ;;  %v3804_v31 = vadd.f32 %v3801_v47, %v3796_v4  ;;  %v3648_v0 = vadd.f32 %v8657_v36, %v3636_v11 }
 0x76a   : > { %v3690_v49 = vadd.f32 %v3688_v3, %v3682_v45  ;;  %v3856_v3 = vadd.f32 %v8630_v57, %v3848_v7  ;;  %v3625_v57 = vadd.f32 %v8653_v46, %v3613_v60 }
 0x76b   : > { %v3734_v23 = vpop.xlane.xlu1 %3733  ;;  %v3705_v18 = vadd.f32 %v3702_v12, %v3697_v37  ;;  %v3879_v12 = vadd.f32 %v3876_v14, %v3871_v22 }
 0x76c   : > { %v3698_v20 = vadd.f32 %v3696_v21, %v3690_v49  ;;  %v3884_v16 = vpop.xlane.xlu0 %3883  ;;  %v3864_v26 = vadd.f32 %v3862_v55, %v3856_v3 }
 0x76d   : > { %v3713_v21 = vadd.f32 %v3710_v19, %v3705_v18  ;;  %v3887_v30 = vadd.f32 %v3884_v16, %v3879_v12  ;;  %v3637_v19 = vadd.f32 %v8622_v41, %v3625_v57 }
 0x76e   : > { %v3706_v56 = vadd.f32 %v8635_v40, %v3698_v20  ;;  %v3872_v43 = vadd.f32 %v8641_v8, %v3864_v26 }
 0x76f   : > { %v3886_v52 = vpop.xlane.xlu1 %3885 }
 0x770   : > { %v3714_v63 = vadd.f32 %v3712_v24, %v3706_v56  ;;  %v3815_v2 = vpop.xlane.xlu0 %3814  ;;  %v3721_v24 = vadd.f32 %v8651_v27, %v3713_v21  ;;  %v3880_v27 = vadd.f32 %v8655_v58, %v3872_v43 }
 0x772   : > { %v3722_v6 = vadd.f32 %v8645_v9, %v3714_v63  ;;  %v3818_v9 = vadd.f32 %v3815_v2, %v3804_v31  ;;  %v3735_v55 = vadd.f32 %v3732_v54, %v3721_v24  ;;  %v3888_v8 = vadd.f32 %v3886_v52, %v3880_v27 }
 0x773   : > { %v3817_v51 = vpop.xlane.xlu1 %3816 }
 0x774   : > { %v3736_v10 = vadd.f32 %v3734_v23, %v3722_v6  ;;  %v3819_v40 = vadd.f32 %v3817_v51, %v3805_v35  ;;  %v3898_v15 = vpop.xlane.xlu0 %3897 }
 0x775   : > { %v3901_v13 = vadd.f32 %v3898_v15, %v3887_v30 }
 0x776   : > { %6830 = vtanh.f32 %v3736_v10 }
 0x777   : > { %6832 = vtanh.f32 %v3819_v40  ;;  %v3900_v14 = vpop.xlane.xlu1 %3899 }
 0x778   : > { %v3647_v53 = vpop.xlane.xlu0 %3646  ;;  %6834 = vtanh.f32 %v3901_v13  ;;  %v3902_v34 = vadd.f32 %v3900_v14, %v3888_v8 }
 0x779   : > { %6836 = vtanh.f32 %v3818_v9  ;;  %v3649_v46 = vadd.f32 %v3647_v53, %v3637_v19 }
 0x77a   : > { %6838 = vtanh.f32 %v3735_v55 }
 0x77b   : > { %v3657_v47 = vpop.xlane.xlu1 %3656 }
 0x77c   : > { %v3660_v50 = vadd.f32 %v3657_v47, %v3648_v0  ;;  %v3659_v25 = vpop.xlane.xlu0 %3658 }
 0x77d   : > { %v3661_v32 = vadd.f32 %v3659_v25, %v3649_v46 }
 0x77e   : > { %6840 = vtanh.f32 %v3660_v50 }
 0x77f   : > { %6842 = vtanh.f32 %v3661_v32 }
 0x780   : > { %v6831_v41 = vpop.eup %6830  ;;  %6844 = vtanh.f32 %v3902_v34 }
 0x781   : > { %v6833_v38 = vpop.eup %6832  ;;  %3743 = vrot.lane.b32.xlu0 %v6831_v41, %s6928_s17 }
 0x782   : > { %3826 = vrot.lane.b32.xlu1 %v6833_v38, %s6929_s26  ;;  %v6835_v58 = vpop.eup %6834 }
 0x783   : > { %v6837_v36 = vpop.eup %6836 }
 0x784   : > { %v6839_v33 = vpop.eup %6838 }
 0x785   : > { %3907 = vrot.lane.b32.xlu0 %v6835_v58, %s6930_s22 }
 0x786   : > { %3824 = vrot.lane.b32.xlu1 %v6837_v36, %s6929_s26 }
 0x787   : > { %6871 = shalt.err (!%p6868_p9)
}
 0x788   : > { %s6872_s1 = scalar_lea.hbm %s8678_s5, 256  ;;  %s6876_s13 = scalar_lea.hbm %s8761_s18, 512 }
 0x789   : > { %p6873_p12 = scmp.ne.s32.totalorder %s8678_s5, %s6872_s1  ;;  %p6877_p1 = scmp.lt.u32.totalorder %s8678_s5, %s8761_s18 }
 0x78a   : > { %p6878_p2 = scmp.lt.u32.totalorder %s6876_s13, %s6872_s1  ;;  %p6880_p4 = scmp.lt.u32.totalorder %s6872_s1, %s8678_s5 }
 0x78b   : > { %p6874_p13 = pnand %p6873_p12, %p7078_p10 }
 0x78c   : > { %p6879_p3 = por %p6878_p2, %p6877_p1 }
 0x78d   : > { %p6875_p0 = pneg %p6874_p13 }
 0x78e   : > { %p6881_p5 = por %p6880_p4, %p6879_p3 }
 0x790   : > { %p6882_p6 = pnand %p6881_p5, %p6875_p0 }
 0x792   : > { %6885 = shalt.err (!%p6882_p6)
}
 0x793   : > { %s6932_s20 = smov 128   ;;  %s6933_s30 = smov 8   ;;  %v6841_v44 = vpop.eup %6840  ;;  %3741 = vrot.lane.b32.xlu1 %v6839_v33, %s6928_s17  ;;  %vm3747_vm9 = vcmask 15368   ;;  %vm3830_vm10 = vcmask 23568   ;;  %vm3913_vm11 = vcmask 31768  }
 0x794   : > { %6781 = dma.vmem_to_hbm [thread:$0]  (%p7078_p10), %s8680_s29, 256, %s8678_s5, %s8691_s27, %s6932_s20, %s6932_s20, %s6933_s30   ;;  %v6843_v39 = vpop.eup %6842 }
 0x795   : > { %3665 = vst.msk [vmem:[%s8687_s2] sm:$0xff] %vm3664_vm8, %v6841_v44  ;;  %3666 = vst.msk [vmem:[%s8687_s2 + $0x8] sm:$0xff] %vm3664_vm8, %v6843_v39  ;;  %v6845_v45 = vpop.eup %6844 }
 0x797   : > { %3909 = vrot.lane.b32.xlu1 %v6845_v45, %s6930_s22 }
 0x7f3   : > { %v3744_v54 = vpop.permute.xlu0 %3743 }
 0x7f4   : > { %3749 = vst.msk [vmem:[%s8687_s2 + $0x8] sm:$0xff] %vm3747_vm9, %v3744_v54  ;;  %v3827_v37 = vpop.permute.xlu1 %3826 }
 0x7f5   : > { %3832 = vst.msk [vmem:[%s8687_s2 + $0x8] sm:$0xff] %vm3830_vm10, %v3827_v37 }
 0x7f7   : > { %v3908_v59 = vpop.permute.xlu0 %3907 }
 0x7f8   : > { %v3825_v48 = vpop.permute.xlu1 %3824 }
 0x805   : > { %v3742_v28 = vpop.permute.xlu1 %3741 }
 0x806   : > { %3748 = vst.msk [vmem:[%s8687_s2] sm:$0xff] %vm3747_vm9, %v3742_v28 }
 0x807   : > { %3831 = vst.msk [vmem:[%s8687_s2] sm:$0xff] %vm3830_vm10, %v3825_v48 }
 0x808   : > { %3914 = vst.msk [vmem:[%s8687_s2] sm:$0xff] %vm3913_vm11, %v3908_v59 }
 0x809   : > { %v3910_v49 = vpop.permute.xlu1 %3909 }
 0x80a   : > { %3915 = vst.msk [vmem:[%s8687_s2 + $0x8] sm:$0xff] %vm3913_vm11, %v3910_v49 }
 0x80b PF: > { %p6787_p10 = scmp.ge.s32.totalorder %s6922_s25, 2  ;;  %s3953_s17 = sand.u32 1, %s6910_s23  }
 0x80c   : > { %s3954_s29 = scalar_lea.sflag [#allocation6], %s3953_s17 }
 0x80d   : > { %p6784_p7 = pnand %p6787_p10, %p7082_p11 }
 0x80f   : > { %6905 = dma.done.wait (!%p6784_p7), %s3954_s29, 256  }
 0x810   : > { %6907 = vsyncadd (!%p6784_p7), %s3954_s29, 4294967040  ;;  %s8789_s25 = sld [smem:[#allocation10_spill]]  ;;  %s8790_s5 = sld [smem:[#allocation9_spill]] }
 0x811   : > { %s8791_s17 = sld [smem:[#allocation11_spill]]  ;;  %s8792_s23 = smov %s6914_s24 }
 0x816   : > { %p38_p8 = scmp.ge.s32.totalorder %s8789_s25, 4   ;;  %s8793_s24 = smov %s8790_s5 }
 0x818   :  { %40 = sbr.rel (!%p38_p8) target bundleno = 25 (0x19), region = 156 }
 0x81f   :  { %3967 = vsyncpa [#allocation6], 1 }
 0x820   :  { %3969 = vsyncpa [#allocation6 + $0x1], 1 }

</bundles_post_ra>
